<compile_context>
chip_gen: v7x
topology: tpu7x:2x2x1
jax: 0.10.0
libtpu: 0.0.40
codegen_flags: <defaults>
</compile_context>

<pallas_src>
import math

import jax
import jax.numpy as jnp
from jax.experimental import pallas as pl
from jax.experimental.pallas import tpu as pltpu

BN_EPS = 1e-5      # python-float constants only: module-level jnp arrays would be
RATIO = 0.8        # captured as jaxpr consts by the kernel (trace-time error)
NEG = -1e30        # finite masked-max sentinel (avoids -inf -> NaN hazard)
NUM_LAYERS = 3
HIDDEN = 64
OUT_PAD = 128      # lane-dense padded output width; sliced back in the wrapper


# ----------------------------------------------------------------------------
# Fused forward kernel (single gridless pallas_call, everything VMEM-resident)
# ----------------------------------------------------------------------------
def fused_gcn_forward_kernel(x_ref, adj_ref, oh_ref, oht_ref,
                             w0_ref, w1_ref, w2_ref, small_ref,
                             mlp_w_ref, mlp_b_ref, out_ref, rmax_ref):
    f32 = jnp.float32
    n = x_ref.shape[0]
    g = oh_ref.shape[0]
    h = w0_ref.shape[1]

    x = x_ref[...]          # [N, Cin] -> [N, H] after layer 1
    a0 = adj_ref[...]       # [N, N] original adjacency (cumulative mask == filter_adj)
    oh = oh_ref[...]        # [G, N]
    oht = oht_ref[...]      # [N, G]
    small = small_ref[...]  # [12, H]  rows per layer: conv bias, gamma, beta, topk p

    row_ids = jax.lax.broadcasted_iota(jnp.int32, (n, n), 0)
    col_ids = jax.lax.broadcasted_iota(jnp.int32, (n, n), 1)

    dn_t = (((1,), (1,)), ((), ()))   # "A @ B^T": contract last dims (attention-style)

    mask = jnp.ones((n, 1), f32)      # live-node indicator (column orientation)
    r_mean = jnp.zeros((g, h), f32)   # accumulated mean-pool readout
    rmax_ref[...] = jnp.zeros((g, h), f32)  # accumulated max-pool readout (scratch)

    w_refs = (w0_ref, w1_ref, w2_ref)
    for layer in range(NUM_LAYERS):
        w = w_refs[layer][...]
        b = small[4 * layer + 0:4 * layer + 1, :]       # [1, H]
        gamma = small[4 * layer + 1:4 * layer + 2, :]   # [1, H]
        beta = small[4 * layer + 2:4 * layer + 3, :]    # [1, H]
        p = small[4 * layer + 3:4 * layer + 4, :]       # [1, H]

        # ---- GCNConv: D^{-1/2}(A_eff + I_live)D^{-1/2} X W + b, diagonal-free ----
        # A_eff = diag(mask) A0 diag(mask);  deg = mask * (A0 @ mask + 1)
        deg = mask * (jnp.dot(a0, mask, preferred_element_type=f32) + 1.0)   # [N,1]
        dinv = jnp.where(deg > 0.0, jax.lax.rsqrt(deg), 0.0)                 # [N,1]
        z = jnp.dot(x, w, preferred_element_type=f32)                        # [N,H]
        agg = jnp.dot(a0, dinv * z, preferred_element_type=f32)              # [N,H]
        y = (dinv * (agg + dinv * z) + b) * mask

        # ---- BatchNorm1d (training-mode batch stats over live nodes) + ReLU ----
        # TODO(synk): running-stats (eval mode) BatchNorm not implemented.
        n_valid = jnp.maximum(jnp.sum(mask, axis=0, keepdims=True), 1.0)     # [1,1]
        inv_nv = pl.reciprocal(n_valid, approx=True)
        mu = jnp.sum(y, axis=0, keepdims=True) * inv_nv                      # [1,H]
        var = jnp.sum(((y - mu) ** 2) * mask, axis=0, keepdims=True) * inv_nv
        y_hat = (y - mu) * jax.lax.rsqrt(var + BN_EPS)
        x = jnp.maximum(gamma * y_hat + beta, 0.0) * mask

        # ---- TopKPooling(ratio=0.8): score = tanh(x.p/||p||), keep top-k/graph ----
        inv_pn = jax.lax.rsqrt(jnp.sum(p * p, axis=1, keepdims=True) + 1e-24)
        s_col = jnp.tanh(
            jax.lax.dot_general(x, p, dn_t, preferred_element_type=f32) * inv_pn)  # [N,1]
        s_row = jnp.tanh(
            jax.lax.dot_general(p, x, dn_t, preferred_element_type=f32) * inv_pn)  # [1,N]

        # same-graph AND both-endpoints-live indicator, via one tiny MXU matmul
        lm = oht * mask                                                       # [N,G]
        same_live = jax.lax.dot_general(lm, lm, dn_t, preferred_element_type=f32)  # [N,N]

        counts = jnp.dot(oh, mask, preferred_element_type=f32)               # [G,1]
        k = jnp.ceil(RATIO * counts)                                         # [G,1]
        k_col = jnp.dot(oht, k, preferred_element_type=f32)                  # [N,1]

        # beats[i,j] = 1 if live node j (same graph) outranks node i
        # (tie-break: lower index wins; diagonal excluded explicitly)
        beats = ((same_live > 0.5) & (col_ids != row_ids) &
                 ((s_row > s_col) | ((s_row == s_col) & (col_ids < row_ids))))
        rank = jnp.sum(beats.astype(f32), axis=1, keepdims=True)             # [N,1]
        keep = jnp.where((mask > 0.5) & (rank < k_col), 1.0, 0.0)            # [N,1]

        x = x * (s_col * keep)        # x[perm] * tanh(score[perm]); dropped rows -> 0
        mask = keep

        # ---- readout: global_mean_pool || global_max_pool over surviving nodes ----
        counts_v = jnp.dot(oh, mask, preferred_element_type=f32)             # [G,1]
        inv_c = pl.reciprocal(jnp.maximum(counts_v, 1.0), approx=True)
        sums = jnp.dot(oh, x, preferred_element_type=f32)                    # [G,H]
        r_mean = r_mean + sums * inv_c
        for gi in range(g):  # G tiny & static; masked max per graph, row-store
            member = oht[:, gi:gi + 1] * mask                                # [N,1]
            mg = jnp.max(jnp.where(member > 0.5, x, NEG), axis=0, keepdims=True)  # [1,H]
            mg = jnp.where(counts_v[gi:gi + 1, :] > 0.5, mg, 0.0)            # empty guard
            rmax_ref[gi:gi + 1, :] = rmax_ref[gi:gi + 1, :] + mg

    # ---- MLP([2H, out]) == single Linear; concat [mean || max] split over W rows ----
    mlp_w = mlp_w_ref[...]                                                   # [2H, OUT_PAD]
    out = (jnp.dot(r_mean, mlp_w[0:h, :], preferred_element_type=f32)
           + jnp.dot(rmax_ref[...], mlp_w[h:2 * h, :], preferred_element_type=f32)
           + mlp_b_ref[...])
    out_ref[...] = out


def _vmem_spec():
    return pl.BlockSpec(memory_space=pltpu.MemorySpace.VMEM)


@jax.jit
def forward_padded(x, adj, batch_oh, params):
    """Returns [G, OUT_PAD] (lane-dense); caller slices [:, :out_dim]."""
    g = batch_oh.shape[0]
    oht = jnp.transpose(batch_oh)   # wrapper-side layout plumbing, not kernel work
    args = (x, adj, batch_oh, oht,
            params["w0"], params["w1"], params["w2"], params["small"],
            params["mlp_w"], params["mlp_b"])
    return pl.pallas_call(
        fused_gcn_forward_kernel,
        in_specs=[_vmem_spec() for _ in args],
        out_specs=_vmem_spec(),
        out_shape=jax.ShapeDtypeStruct((g, OUT_PAD), jnp.float32),
        scratch_shapes=[pltpu.VMEM((g, HIDDEN), jnp.float32)],
    )(*args)


# ----------------------------------------------------------------------------
# Parameter init (glorot weights; BN gamma=1, beta=0; biases 0)
# TODO(synk): exact torch.manual_seed(8161) parameter values are not reproducible
#             in JAX; structure/init distributions match instead.
# ----------------------------------------------------------------------------
def init_params(key, in_dim, out_dim, hidden=HIDDEN):
    ks = jax.random.split(key, 8)

    def glorot(k, shape):
        lim = math.sqrt(6.0 / (shape[0] + shape[1]))
        return jax.random.uniform(k, shape, jnp.float32, -lim, lim)

    params = {}
    dims = [in_dim, hidden, hidden, hidden]
    small_rows = []
    for layer in range(NUM_LAYERS):
        params[f"w{layer}"] = glorot(ks[2 * layer], (dims[layer], hidden))
        small_rows += [
            jnp.zeros((1, hidden), jnp.float32),     # conv bias
            jnp.ones((1, hidden), jnp.float32),      # BN gamma
            jnp.zeros((1, hidden), jnp.float32),     # BN beta
            glorot(ks[2 * layer + 1], (1, hidden)),  # TopK projection p
        ]
    params["small"] = jnp.concatenate(small_rows, axis=0)            # [12, hidden]
    mlp_w = glorot(ks[6], (2 * hidden, out_dim))
    params["mlp_w"] = jnp.pad(mlp_w, ((0, 0), (0, OUT_PAD - out_dim)))  # lane-dense pad
    params["mlp_b"] = jnp.zeros((1, OUT_PAD), jnp.float32)
    return params


# ----------------------------------------------------------------------------
if __name__ == "__main__":
    key = jax.random.PRNGKey(0)
    k_x, k_adj, k_par = jax.random.split(key, 3)

    in_dim, out_dim = 16, 8
    num_graphs, nodes_per_graph = 2, 16
    n = num_graphs * nodes_per_graph

    x = jax.random.normal(k_x, (n, in_dim), jnp.float32)
    batch = jnp.repeat(jnp.arange(num_graphs, dtype=jnp.int32), nodes_per_graph)

    # deterministic random undirected adjacency, edges only within each graph
    prob = jax.random.uniform(k_adj, (n, n))
    same_graph = batch[:, None] == batch[None, :]
    adj = ((prob < 0.25) & same_graph).astype(jnp.float32)
    adj = jnp.clip(adj + adj.T, 0.0, 1.0)
    adj = adj * (1.0 - jnp.eye(n, dtype=jnp.float32))

    batch_oh = (jnp.arange(num_graphs)[:, None] == batch[None, :]).astype(jnp.float32)

    params = init_params(k_par, in_dim, out_dim)

    out_pad = forward_padded(x, adj, batch_oh, params)
    out = jax.block_until_ready(out_pad[:, :out_dim])
    assert out.shape == (num_graphs, out_dim)
    assert bool(jnp.all(jnp.isfinite(out)))
    print("KERNEL_OK")
</pallas_src>

<mosaic_0001>
module attributes {stable_mosaic.version = 11 : i64} {
  func.func @fused_gcn_forward_kernel(%arg0: memref<32x16xf32, #tpu.memory_space<vmem>>, %arg1: memref<32x32xf32, #tpu.memory_space<vmem>>, %arg2: memref<2x32xf32, #tpu.memory_space<vmem>>, %arg3: memref<32x2xf32, #tpu.memory_space<vmem>>, %arg4: memref<16x64xf32, #tpu.memory_space<vmem>>, %arg5: memref<64x64xf32, #tpu.memory_space<vmem>>, %arg6: memref<64x64xf32, #tpu.memory_space<vmem>>, %arg7: memref<12x64xf32, #tpu.memory_space<vmem>>, %arg8: memref<128x128xf32, #tpu.memory_space<vmem>>, %arg9: memref<1x128xf32, #tpu.memory_space<vmem>>, %arg10: memref<2x128xf32, #tpu.memory_space<vmem>>, %arg11: memref<2x64xf32, #tpu.memory_space<vmem>>) attributes {dimension_semantics = [], scalar_prefetch = 0 : i64, scratch_operands = 1 : i64, tpu.core_type = #tpu.core_type<tc>} {
    %c0 = arith.constant 0 : index
    %c0_0 = arith.constant 0 : index
    %0 = vector.load %arg0[%c0, %c0_0] : memref<32x16xf32, #tpu.memory_space<vmem>>, vector<32x16xf32>
    %c0_1 = arith.constant 0 : index
    %c0_2 = arith.constant 0 : index
    %1 = vector.load %arg1[%c0_1, %c0_2] : memref<32x32xf32, #tpu.memory_space<vmem>>, vector<32x32xf32>
    %c0_3 = arith.constant 0 : index
    %c0_4 = arith.constant 0 : index
    %2 = vector.load %arg2[%c0_3, %c0_4] : memref<2x32xf32, #tpu.memory_space<vmem>>, vector<2x32xf32>
    %c0_5 = arith.constant 0 : index
    %c0_6 = arith.constant 0 : index
    %3 = vector.load %arg3[%c0_5, %c0_6] : memref<32x2xf32, #tpu.memory_space<vmem>>, vector<32x2xf32>
    %c0_7 = arith.constant 0 : index
    %c0_8 = arith.constant 0 : index
    %4 = vector.load %arg7[%c0_7, %c0_8] : memref<12x64xf32, #tpu.memory_space<vmem>>, vector<12x64xf32>
    %5 = tpu.iota {dimensions = array<i32: 0>} : vector<32x32xi32>
    %6 = tpu.iota {dimensions = array<i32: 1>} : vector<32x32xi32>
    %cst = arith.constant 1.000000e+00 : f32
    %7 = vector.broadcast %cst : f32 to vector<32x1xf32>
    %cst_9 = arith.constant 0.000000e+00 : f32
    %8 = vector.broadcast %cst_9 : f32 to vector<2x64xf32>
    %cst_10 = arith.constant 0.000000e+00 : f32
    %9 = vector.broadcast %cst_10 : f32 to vector<2x64xf32>
    %c0_11 = arith.constant 0 : index
    %c0_12 = arith.constant 0 : index
    %10 = vector.load %arg11[%c0_11, %c0_12] : memref<2x64xf32, #tpu.memory_space<vmem>>, vector<2x64xf32>
    tpu.vector_store %arg11[%c0_11, %c0_12], %9 {strides = array<i32>} : memref<2x64xf32, #tpu.memory_space<vmem>>, vector<2x64xf32>,
    %c0_13 = arith.constant 0 : index
    %c0_14 = arith.constant 0 : index
    %11 = vector.load %arg4[%c0_13, %c0_14] : memref<16x64xf32, #tpu.memory_space<vmem>>, vector<16x64xf32>
    %12 = vector.extract_strided_slice %4 {offsets = [0, 0], sizes = [1, 64], strides = [1, 1]} : vector<12x64xf32> to vector<1x64xf32>
    %13 = vector.extract_strided_slice %4 {offsets = [1, 0], sizes = [1, 64], strides = [1, 1]} : vector<12x64xf32> to vector<1x64xf32>
    %14 = vector.extract_strided_slice %4 {offsets = [2, 0], sizes = [1, 64], strides = [1, 1]} : vector<12x64xf32> to vector<1x64xf32>
    %15 = vector.extract_strided_slice %4 {offsets = [3, 0], sizes = [1, 64], strides = [1, 1]} : vector<12x64xf32> to vector<1x64xf32>
    %cst_15 = arith.constant dense<0.000000e+00> : vector<32x1xf32>
    %16 = tpu.matmul %1, %7, %cst_15 {dimension_numbers = #tpu.dot_dimension_numbers<[1], [0], [0], [1], [0, 0, 1, 1], [], []>} : vector<32x32xf32>, vector<32x1xf32>, vector<32x1xf32> -> vector<32x1xf32>
    %cst_16 = arith.constant 1.000000e+00 : f32
    %17 = vector.broadcast %cst_16 : f32 to vector<32x1xf32>
    %18 = arith.addf %16, %17 : vector<32x1xf32>
    %19 = arith.mulf %7, %18 : vector<32x1xf32>
    %cst_17 = arith.constant 0.000000e+00 : f32
    %20 = vector.broadcast %cst_17 : f32 to vector<32x1xf32>
    %21 = arith.cmpf ogt, %19, %20 : vector<32x1xf32>
    %22 = math.rsqrt %19 : vector<32x1xf32>
    %cst_18 = arith.constant 0.000000e+00 : f32
    %23 = vector.broadcast %cst_18 : f32 to vector<32x1xf32>
    %24 = arith.select %21, %22, %23 : vector<32x1xi1>, vector<32x1xf32>
    %cst_19 = arith.constant dense<0.000000e+00> : vector<32x64xf32>
    %25 = tpu.matmul %0, %11, %cst_19 {dimension_numbers = #tpu.dot_dimension_numbers<[1], [0], [0], [1], [0, 0, 1, 1], [], []>} : vector<32x16xf32>, vector<16x64xf32>, vector<32x64xf32> -> vector<32x64xf32>
    %26 = vector.broadcast %24 : vector<32x1xf32> to vector<32x64xf32>
    %27 = arith.mulf %26, %25 : vector<32x64xf32>
    %cst_20 = arith.constant dense<0.000000e+00> : vector<32x64xf32>
    %28 = tpu.matmul %1, %27, %cst_20 {dimension_numbers = #tpu.dot_dimension_numbers<[1], [0], [0], [1], [0, 0, 1, 1], [], []>} : vector<32x32xf32>, vector<32x64xf32>, vector<32x64xf32> -> vector<32x64xf32>
    %29 = vector.broadcast %24 : vector<32x1xf32> to vector<32x64xf32>
    %30 = arith.mulf %29, %25 : vector<32x64xf32>
    %31 = arith.addf %28, %30 : vector<32x64xf32>
    %32 = vector.broadcast %24 : vector<32x1xf32> to vector<32x64xf32>
    %33 = arith.mulf %32, %31 : vector<32x64xf32>
    %34 = vector.broadcast %12 : vector<1x64xf32> to vector<32x64xf32>
    %35 = arith.addf %33, %34 : vector<32x64xf32>
    %36 = vector.broadcast %7 : vector<32x1xf32> to vector<32x64xf32>
    %37 = arith.mulf %35, %36 : vector<32x64xf32>
    %cst_21 = arith.constant dense<0.000000e+00> : vector<1xf32>
    %38 = vector.multi_reduction <add>, %7, %cst_21 [0] : vector<32x1xf32> to vector<1xf32>
    %39 = vector.shape_cast %38 : vector<1xf32> to vector<1x1xf32>
    %cst_22 = arith.constant 1.000000e+00 : f32
    %40 = vector.broadcast %cst_22 : f32 to vector<1x1xf32>
    %41 = arith.maximumf %39, %40 : vector<1x1xf32>
    %42 = tpu.reciprocal %41 {approx = true} : vector<1x1xf32> -> vector<1x1xf32>
    %cst_23 = arith.constant dense<0.000000e+00> : vector<64xf32>
    %43 = vector.multi_reduction <add>, %37, %cst_23 [0] : vector<32x64xf32> to vector<64xf32>
    %44 = vector.shape_cast %43 : vector<64xf32> to vector<1x64xf32>
    %45 = vector.broadcast %42 : vector<1x1xf32> to vector<1x64xf32>
    %46 = arith.mulf %44, %45 : vector<1x64xf32>
    %47 = vector.broadcast %46 : vector<1x64xf32> to vector<32x64xf32>
    %48 = arith.subf %37, %47 : vector<32x64xf32>
    %49 = arith.mulf %48, %48 : vector<32x64xf32>
    %50 = vector.broadcast %7 : vector<32x1xf32> to vector<32x64xf32>
    %51 = arith.mulf %49, %50 : vector<32x64xf32>
    %cst_24 = arith.constant dense<0.000000e+00> : vector<64xf32>
    %52 = vector.multi_reduction <add>, %51, %cst_24 [0] : vector<32x64xf32> to vector<64xf32>
    %53 = vector.shape_cast %52 : vector<64xf32> to vector<1x64xf32>
    %54 = vector.broadcast %42 : vector<1x1xf32> to vector<1x64xf32>
    %55 = arith.mulf %53, %54 : vector<1x64xf32>
    %56 = vector.broadcast %46 : vector<1x64xf32> to vector<32x64xf32>
    %57 = arith.subf %37, %56 : vector<32x64xf32>
    %cst_25 = arith.constant 9.99999974E-6 : f32
    %58 = vector.broadcast %cst_25 : f32 to vector<1x64xf32>
    %59 = arith.addf %55, %58 : vector<1x64xf32>
    %60 = math.rsqrt %59 : vector<1x64xf32>
    %61 = vector.broadcast %60 : vector<1x64xf32> to vector<32x64xf32>
    %62 = arith.mulf %57, %61 : vector<32x64xf32>
    %63 = vector.broadcast %13 : vector<1x64xf32> to vector<32x64xf32>
    %64 = arith.mulf %63, %62 : vector<32x64xf32>
    %65 = vector.broadcast %14 : vector<1x64xf32> to vector<32x64xf32>
    %66 = arith.addf %64, %65 : vector<32x64xf32>
    %cst_26 = arith.constant 0.000000e+00 : f32
    %67 = vector.broadcast %cst_26 : f32 to vector<32x64xf32>
    %68 = arith.maximumf %66, %67 : vector<32x64xf32>
    %69 = vector.broadcast %7 : vector<32x1xf32> to vector<32x64xf32>
    %70 = arith.mulf %68, %69 : vector<32x64xf32>
    %71 = arith.mulf %15, %15 : vector<1x64xf32>
    %cst_27 = arith.constant dense<0.000000e+00> : vector<1xf32>
    %72 = vector.multi_reduction <add>, %71, %cst_27 [1] : vector<1x64xf32> to vector<1xf32>
    %73 = vector.shape_cast %72 : vector<1xf32> to vector<1x1xf32>
    %cst_28 = arith.constant 1.000000e-24 : f32
    %74 = vector.broadcast %cst_28 : f32 to vector<1x1xf32>
    %75 = arith.addf %73, %74 : vector<1x1xf32>
    %76 = math.rsqrt %75 : vector<1x1xf32>
    %cst_29 = arith.constant dense<0.000000e+00> : vector<32x1xf32>
    %77 = tpu.matmul %70, %15, %cst_29 {dimension_numbers = #tpu.dot_dimension_numbers<[1], [1], [0], [0], [0, 0, 1, 0], [], []>} : vector<32x64xf32>, vector<1x64xf32>, vector<32x1xf32> -> vector<32x1xf32>
    %78 = vector.broadcast %76 : vector<1x1xf32> to vector<32x1xf32>
    %79 = arith.mulf %77, %78 : vector<32x1xf32>
    %80 = math.tanh %79 : vector<32x1xf32>
    %cst_30 = arith.constant dense<0.000000e+00> : vector<1x32xf32>
    %81 = tpu.matmul %15, %70, %cst_30 {dimension_numbers = #tpu.dot_dimension_numbers<[1], [1], [0], [0], [0, 0, 1, 0], [], []>} : vector<1x64xf32>, vector<32x64xf32>, vector<1x32xf32> -> vector<1x32xf32>
    %82 = vector.broadcast %76 : vector<1x1xf32> to vector<1x32xf32>
    %83 = arith.mulf %81, %82 : vector<1x32xf32>
    %84 = math.tanh %83 : vector<1x32xf32>
    %85 = vector.broadcast %7 : vector<32x1xf32> to vector<32x2xf32>
    %86 = arith.mulf %3, %85 : vector<32x2xf32>
    %cst_31 = arith.constant dense<0.000000e+00> : vector<32x32xf32>
    %87 = tpu.matmul %86, %86, %cst_31 {dimension_numbers = #tpu.dot_dimension_numbers<[1], [1], [0], [0], [0, 0, 1, 0], [], []>} : vector<32x2xf32>, vector<32x2xf32>, vector<32x32xf32> -> vector<32x32xf32>
    %cst_32 = arith.constant dense<0.000000e+00> : vector<2x1xf32>
    %88 = tpu.matmul %2, %7, %cst_32 {dimension_numbers = #tpu.dot_dimension_numbers<[1], [0], [0], [1], [0, 0, 1, 1], [], []>} : vector<2x32xf32>, vector<32x1xf32>, vector<2x1xf32> -> vector<2x1xf32>
    %cst_33 = arith.constant 8.000000e-01 : f32
    %89 = vector.broadcast %cst_33 : f32 to vector<2x1xf32>
    %90 = arith.mulf %89, %88 : vector<2x1xf32>
    %91 = math.ceil %90 : vector<2x1xf32>
    %cst_34 = arith.constant dense<0.000000e+00> : vector<32x1xf32>
    %92 = tpu.matmul %3, %91, %cst_34 {dimension_numbers = #tpu.dot_dimension_numbers<[1], [0], [0], [1], [0, 0, 1, 1], [], []>} : vector<32x2xf32>, vector<2x1xf32>, vector<32x1xf32> -> vector<32x1xf32>
    %cst_35 = arith.constant 5.000000e-01 : f32
    %93 = vector.broadcast %cst_35 : f32 to vector<32x32xf32>
    %94 = arith.cmpf ogt, %87, %93 : vector<32x32xf32>
    %95 = arith.cmpi ne, %6, %5 : vector<32x32xi32>
    %96 = arith.andi %94, %95 : vector<32x32xi1>
    %97 = vector.broadcast %84 : vector<1x32xf32> to vector<32x32xf32>
    %98 = vector.broadcast %80 : vector<32x1xf32> to vector<32x32xf32>
    %99 = arith.cmpf ogt, %97, %98 : vector<32x32xf32>
    %100 = vector.broadcast %84 : vector<1x32xf32> to vector<32x32xf32>
    %101 = vector.broadcast %80 : vector<32x1xf32> to vector<32x32xf32>
    %102 = arith.cmpf oeq, %100, %101 : vector<32x32xf32>
    %103 = arith.cmpi slt, %6, %5 : vector<32x32xi32>
    %104 = arith.andi %102, %103 : vector<32x32xi1>
    %105 = arith.ori %99, %104 : vector<32x32xi1>
    %106 = arith.andi %96, %105 : vector<32x32xi1>
    %107 = arith.extui %106 : vector<32x32xi1> to vector<32x32xi32>
    %108 = arith.sitofp %107 : vector<32x32xi32> to vector<32x32xf32>
    %cst_36 = arith.constant dense<0.000000e+00> : vector<32xf32>
    %109 = vector.multi_reduction <add>, %108, %cst_36 [1] : vector<32x32xf32> to vector<32xf32>
    %110 = vector.shape_cast %109 : vector<32xf32> to vector<32x1xf32>
    %cst_37 = arith.constant 5.000000e-01 : f32
    %111 = vector.broadcast %cst_37 : f32 to vector<32x1xf32>
    %112 = arith.cmpf ogt, %7, %111 : vector<32x1xf32>
    %113 = arith.cmpf olt, %110, %92 : vector<32x1xf32>
    %114 = arith.andi %112, %113 : vector<32x1xi1>
    %cst_38 = arith.constant 1.000000e+00 : f32
    %cst_39 = arith.constant 0.000000e+00 : f32
    %115 = vector.broadcast %cst_38 : f32 to vector<32x1xf32>
    %116 = vector.broadcast %cst_39 : f32 to vector<32x1xf32>
    %117 = arith.select %114, %115, %116 : vector<32x1xi1>, vector<32x1xf32>
    %118 = arith.mulf %80, %117 : vector<32x1xf32>
    %119 = vector.broadcast %118 : vector<32x1xf32> to vector<32x64xf32>
    %120 = arith.mulf %70, %119 : vector<32x64xf32>
    %cst_40 = arith.constant dense<0.000000e+00> : vector<2x1xf32>
    %121 = tpu.matmul %2, %117, %cst_40 {dimension_numbers = #tpu.dot_dimension_numbers<[1], [0], [0], [1], [0, 0, 1, 1], [], []>} : vector<2x32xf32>, vector<32x1xf32>, vector<2x1xf32> -> vector<2x1xf32>
    %cst_41 = arith.constant 1.000000e+00 : f32
    %122 = vector.broadcast %cst_41 : f32 to vector<2x1xf32>
    %123 = arith.maximumf %121, %122 : vector<2x1xf32>
    %124 = tpu.reciprocal %123 {approx = true} : vector<2x1xf32> -> vector<2x1xf32>
    %cst_42 = arith.constant dense<0.000000e+00> : vector<2x64xf32>
    %125 = tpu.matmul %2, %120, %cst_42 {dimension_numbers = #tpu.dot_dimension_numbers<[1], [0], [0], [1], [0, 0, 1, 1], [], []>} : vector<2x32xf32>, vector<32x64xf32>, vector<2x64xf32> -> vector<2x64xf32>
    %126 = vector.broadcast %124 : vector<2x1xf32> to vector<2x64xf32>
    %127 = arith.mulf %125, %126 : vector<2x64xf32>
    %128 = arith.addf %8, %127 : vector<2x64xf32>
    %129 = vector.extract_strided_slice %3 {offsets = [0, 0], sizes = [32, 1], strides = [1, 1]} : vector<32x2xf32> to vector<32x1xf32>
    %130 = arith.mulf %129, %117 : vector<32x1xf32>
    %cst_43 = arith.constant 5.000000e-01 : f32
    %131 = vector.broadcast %cst_43 : f32 to vector<32x1xf32>
    %132 = arith.cmpf ogt, %130, %131 : vector<32x1xf32>
    %cst_44 = arith.constant -1.000000e+30 : f32
    %133 = vector.shape_cast %132 : vector<32x1xi1> to vector<32x1xi1>
    %134 = vector.broadcast %133 : vector<32x1xi1> to vector<32x64xi1>
    %135 = vector.broadcast %cst_44 : f32 to vector<32x64xf32>
    %136 = arith.select %134, %120, %135 : vector<32x64xi1>, vector<32x64xf32>
    %cst_45 = arith.constant dense<0xFF800000> : vector<64xf32>
    %137 = vector.multi_reduction <maximumf>, %136, %cst_45 [0] : vector<32x64xf32> to vector<64xf32>
    %138 = vector.shape_cast %137 : vector<64xf32> to vector<1x64xf32>
    %139 = vector.extract_strided_slice %121 {offsets = [0, 0], sizes = [1, 1], strides = [1, 1]} : vector<2x1xf32> to vector<1x1xf32>
    %cst_46 = arith.constant 5.000000e-01 : f32
    %140 = vector.broadcast %cst_46 : f32 to vector<1x1xf32>
    %141 = arith.cmpf ogt, %139, %140 : vector<1x1xf32>
    %cst_47 = arith.constant 0.000000e+00 : f32
    %142 = vector.shape_cast %141 : vector<1x1xi1> to vector<1x1xi1>
    %143 = vector.broadcast %142 : vector<1x1xi1> to vector<1x64xi1>
    %144 = vector.broadcast %cst_47 : f32 to vector<1x64xf32>
    %145 = arith.select %143, %138, %144 : vector<1x64xi1>, vector<1x64xf32>
    %c0_48 = arith.constant 0 : index
    %c0_49 = arith.constant 0 : index
    %146 = vector.load %arg11[%c0_48, %c0_49] : memref<2x64xf32, #tpu.memory_space<vmem>>, vector<1x64xf32>
    %147 = arith.addf %146, %145 : vector<1x64xf32>
    %c0_50 = arith.constant 0 : index
    %c0_51 = arith.constant 0 : index
    %148 = vector.load %arg11[%c0_50, %c0_51] : memref<2x64xf32, #tpu.memory_space<vmem>>, vector<1x64xf32>
    tpu.vector_store %arg11[%c0_50, %c0_51], %147 {strides = array<i32>} : memref<2x64xf32, #tpu.memory_space<vmem>>, vector<1x64xf32>,
    %149 = vector.extract_strided_slice %3 {offsets = [0, 1], sizes = [32, 1], strides = [1, 1]} : vector<32x2xf32> to vector<32x1xf32>
    %150 = arith.mulf %149, %117 : vector<32x1xf32>
    %cst_52 = arith.constant 5.000000e-01 : f32
    %151 = vector.broadcast %cst_52 : f32 to vector<32x1xf32>
    %152 = arith.cmpf ogt, %150, %151 : vector<32x1xf32>
    %cst_53 = arith.constant -1.000000e+30 : f32
    %153 = vector.shape_cast %152 : vector<32x1xi1> to vector<32x1xi1>
    %154 = vector.broadcast %153 : vector<32x1xi1> to vector<32x64xi1>
    %155 = vector.broadcast %cst_53 : f32 to vector<32x64xf32>
    %156 = arith.select %154, %120, %155 : vector<32x64xi1>, vector<32x64xf32>
    %cst_54 = arith.constant dense<0xFF800000> : vector<64xf32>
    %157 = vector.multi_reduction <maximumf>, %156, %cst_54 [0] : vector<32x64xf32> to vector<64xf32>
    %158 = vector.shape_cast %157 : vector<64xf32> to vector<1x64xf32>
    %159 = vector.extract_strided_slice %121 {offsets = [1, 0], sizes = [1, 1], strides = [1, 1]} : vector<2x1xf32> to vector<1x1xf32>
    %cst_55 = arith.constant 5.000000e-01 : f32
    %160 = vector.broadcast %cst_55 : f32 to vector<1x1xf32>
    %161 = arith.cmpf ogt, %159, %160 : vector<1x1xf32>
    %cst_56 = arith.constant 0.000000e+00 : f32
    %162 = vector.shape_cast %161 : vector<1x1xi1> to vector<1x1xi1>
    %163 = vector.broadcast %162 : vector<1x1xi1> to vector<1x64xi1>
    %164 = vector.broadcast %cst_56 : f32 to vector<1x64xf32>
    %165 = arith.select %163, %158, %164 : vector<1x64xi1>, vector<1x64xf32>
    %c1 = arith.constant 1 : index
    %c0_57 = arith.constant 0 : index
    %166 = vector.load %arg11[%c1, %c0_57] : memref<2x64xf32, #tpu.memory_space<vmem>>, vector<1x64xf32>
    %167 = arith.addf %166, %165 : vector<1x64xf32>
    %c1_58 = arith.constant 1 : index
    %c0_59 = arith.constant 0 : index
    %168 = vector.load %arg11[%c1_58, %c0_59] : memref<2x64xf32, #tpu.memory_space<vmem>>, vector<1x64xf32>
    tpu.vector_store %arg11[%c1_58, %c0_59], %167 {strides = array<i32>} : memref<2x64xf32, #tpu.memory_space<vmem>>, vector<1x64xf32>,
    %c0_60 = arith.constant 0 : index
    %c0_61 = arith.constant 0 : index
    %169 = vector.load %arg5[%c0_60, %c0_61] : memref<64x64xf32, #tpu.memory_space<vmem>>, vector<64x64xf32>
    %170 = vector.extract_strided_slice %4 {offsets = [4, 0], sizes = [1, 64], strides = [1, 1]} : vector<12x64xf32> to vector<1x64xf32>
    %171 = vector.extract_strided_slice %4 {offsets = [5, 0], sizes = [1, 64], strides = [1, 1]} : vector<12x64xf32> to vector<1x64xf32>
    %172 = vector.extract_strided_slice %4 {offsets = [6, 0], sizes = [1, 64], strides = [1, 1]} : vector<12x64xf32> to vector<1x64xf32>
    %173 = vector.extract_strided_slice %4 {offsets = [7, 0], sizes = [1, 64], strides = [1, 1]} : vector<12x64xf32> to vector<1x64xf32>
    %cst_62 = arith.constant dense<0.000000e+00> : vector<32x1xf32>
    %174 = tpu.matmul %1, %117, %cst_62 {dimension_numbers = #tpu.dot_dimension_numbers<[1], [0], [0], [1], [0, 0, 1, 1], [], []>} : vector<32x32xf32>, vector<32x1xf32>, vector<32x1xf32> -> vector<32x1xf32>
    %cst_63 = arith.constant 1.000000e+00 : f32
    %175 = vector.broadcast %cst_63 : f32 to vector<32x1xf32>
    %176 = arith.addf %174, %175 : vector<32x1xf32>
    %177 = arith.mulf %117, %176 : vector<32x1xf32>
    %cst_64 = arith.constant 0.000000e+00 : f32
    %178 = vector.broadcast %cst_64 : f32 to vector<32x1xf32>
    %179 = arith.cmpf ogt, %177, %178 : vector<32x1xf32>
    %180 = math.rsqrt %177 : vector<32x1xf32>
    %cst_65 = arith.constant 0.000000e+00 : f32
    %181 = vector.broadcast %cst_65 : f32 to vector<32x1xf32>
    %182 = arith.select %179, %180, %181 : vector<32x1xi1>, vector<32x1xf32>
    %cst_66 = arith.constant dense<0.000000e+00> : vector<32x64xf32>
    %183 = tpu.matmul %120, %169, %cst_66 {dimension_numbers = #tpu.dot_dimension_numbers<[1], [0], [0], [1], [0, 0, 1, 1], [], []>} : vector<32x64xf32>, vector<64x64xf32>, vector<32x64xf32> -> vector<32x64xf32>
    %184 = vector.broadcast %182 : vector<32x1xf32> to vector<32x64xf32>
    %185 = arith.mulf %184, %183 : vector<32x64xf32>
    %cst_67 = arith.constant dense<0.000000e+00> : vector<32x64xf32>
    %186 = tpu.matmul %1, %185, %cst_67 {dimension_numbers = #tpu.dot_dimension_numbers<[1], [0], [0], [1], [0, 0, 1, 1], [], []>} : vector<32x32xf32>, vector<32x64xf32>, vector<32x64xf32> -> vector<32x64xf32>
    %187 = vector.broadcast %182 : vector<32x1xf32> to vector<32x64xf32>
    %188 = arith.mulf %187, %183 : vector<32x64xf32>
    %189 = arith.addf %186, %188 : vector<32x64xf32>
    %190 = vector.broadcast %182 : vector<32x1xf32> to vector<32x64xf32>
    %191 = arith.mulf %190, %189 : vector<32x64xf32>
    %192 = vector.broadcast %170 : vector<1x64xf32> to vector<32x64xf32>
    %193 = arith.addf %191, %192 : vector<32x64xf32>
    %194 = vector.broadcast %117 : vector<32x1xf32> to vector<32x64xf32>
    %195 = arith.mulf %193, %194 : vector<32x64xf32>
    %cst_68 = arith.constant dense<0.000000e+00> : vector<1xf32>
    %196 = vector.multi_reduction <add>, %117, %cst_68 [0] : vector<32x1xf32> to vector<1xf32>
    %197 = vector.shape_cast %196 : vector<1xf32> to vector<1x1xf32>
    %cst_69 = arith.constant 1.000000e+00 : f32
    %198 = vector.broadcast %cst_69 : f32 to vector<1x1xf32>
    %199 = arith.maximumf %197, %198 : vector<1x1xf32>
    %200 = tpu.reciprocal %199 {approx = true} : vector<1x1xf32> -> vector<1x1xf32>
    %cst_70 = arith.constant dense<0.000000e+00> : vector<64xf32>
    %201 = vector.multi_reduction <add>, %195, %cst_70 [0] : vector<32x64xf32> to vector<64xf32>
    %202 = vector.shape_cast %201 : vector<64xf32> to vector<1x64xf32>
    %203 = vector.broadcast %200 : vector<1x1xf32> to vector<1x64xf32>
    %204 = arith.mulf %202, %203 : vector<1x64xf32>
    %205 = vector.broadcast %204 : vector<1x64xf32> to vector<32x64xf32>
    %206 = arith.subf %195, %205 : vector<32x64xf32>
    %207 = arith.mulf %206, %206 : vector<32x64xf32>
    %208 = vector.broadcast %117 : vector<32x1xf32> to vector<32x64xf32>
    %209 = arith.mulf %207, %208 : vector<32x64xf32>
    %cst_71 = arith.constant dense<0.000000e+00> : vector<64xf32>
    %210 = vector.multi_reduction <add>, %209, %cst_71 [0] : vector<32x64xf32> to vector<64xf32>
    %211 = vector.shape_cast %210 : vector<64xf32> to vector<1x64xf32>
    %212 = vector.broadcast %200 : vector<1x1xf32> to vector<1x64xf32>
    %213 = arith.mulf %211, %212 : vector<1x64xf32>
    %214 = vector.broadcast %204 : vector<1x64xf32> to vector<32x64xf32>
    %215 = arith.subf %195, %214 : vector<32x64xf32>
    %cst_72 = arith.constant 9.99999974E-6 : f32
    %216 = vector.broadcast %cst_72 : f32 to vector<1x64xf32>
    %217 = arith.addf %213, %216 : vector<1x64xf32>
    %218 = math.rsqrt %217 : vector<1x64xf32>
    %219 = vector.broadcast %218 : vector<1x64xf32> to vector<32x64xf32>
    %220 = arith.mulf %215, %219 : vector<32x64xf32>
    %221 = vector.broadcast %171 : vector<1x64xf32> to vector<32x64xf32>
    %222 = arith.mulf %221, %220 : vector<32x64xf32>
    %223 = vector.broadcast %172 : vector<1x64xf32> to vector<32x64xf32>
    %224 = arith.addf %222, %223 : vector<32x64xf32>
    %cst_73 = arith.constant 0.000000e+00 : f32
    %225 = vector.broadcast %cst_73 : f32 to vector<32x64xf32>
    %226 = arith.maximumf %224, %225 : vector<32x64xf32>
    %227 = vector.broadcast %117 : vector<32x1xf32> to vector<32x64xf32>
    %228 = arith.mulf %226, %227 : vector<32x64xf32>
    %229 = arith.mulf %173, %173 : vector<1x64xf32>
    %cst_74 = arith.constant dense<0.000000e+00> : vector<1xf32>
    %230 = vector.multi_reduction <add>, %229, %cst_74 [1] : vector<1x64xf32> to vector<1xf32>
    %231 = vector.shape_cast %230 : vector<1xf32> to vector<1x1xf32>
    %cst_75 = arith.constant 1.000000e-24 : f32
    %232 = vector.broadcast %cst_75 : f32 to vector<1x1xf32>
    %233 = arith.addf %231, %232 : vector<1x1xf32>
    %234 = math.rsqrt %233 : vector<1x1xf32>
    %cst_76 = arith.constant dense<0.000000e+00> : vector<32x1xf32>
    %235 = tpu.matmul %228, %173, %cst_76 {dimension_numbers = #tpu.dot_dimension_numbers<[1], [1], [0], [0], [0, 0, 1, 0], [], []>} : vector<32x64xf32>, vector<1x64xf32>, vector<32x1xf32> -> vector<32x1xf32>
    %236 = vector.broadcast %234 : vector<1x1xf32> to vector<32x1xf32>
    %237 = arith.mulf %235, %236 : vector<32x1xf32>
    %238 = math.tanh %237 : vector<32x1xf32>
    %cst_77 = arith.constant dense<0.000000e+00> : vector<1x32xf32>
    %239 = tpu.matmul %173, %228, %cst_77 {dimension_numbers = #tpu.dot_dimension_numbers<[1], [1], [0], [0], [0, 0, 1, 0], [], []>} : vector<1x64xf32>, vector<32x64xf32>, vector<1x32xf32> -> vector<1x32xf32>
    %240 = vector.broadcast %234 : vector<1x1xf32> to vector<1x32xf32>
    %241 = arith.mulf %239, %240 : vector<1x32xf32>
    %242 = math.tanh %241 : vector<1x32xf32>
    %243 = vector.broadcast %117 : vector<32x1xf32> to vector<32x2xf32>
    %244 = arith.mulf %3, %243 : vector<32x2xf32>
    %cst_78 = arith.constant dense<0.000000e+00> : vector<32x32xf32>
    %245 = tpu.matmul %244, %244, %cst_78 {dimension_numbers = #tpu.dot_dimension_numbers<[1], [1], [0], [0], [0, 0, 1, 0], [], []>} : vector<32x2xf32>, vector<32x2xf32>, vector<32x32xf32> -> vector<32x32xf32>
    %cst_79 = arith.constant dense<0.000000e+00> : vector<2x1xf32>
    %246 = tpu.matmul %2, %117, %cst_79 {dimension_numbers = #tpu.dot_dimension_numbers<[1], [0], [0], [1], [0, 0, 1, 1], [], []>} : vector<2x32xf32>, vector<32x1xf32>, vector<2x1xf32> -> vector<2x1xf32>
    %cst_80 = arith.constant 8.000000e-01 : f32
    %247 = vector.broadcast %cst_80 : f32 to vector<2x1xf32>
    %248 = arith.mulf %247, %246 : vector<2x1xf32>
    %249 = math.ceil %248 : vector<2x1xf32>
    %cst_81 = arith.constant dense<0.000000e+00> : vector<32x1xf32>
    %250 = tpu.matmul %3, %249, %cst_81 {dimension_numbers = #tpu.dot_dimension_numbers<[1], [0], [0], [1], [0, 0, 1, 1], [], []>} : vector<32x2xf32>, vector<2x1xf32>, vector<32x1xf32> -> vector<32x1xf32>
    %cst_82 = arith.constant 5.000000e-01 : f32
    %251 = vector.broadcast %cst_82 : f32 to vector<32x32xf32>
    %252 = arith.cmpf ogt, %245, %251 : vector<32x32xf32>
    %253 = arith.cmpi ne, %6, %5 : vector<32x32xi32>
    %254 = arith.andi %252, %253 : vector<32x32xi1>
    %255 = vector.broadcast %242 : vector<1x32xf32> to vector<32x32xf32>
    %256 = vector.broadcast %238 : vector<32x1xf32> to vector<32x32xf32>
    %257 = arith.cmpf ogt, %255, %256 : vector<32x32xf32>
    %258 = vector.broadcast %242 : vector<1x32xf32> to vector<32x32xf32>
    %259 = vector.broadcast %238 : vector<32x1xf32> to vector<32x32xf32>
    %260 = arith.cmpf oeq, %258, %259 : vector<32x32xf32>
    %261 = arith.cmpi slt, %6, %5 : vector<32x32xi32>
    %262 = arith.andi %260, %261 : vector<32x32xi1>
    %263 = arith.ori %257, %262 : vector<32x32xi1>
    %264 = arith.andi %254, %263 : vector<32x32xi1>
    %265 = arith.extui %264 : vector<32x32xi1> to vector<32x32xi32>
    %266 = arith.sitofp %265 : vector<32x32xi32> to vector<32x32xf32>
    %cst_83 = arith.constant dense<0.000000e+00> : vector<32xf32>
    %267 = vector.multi_reduction <add>, %266, %cst_83 [1] : vector<32x32xf32> to vector<32xf32>
    %268 = vector.shape_cast %267 : vector<32xf32> to vector<32x1xf32>
    %cst_84 = arith.constant 5.000000e-01 : f32
    %269 = vector.broadcast %cst_84 : f32 to vector<32x1xf32>
    %270 = arith.cmpf ogt, %117, %269 : vector<32x1xf32>
    %271 = arith.cmpf olt, %268, %250 : vector<32x1xf32>
    %272 = arith.andi %270, %271 : vector<32x1xi1>
    %cst_85 = arith.constant 1.000000e+00 : f32
    %cst_86 = arith.constant 0.000000e+00 : f32
    %273 = vector.broadcast %cst_85 : f32 to vector<32x1xf32>
    %274 = vector.broadcast %cst_86 : f32 to vector<32x1xf32>
    %275 = arith.select %272, %273, %274 : vector<32x1xi1>, vector<32x1xf32>
    %276 = arith.mulf %238, %275 : vector<32x1xf32>
    %277 = vector.broadcast %276 : vector<32x1xf32> to vector<32x64xf32>
    %278 = arith.mulf %228, %277 : vector<32x64xf32>
    %cst_87 = arith.constant dense<0.000000e+00> : vector<2x1xf32>
    %279 = tpu.matmul %2, %275, %cst_87 {dimension_numbers = #tpu.dot_dimension_numbers<[1], [0], [0], [1], [0, 0, 1, 1], [], []>} : vector<2x32xf32>, vector<32x1xf32>, vector<2x1xf32> -> vector<2x1xf32>
    %cst_88 = arith.constant 1.000000e+00 : f32
    %280 = vector.broadcast %cst_88 : f32 to vector<2x1xf32>
    %281 = arith.maximumf %279, %280 : vector<2x1xf32>
    %282 = tpu.reciprocal %281 {approx = true} : vector<2x1xf32> -> vector<2x1xf32>
    %cst_89 = arith.constant dense<0.000000e+00> : vector<2x64xf32>
    %283 = tpu.matmul %2, %278, %cst_89 {dimension_numbers = #tpu.dot_dimension_numbers<[1], [0], [0], [1], [0, 0, 1, 1], [], []>} : vector<2x32xf32>, vector<32x64xf32>, vector<2x64xf32> -> vector<2x64xf32>
    %284 = vector.broadcast %282 : vector<2x1xf32> to vector<2x64xf32>
    %285 = arith.mulf %283, %284 : vector<2x64xf32>
    %286 = arith.addf %128, %285 : vector<2x64xf32>
    %287 = vector.extract_strided_slice %3 {offsets = [0, 0], sizes = [32, 1], strides = [1, 1]} : vector<32x2xf32> to vector<32x1xf32>
    %288 = arith.mulf %287, %275 : vector<32x1xf32>
    %cst_90 = arith.constant 5.000000e-01 : f32
    %289 = vector.broadcast %cst_90 : f32 to vector<32x1xf32>
    %290 = arith.cmpf ogt, %288, %289 : vector<32x1xf32>
    %cst_91 = arith.constant -1.000000e+30 : f32
    %291 = vector.shape_cast %290 : vector<32x1xi1> to vector<32x1xi1>
    %292 = vector.broadcast %291 : vector<32x1xi1> to vector<32x64xi1>
    %293 = vector.broadcast %cst_91 : f32 to vector<32x64xf32>
    %294 = arith.select %292, %278, %293 : vector<32x64xi1>, vector<32x64xf32>
    %cst_92 = arith.constant dense<0xFF800000> : vector<64xf32>
    %295 = vector.multi_reduction <maximumf>, %294, %cst_92 [0] : vector<32x64xf32> to vector<64xf32>
    %296 = vector.shape_cast %295 : vector<64xf32> to vector<1x64xf32>
    %297 = vector.extract_strided_slice %279 {offsets = [0, 0], sizes = [1, 1], strides = [1, 1]} : vector<2x1xf32> to vector<1x1xf32>
    %cst_93 = arith.constant 5.000000e-01 : f32
    %298 = vector.broadcast %cst_93 : f32 to vector<1x1xf32>
    %299 = arith.cmpf ogt, %297, %298 : vector<1x1xf32>
    %cst_94 = arith.constant 0.000000e+00 : f32
    %300 = vector.shape_cast %299 : vector<1x1xi1> to vector<1x1xi1>
    %301 = vector.broadcast %300 : vector<1x1xi1> to vector<1x64xi1>
    %302 = vector.broadcast %cst_94 : f32 to vector<1x64xf32>
    %303 = arith.select %301, %296, %302 : vector<1x64xi1>, vector<1x64xf32>
    %c0_95 = arith.constant 0 : index
    %c0_96 = arith.constant 0 : index
    %304 = vector.load %arg11[%c0_95, %c0_96] : memref<2x64xf32, #tpu.memory_space<vmem>>, vector<1x64xf32>
    %305 = arith.addf %304, %303 : vector<1x64xf32>
    %c0_97 = arith.constant 0 : index
    %c0_98 = arith.constant 0 : index
    %306 = vector.load %arg11[%c0_97, %c0_98] : memref<2x64xf32, #tpu.memory_space<vmem>>, vector<1x64xf32>
    tpu.vector_store %arg11[%c0_97, %c0_98], %305 {strides = array<i32>} : memref<2x64xf32, #tpu.memory_space<vmem>>, vector<1x64xf32>,
    %307 = vector.extract_strided_slice %3 {offsets = [0, 1], sizes = [32, 1], strides = [1, 1]} : vector<32x2xf32> to vector<32x1xf32>
    %308 = arith.mulf %307, %275 : vector<32x1xf32>
    %cst_99 = arith.constant 5.000000e-01 : f32
    %309 = vector.broadcast %cst_99 : f32 to vector<32x1xf32>
    %310 = arith.cmpf ogt, %308, %309 : vector<32x1xf32>
    %cst_100 = arith.constant -1.000000e+30 : f32
    %311 = vector.shape_cast %310 : vector<32x1xi1> to vector<32x1xi1>
    %312 = vector.broadcast %311 : vector<32x1xi1> to vector<32x64xi1>
    %313 = vector.broadcast %cst_100 : f32 to vector<32x64xf32>
    %314 = arith.select %312, %278, %313 : vector<32x64xi1>, vector<32x64xf32>
    %cst_101 = arith.constant dense<0xFF800000> : vector<64xf32>
    %315 = vector.multi_reduction <maximumf>, %314, %cst_101 [0] : vector<32x64xf32> to vector<64xf32>
    %316 = vector.shape_cast %315 : vector<64xf32> to vector<1x64xf32>
    %317 = vector.extract_strided_slice %279 {offsets = [1, 0], sizes = [1, 1], strides = [1, 1]} : vector<2x1xf32> to vector<1x1xf32>
    %cst_102 = arith.constant 5.000000e-01 : f32
    %318 = vector.broadcast %cst_102 : f32 to vector<1x1xf32>
    %319 = arith.cmpf ogt, %317, %318 : vector<1x1xf32>
    %cst_103 = arith.constant 0.000000e+00 : f32
    %320 = vector.shape_cast %319 : vector<1x1xi1> to vector<1x1xi1>
    %321 = vector.broadcast %320 : vector<1x1xi1> to vector<1x64xi1>
    %322 = vector.broadcast %cst_103 : f32 to vector<1x64xf32>
    %323 = arith.select %321, %316, %322 : vector<1x64xi1>, vector<1x64xf32>
    %c1_104 = arith.constant 1 : index
    %c0_105 = arith.constant 0 : index
    %324 = vector.load %arg11[%c1_104, %c0_105] : memref<2x64xf32, #tpu.memory_space<vmem>>, vector<1x64xf32>
    %325 = arith.addf %324, %323 : vector<1x64xf32>
    %c1_106 = arith.constant 1 : index
    %c0_107 = arith.constant 0 : index
    %326 = vector.load %arg11[%c1_106, %c0_107] : memref<2x64xf32, #tpu.memory_space<vmem>>, vector<1x64xf32>
    tpu.vector_store %arg11[%c1_106, %c0_107], %325 {strides = array<i32>} : memref<2x64xf32, #tpu.memory_space<vmem>>, vector<1x64xf32>,
    %c0_108 = arith.constant 0 : index
    %c0_109 = arith.constant 0 : index
    %327 = vector.load %arg6[%c0_108, %c0_109] : memref<64x64xf32, #tpu.memory_space<vmem>>, vector<64x64xf32>
    %328 = vector.extract_strided_slice %4 {offsets = [8, 0], sizes = [1, 64], strides = [1, 1]} : vector<12x64xf32> to vector<1x64xf32>
    %329 = vector.extract_strided_slice %4 {offsets = [9, 0], sizes = [1, 64], strides = [1, 1]} : vector<12x64xf32> to vector<1x64xf32>
    %330 = vector.extract_strided_slice %4 {offsets = [10, 0], sizes = [1, 64], strides = [1, 1]} : vector<12x64xf32> to vector<1x64xf32>
    %331 = vector.extract_strided_slice %4 {offsets = [11, 0], sizes = [1, 64], strides = [1, 1]} : vector<12x64xf32> to vector<1x64xf32>
    %cst_110 = arith.constant dense<0.000000e+00> : vector<32x1xf32>
    %332 = tpu.matmul %1, %275, %cst_110 {dimension_numbers = #tpu.dot_dimension_numbers<[1], [0], [0], [1], [0, 0, 1, 1], [], []>} : vector<32x32xf32>, vector<32x1xf32>, vector<32x1xf32> -> vector<32x1xf32>
    %cst_111 = arith.constant 1.000000e+00 : f32
    %333 = vector.broadcast %cst_111 : f32 to vector<32x1xf32>
    %334 = arith.addf %332, %333 : vector<32x1xf32>
    %335 = arith.mulf %275, %334 : vector<32x1xf32>
    %cst_112 = arith.constant 0.000000e+00 : f32
    %336 = vector.broadcast %cst_112 : f32 to vector<32x1xf32>
    %337 = arith.cmpf ogt, %335, %336 : vector<32x1xf32>
    %338 = math.rsqrt %335 : vector<32x1xf32>
    %cst_113 = arith.constant 0.000000e+00 : f32
    %339 = vector.broadcast %cst_113 : f32 to vector<32x1xf32>
    %340 = arith.select %337, %338, %339 : vector<32x1xi1>, vector<32x1xf32>
    %cst_114 = arith.constant dense<0.000000e+00> : vector<32x64xf32>
    %341 = tpu.matmul %278, %327, %cst_114 {dimension_numbers = #tpu.dot_dimension_numbers<[1], [0], [0], [1], [0, 0, 1, 1], [], []>} : vector<32x64xf32>, vector<64x64xf32>, vector<32x64xf32> -> vector<32x64xf32>
    %342 = vector.broadcast %340 : vector<32x1xf32> to vector<32x64xf32>
    %343 = arith.mulf %342, %341 : vector<32x64xf32>
    %cst_115 = arith.constant dense<0.000000e+00> : vector<32x64xf32>
    %344 = tpu.matmul %1, %343, %cst_115 {dimension_numbers = #tpu.dot_dimension_numbers<[1], [0], [0], [1], [0, 0, 1, 1], [], []>} : vector<32x32xf32>, vector<32x64xf32>, vector<32x64xf32> -> vector<32x64xf32>
    %345 = vector.broadcast %340 : vector<32x1xf32> to vector<32x64xf32>
    %346 = arith.mulf %345, %341 : vector<32x64xf32>
    %347 = arith.addf %344, %346 : vector<32x64xf32>
    %348 = vector.broadcast %340 : vector<32x1xf32> to vector<32x64xf32>
    %349 = arith.mulf %348, %347 : vector<32x64xf32>
    %350 = vector.broadcast %328 : vector<1x64xf32> to vector<32x64xf32>
    %351 = arith.addf %349, %350 : vector<32x64xf32>
    %352 = vector.broadcast %275 : vector<32x1xf32> to vector<32x64xf32>
    %353 = arith.mulf %351, %352 : vector<32x64xf32>
    %cst_116 = arith.constant dense<0.000000e+00> : vector<1xf32>
    %354 = vector.multi_reduction <add>, %275, %cst_116 [0] : vector<32x1xf32> to vector<1xf32>
    %355 = vector.shape_cast %354 : vector<1xf32> to vector<1x1xf32>
    %cst_117 = arith.constant 1.000000e+00 : f32
    %356 = vector.broadcast %cst_117 : f32 to vector<1x1xf32>
    %357 = arith.maximumf %355, %356 : vector<1x1xf32>
    %358 = tpu.reciprocal %357 {approx = true} : vector<1x1xf32> -> vector<1x1xf32>
    %cst_118 = arith.constant dense<0.000000e+00> : vector<64xf32>
    %359 = vector.multi_reduction <add>, %353, %cst_118 [0] : vector<32x64xf32> to vector<64xf32>
    %360 = vector.shape_cast %359 : vector<64xf32> to vector<1x64xf32>
    %361 = vector.broadcast %358 : vector<1x1xf32> to vector<1x64xf32>
    %362 = arith.mulf %360, %361 : vector<1x64xf32>
    %363 = vector.broadcast %362 : vector<1x64xf32> to vector<32x64xf32>
    %364 = arith.subf %353, %363 : vector<32x64xf32>
    %365 = arith.mulf %364, %364 : vector<32x64xf32>
    %366 = vector.broadcast %275 : vector<32x1xf32> to vector<32x64xf32>
    %367 = arith.mulf %365, %366 : vector<32x64xf32>
    %cst_119 = arith.constant dense<0.000000e+00> : vector<64xf32>
    %368 = vector.multi_reduction <add>, %367, %cst_119 [0] : vector<32x64xf32> to vector<64xf32>
    %369 = vector.shape_cast %368 : vector<64xf32> to vector<1x64xf32>
    %370 = vector.broadcast %358 : vector<1x1xf32> to vector<1x64xf32>
    %371 = arith.mulf %369, %370 : vector<1x64xf32>
    %372 = vector.broadcast %362 : vector<1x64xf32> to vector<32x64xf32>
    %373 = arith.subf %353, %372 : vector<32x64xf32>
    %cst_120 = arith.constant 9.99999974E-6 : f32
    %374 = vector.broadcast %cst_120 : f32 to vector<1x64xf32>
    %375 = arith.addf %371, %374 : vector<1x64xf32>
    %376 = math.rsqrt %375 : vector<1x64xf32>
    %377 = vector.broadcast %376 : vector<1x64xf32> to vector<32x64xf32>
    %378 = arith.mulf %373, %377 : vector<32x64xf32>
    %379 = vector.broadcast %329 : vector<1x64xf32> to vector<32x64xf32>
    %380 = arith.mulf %379, %378 : vector<32x64xf32>
    %381 = vector.broadcast %330 : vector<1x64xf32> to vector<32x64xf32>
    %382 = arith.addf %380, %381 : vector<32x64xf32>
    %cst_121 = arith.constant 0.000000e+00 : f32
    %383 = vector.broadcast %cst_121 : f32 to vector<32x64xf32>
    %384 = arith.maximumf %382, %383 : vector<32x64xf32>
    %385 = vector.broadcast %275 : vector<32x1xf32> to vector<32x64xf32>
    %386 = arith.mulf %384, %385 : vector<32x64xf32>
    %387 = arith.mulf %331, %331 : vector<1x64xf32>
    %cst_122 = arith.constant dense<0.000000e+00> : vector<1xf32>
    %388 = vector.multi_reduction <add>, %387, %cst_122 [1] : vector<1x64xf32> to vector<1xf32>
    %389 = vector.shape_cast %388 : vector<1xf32> to vector<1x1xf32>
    %cst_123 = arith.constant 1.000000e-24 : f32
    %390 = vector.broadcast %cst_123 : f32 to vector<1x1xf32>
    %391 = arith.addf %389, %390 : vector<1x1xf32>
    %392 = math.rsqrt %391 : vector<1x1xf32>
    %cst_124 = arith.constant dense<0.000000e+00> : vector<32x1xf32>
    %393 = tpu.matmul %386, %331, %cst_124 {dimension_numbers = #tpu.dot_dimension_numbers<[1], [1], [0], [0], [0, 0, 1, 0], [], []>} : vector<32x64xf32>, vector<1x64xf32>, vector<32x1xf32> -> vector<32x1xf32>
    %394 = vector.broadcast %392 : vector<1x1xf32> to vector<32x1xf32>
    %395 = arith.mulf %393, %394 : vector<32x1xf32>
    %396 = math.tanh %395 : vector<32x1xf32>
    %cst_125 = arith.constant dense<0.000000e+00> : vector<1x32xf32>
    %397 = tpu.matmul %331, %386, %cst_125 {dimension_numbers = #tpu.dot_dimension_numbers<[1], [1], [0], [0], [0, 0, 1, 0], [], []>} : vector<1x64xf32>, vector<32x64xf32>, vector<1x32xf32> -> vector<1x32xf32>
    %398 = vector.broadcast %392 : vector<1x1xf32> to vector<1x32xf32>
    %399 = arith.mulf %397, %398 : vector<1x32xf32>
    %400 = math.tanh %399 : vector<1x32xf32>
    %401 = vector.broadcast %275 : vector<32x1xf32> to vector<32x2xf32>
    %402 = arith.mulf %3, %401 : vector<32x2xf32>
    %cst_126 = arith.constant dense<0.000000e+00> : vector<32x32xf32>
    %403 = tpu.matmul %402, %402, %cst_126 {dimension_numbers = #tpu.dot_dimension_numbers<[1], [1], [0], [0], [0, 0, 1, 0], [], []>} : vector<32x2xf32>, vector<32x2xf32>, vector<32x32xf32> -> vector<32x32xf32>
    %cst_127 = arith.constant dense<0.000000e+00> : vector<2x1xf32>
    %404 = tpu.matmul %2, %275, %cst_127 {dimension_numbers = #tpu.dot_dimension_numbers<[1], [0], [0], [1], [0, 0, 1, 1], [], []>} : vector<2x32xf32>, vector<32x1xf32>, vector<2x1xf32> -> vector<2x1xf32>
    %cst_128 = arith.constant 8.000000e-01 : f32
    %405 = vector.broadcast %cst_128 : f32 to vector<2x1xf32>
    %406 = arith.mulf %405, %404 : vector<2x1xf32>
    %407 = math.ceil %406 : vector<2x1xf32>
    %cst_129 = arith.constant dense<0.000000e+00> : vector<32x1xf32>
    %408 = tpu.matmul %3, %407, %cst_129 {dimension_numbers = #tpu.dot_dimension_numbers<[1], [0], [0], [1], [0, 0, 1, 1], [], []>} : vector<32x2xf32>, vector<2x1xf32>, vector<32x1xf32> -> vector<32x1xf32>
    %cst_130 = arith.constant 5.000000e-01 : f32
    %409 = vector.broadcast %cst_130 : f32 to vector<32x32xf32>
    %410 = arith.cmpf ogt, %403, %409 : vector<32x32xf32>
    %411 = arith.cmpi ne, %6, %5 : vector<32x32xi32>
    %412 = arith.andi %410, %411 : vector<32x32xi1>
    %413 = vector.broadcast %400 : vector<1x32xf32> to vector<32x32xf32>
    %414 = vector.broadcast %396 : vector<32x1xf32> to vector<32x32xf32>
    %415 = arith.cmpf ogt, %413, %414 : vector<32x32xf32>
    %416 = vector.broadcast %400 : vector<1x32xf32> to vector<32x32xf32>
    %417 = vector.broadcast %396 : vector<32x1xf32> to vector<32x32xf32>
    %418 = arith.cmpf oeq, %416, %417 : vector<32x32xf32>
    %419 = arith.cmpi slt, %6, %5 : vector<32x32xi32>
    %420 = arith.andi %418, %419 : vector<32x32xi1>
    %421 = arith.ori %415, %420 : vector<32x32xi1>
    %422 = arith.andi %412, %421 : vector<32x32xi1>
    %423 = arith.extui %422 : vector<32x32xi1> to vector<32x32xi32>
    %424 = arith.sitofp %423 : vector<32x32xi32> to vector<32x32xf32>
    %cst_131 = arith.constant dense<0.000000e+00> : vector<32xf32>
    %425 = vector.multi_reduction <add>, %424, %cst_131 [1] : vector<32x32xf32> to vector<32xf32>
    %426 = vector.shape_cast %425 : vector<32xf32> to vector<32x1xf32>
    %cst_132 = arith.constant 5.000000e-01 : f32
    %427 = vector.broadcast %cst_132 : f32 to vector<32x1xf32>
    %428 = arith.cmpf ogt, %275, %427 : vector<32x1xf32>
    %429 = arith.cmpf olt, %426, %408 : vector<32x1xf32>
    %430 = arith.andi %428, %429 : vector<32x1xi1>
    %cst_133 = arith.constant 1.000000e+00 : f32
    %cst_134 = arith.constant 0.000000e+00 : f32
    %431 = vector.broadcast %cst_133 : f32 to vector<32x1xf32>
    %432 = vector.broadcast %cst_134 : f32 to vector<32x1xf32>
    %433 = arith.select %430, %431, %432 : vector<32x1xi1>, vector<32x1xf32>
    %434 = arith.mulf %396, %433 : vector<32x1xf32>
    %435 = vector.broadcast %434 : vector<32x1xf32> to vector<32x64xf32>
    %436 = arith.mulf %386, %435 : vector<32x64xf32>
    %cst_135 = arith.constant dense<0.000000e+00> : vector<2x1xf32>
    %437 = tpu.matmul %2, %433, %cst_135 {dimension_numbers = #tpu.dot_dimension_numbers<[1], [0], [0], [1], [0, 0, 1, 1], [], []>} : vector<2x32xf32>, vector<32x1xf32>, vector<2x1xf32> -> vector<2x1xf32>
    %cst_136 = arith.constant 1.000000e+00 : f32
    %438 = vector.broadcast %cst_136 : f32 to vector<2x1xf32>
    %439 = arith.maximumf %437, %438 : vector<2x1xf32>
    %440 = tpu.reciprocal %439 {approx = true} : vector<2x1xf32> -> vector<2x1xf32>
    %cst_137 = arith.constant dense<0.000000e+00> : vector<2x64xf32>
    %441 = tpu.matmul %2, %436, %cst_137 {dimension_numbers = #tpu.dot_dimension_numbers<[1], [0], [0], [1], [0, 0, 1, 1], [], []>} : vector<2x32xf32>, vector<32x64xf32>, vector<2x64xf32> -> vector<2x64xf32>
    %442 = vector.broadcast %440 : vector<2x1xf32> to vector<2x64xf32>
    %443 = arith.mulf %441, %442 : vector<2x64xf32>
    %444 = arith.addf %286, %443 : vector<2x64xf32>
    %445 = vector.extract_strided_slice %3 {offsets = [0, 0], sizes = [32, 1], strides = [1, 1]} : vector<32x2xf32> to vector<32x1xf32>
    %446 = arith.mulf %445, %433 : vector<32x1xf32>
    %cst_138 = arith.constant 5.000000e-01 : f32
    %447 = vector.broadcast %cst_138 : f32 to vector<32x1xf32>
    %448 = arith.cmpf ogt, %446, %447 : vector<32x1xf32>
    %cst_139 = arith.constant -1.000000e+30 : f32
    %449 = vector.shape_cast %448 : vector<32x1xi1> to vector<32x1xi1>
    %450 = vector.broadcast %449 : vector<32x1xi1> to vector<32x64xi1>
    %451 = vector.broadcast %cst_139 : f32 to vector<32x64xf32>
    %452 = arith.select %450, %436, %451 : vector<32x64xi1>, vector<32x64xf32>
    %cst_140 = arith.constant dense<0xFF800000> : vector<64xf32>
    %453 = vector.multi_reduction <maximumf>, %452, %cst_140 [0] : vector<32x64xf32> to vector<64xf32>
    %454 = vector.shape_cast %453 : vector<64xf32> to vector<1x64xf32>
    %455 = vector.extract_strided_slice %437 {offsets = [0, 0], sizes = [1, 1], strides = [1, 1]} : vector<2x1xf32> to vector<1x1xf32>
    %cst_141 = arith.constant 5.000000e-01 : f32
    %456 = vector.broadcast %cst_141 : f32 to vector<1x1xf32>
    %457 = arith.cmpf ogt, %455, %456 : vector<1x1xf32>
    %cst_142 = arith.constant 0.000000e+00 : f32
    %458 = vector.shape_cast %457 : vector<1x1xi1> to vector<1x1xi1>
    %459 = vector.broadcast %458 : vector<1x1xi1> to vector<1x64xi1>
    %460 = vector.broadcast %cst_142 : f32 to vector<1x64xf32>
    %461 = arith.select %459, %454, %460 : vector<1x64xi1>, vector<1x64xf32>
    %c0_143 = arith.constant 0 : index
    %c0_144 = arith.constant 0 : index
    %462 = vector.load %arg11[%c0_143, %c0_144] : memref<2x64xf32, #tpu.memory_space<vmem>>, vector<1x64xf32>
    %463 = arith.addf %462, %461 : vector<1x64xf32>
    %c0_145 = arith.constant 0 : index
    %c0_146 = arith.constant 0 : index
    %464 = vector.load %arg11[%c0_145, %c0_146] : memref<2x64xf32, #tpu.memory_space<vmem>>, vector<1x64xf32>
    tpu.vector_store %arg11[%c0_145, %c0_146], %463 {strides = array<i32>} : memref<2x64xf32, #tpu.memory_space<vmem>>, vector<1x64xf32>,
    %465 = vector.extract_strided_slice %3 {offsets = [0, 1], sizes = [32, 1], strides = [1, 1]} : vector<32x2xf32> to vector<32x1xf32>
    %466 = arith.mulf %465, %433 : vector<32x1xf32>
    %cst_147 = arith.constant 5.000000e-01 : f32
    %467 = vector.broadcast %cst_147 : f32 to vector<32x1xf32>
    %468 = arith.cmpf ogt, %466, %467 : vector<32x1xf32>
    %cst_148 = arith.constant -1.000000e+30 : f32
    %469 = vector.shape_cast %468 : vector<32x1xi1> to vector<32x1xi1>
    %470 = vector.broadcast %469 : vector<32x1xi1> to vector<32x64xi1>
    %471 = vector.broadcast %cst_148 : f32 to vector<32x64xf32>
    %472 = arith.select %470, %436, %471 : vector<32x64xi1>, vector<32x64xf32>
    %cst_149 = arith.constant dense<0xFF800000> : vector<64xf32>
    %473 = vector.multi_reduction <maximumf>, %472, %cst_149 [0] : vector<32x64xf32> to vector<64xf32>
    %474 = vector.shape_cast %473 : vector<64xf32> to vector<1x64xf32>
    %475 = vector.extract_strided_slice %437 {offsets = [1, 0], sizes = [1, 1], strides = [1, 1]} : vector<2x1xf32> to vector<1x1xf32>
    %cst_150 = arith.constant 5.000000e-01 : f32
    %476 = vector.broadcast %cst_150 : f32 to vector<1x1xf32>
    %477 = arith.cmpf ogt, %475, %476 : vector<1x1xf32>
    %cst_151 = arith.constant 0.000000e+00 : f32
    %478 = vector.shape_cast %477 : vector<1x1xi1> to vector<1x1xi1>
    %479 = vector.broadcast %478 : vector<1x1xi1> to vector<1x64xi1>
    %480 = vector.broadcast %cst_151 : f32 to vector<1x64xf32>
    %481 = arith.select %479, %474, %480 : vector<1x64xi1>, vector<1x64xf32>
    %c1_152 = arith.constant 1 : index
    %c0_153 = arith.constant 0 : index
    %482 = vector.load %arg11[%c1_152, %c0_153] : memref<2x64xf32, #tpu.memory_space<vmem>>, vector<1x64xf32>
    %483 = arith.addf %482, %481 : vector<1x64xf32>
    %c1_154 = arith.constant 1 : index
    %c0_155 = arith.constant 0 : index
    %484 = vector.load %arg11[%c1_154, %c0_155] : memref<2x64xf32, #tpu.memory_space<vmem>>, vector<1x64xf32>
    tpu.vector_store %arg11[%c1_154, %c0_155], %483 {strides = array<i32>} : memref<2x64xf32, #tpu.memory_space<vmem>>, vector<1x64xf32>,
    %c0_156 = arith.constant 0 : index
    %c0_157 = arith.constant 0 : index
    %485 = vector.load %arg8[%c0_156, %c0_157] : memref<128x128xf32, #tpu.memory_space<vmem>>, vector<128x128xf32>
    %486 = vector.extract_strided_slice %485 {offsets = [0, 0], sizes = [64, 128], strides = [1, 1]} : vector<128x128xf32> to vector<64x128xf32>
    %cst_158 = arith.constant dense<0.000000e+00> : vector<2x128xf32>
    %487 = tpu.matmul %444, %486, %cst_158 {dimension_numbers = #tpu.dot_dimension_numbers<[1], [0], [0], [1], [0, 0, 1, 1], [], []>} : vector<2x64xf32>, vector<64x128xf32>, vector<2x128xf32> -> vector<2x128xf32>
    %c0_159 = arith.constant 0 : index
    %c0_160 = arith.constant 0 : index
    %488 = vector.load %arg11[%c0_159, %c0_160] : memref<2x64xf32, #tpu.memory_space<vmem>>, vector<2x64xf32>
    %489 = vector.extract_strided_slice %485 {offsets = [64, 0], sizes = [64, 128], strides = [1, 1]} : vector<128x128xf32> to vector<64x128xf32>
    %cst_161 = arith.constant dense<0.000000e+00> : vector<2x128xf32>
    %490 = tpu.matmul %488, %489, %cst_161 {dimension_numbers = #tpu.dot_dimension_numbers<[1], [0], [0], [1], [0, 0, 1, 1], [], []>} : vector<2x64xf32>, vector<64x128xf32>, vector<2x128xf32> -> vector<2x128xf32>
    %491 = arith.addf %487, %490 : vector<2x128xf32>
    %c0_162 = arith.constant 0 : index
    %c0_163 = arith.constant 0 : index
    %492 = vector.load %arg9[%c0_162, %c0_163] : memref<1x128xf32, #tpu.memory_space<vmem>>, vector<1x128xf32>
    %493 = vector.broadcast %492 : vector<1x128xf32> to vector<2x128xf32>
    %494 = arith.addf %491, %493 : vector<2x128xf32>
    %c0_164 = arith.constant 0 : index
    %c0_165 = arith.constant 0 : index
    %495 = vector.load %arg10[%c0_164, %c0_165] : memref<2x128xf32, #tpu.memory_space<vmem>>, vector<2x128xf32>
    tpu.vector_store %arg10[%c0_164, %c0_165], %494 {strides = array<i32>} : memref<2x128xf32, #tpu.memory_space<vmem>>, vector<2x128xf32>,
    return
  }
}

</mosaic_0001>

<bundles_post_ra>
// kernel: forward_padded.1
= control target key start
LH: loop header
LB: loop body
LE: loop exit
PB: predicated region body
PF: predicated region fallthrough
CT: control target
= control target key end

     0   :  { %15 = vsyncpa [#allocation4], 0  ;;  %s6168_s0 = inlined_call_operand.vmem [shape: f32[32,16], index: 0, kind: input, shape index: {}]   ;;  %s6169_s1 = inlined_call_operand.vmem [shape: f32[32,32], index: 1, kind: input, shape index: {}]   ;;  %s6170_s2 = inlined_call_operand.vmem [shape: f32[2,32], index: 2, kind: input, shape index: {}]   ;;  %s6171_s3 = inlined_call_operand.vmem [shape: f32[32,2], index: 3, kind: input, shape index: {}]   ;;  %s6172_s4 = inlined_call_operand.hbm [shape: f32[16,64], index: 4, kind: input, shape index: {}]   ;;  %s6173_s5 = inlined_call_operand.vmem [shape: f32[64,64], index: 5, kind: input, shape index: {}]   ;;  %s6174_s6 = inlined_call_operand.hbm [shape: f32[64,64], index: 6, kind: input, shape index: {}]   ;;  %s6175_s7 = inlined_call_operand.hbm [shape: f32[12,64], index: 7, kind: input, shape index: {}]   ;;  %s6176_s8 = inlined_call_operand.hbm [shape: f32[128,128], index: 8, kind: input, shape index: {}]   ;;  %s6177_s9 = inlined_call_operand.vmem [shape: f32[1,128], index: 9, kind: input, shape index: {}]   ;;  %s6178_s10 = inlined_call_operand.hbm [shape: f32[2,128], index: 10, kind: output, shape index: {}]  }
   0x1   :  { %16 = vsyncpa [#allocation7], 0 }
   0x2   :  { %17 = vsyncpa [#allocation10], 0 }
   0x3   :  { %18 = vsyncpa [#allocation5], 0  ;;  %s4864_s13 = smov [#allocation6]   ;;  %s4865_s15 = smov [#allocation3]  }
   0x4   :  { %s46_s14 = sshll.u32 %s4864_s13, 4  ;;  %s32_s16 = sshll.u32 %s4865_s15, 4  ;;  %s47_s14 = int_to_ptr.vmem [resolvable:$true] %s46_s14  ;;  %s4933_s16 = int_to_ptr.vmem [resolvable:$true] %s32_s16 }
   0x5   :  { %s4746_s19 = scalar_lea.hbm %s6174_s6, 1024 }
   0x6   :  { %p4747_p0 = scmp.ne.s32.totalorder %s6174_s6, %s4746_s19  ;;  %p4750_p1 = scmp.lt.u32.totalorder %s4746_s19, %s6174_s6 }
   0x8   :  { %p4752_p2 = pnand %p4750_p1, %p4747_p0 }
   0xa   :  { %4755 = shalt.err (!%p4752_p2)
}
   0xb   :  { %s4756_s24 = scalar_lea.vmem %s47_s14, 1024  ;;  %p4761_p4 = scmp.lt.s32.totalorder %s47_s14, %s47_s14 }
   0xc   :  { %p4757_p3 = scmp.ne.s32.totalorder %s47_s14, %s4756_s24  ;;  %p4762_p5 = scmp.lt.s32.totalorder %s4756_s24, %s4756_s24 }
   0xe   :  { %p4763_p6 = por %p4762_p5, %p4761_p4 }
  0x10   :  { %p4764_p7 = pnand %p4763_p6, %p4757_p3 }
  0x12   :  { %4767 = shalt.err (!%p4764_p7)
}
  0x13   :  { %s4866_s25 = smov 128   ;;  %s4867_s26 = smov 8  }
  0x14   :  { %52 = dma.hbm_to_vmem [thread:$0]  %s6174_s6, 1024, %s47_s14, [#allocation7], %s4866_s25, %s4866_s25, %s4867_s26  }
  0x15   :  { %s4768_s11 = scalar_lea.hbm %s6172_s4, 256 }
  0x16   :  { %p4769_p8 = scmp.ne.s32.totalorder %s6172_s4, %s4768_s11  ;;  %p4772_p9 = scmp.lt.u32.totalorder %s4768_s11, %s6172_s4 }
  0x18   :  { %p4774_p10 = pnand %p4772_p9, %p4769_p8 }
  0x1a   :  { %4777 = shalt.err (!%p4774_p10)
}
  0x1b   :  { %s4778_s18 = scalar_lea.vmem %s4933_s16, 256  ;;  %p4783_p12 = scmp.lt.s32.totalorder %s4933_s16, %s4933_s16 }
  0x1c   :  { %p4779_p11 = scmp.ne.s32.totalorder %s4933_s16, %s4778_s18  ;;  %p4784_p13 = scmp.lt.s32.totalorder %s4778_s18, %s4778_s18 }
  0x1e   :  { %p4785_p0 = por %p4784_p13, %p4783_p12 }
  0x20   :  { %p4786_p1 = pnand %p4785_p0, %p4779_p11 }
  0x22   :  { %4789 = shalt.err (!%p4786_p1)
}
  0x23   :  { %38 = dma.hbm_to_vmem [thread:$0]  %s6172_s4, 256, %s4933_s16, [#allocation4], %s4866_s25, %s4866_s25, %s4867_s26  }
  0x24   :  { %s4868_s19 = smov [#allocation8]   ;;  %s4869_s21 = smov [#allocation9]  }
  0x25   :  { %s58_s20 = sshll.u32 %s4868_s19, 4  ;;  %s70_s22 = sshll.u32 %s4869_s21, 4  ;;  %s59_s20 = int_to_ptr.vmem [resolvable:$true] %s58_s20  ;;  %s4970_s22 = int_to_ptr.vmem [resolvable:$true] %s70_s22 }
  0x26   :  { %s4790_s27 = scalar_lea.hbm %s6175_s7, 256 }
  0x27   :  { %p4791_p2 = scmp.ne.s32.totalorder %s6175_s7, %s4790_s27  ;;  %p4794_p3 = scmp.lt.u32.totalorder %s4790_s27, %s6175_s7 }
  0x29   :  { %p4796_p4 = pnand %p4794_p3, %p4791_p2 }
  0x2b   :  { %4799 = shalt.err (!%p4796_p4)
}
  0x2c   :  { %s4800_s4 = scalar_lea.vmem %s59_s20, 256  ;;  %p4805_p6 = scmp.lt.s32.totalorder %s59_s20, %s59_s20 }
  0x2d   :  { %p4801_p5 = scmp.ne.s32.totalorder %s59_s20, %s4800_s4  ;;  %p4806_p7 = scmp.lt.s32.totalorder %s4800_s4, %s4800_s4 }
  0x2f   :  { %p4807_p8 = por %p4806_p7, %p4805_p6 }
  0x31   :  { %p4808_p9 = pnand %p4807_p8, %p4801_p5 }
  0x33   :  { %4811 = shalt.err (!%p4808_p9)
}
  0x34   :  { %64 = dma.hbm_to_vmem [thread:$0]  %s6175_s7, 256, %s59_s20, [#allocation7], %s4866_s25, %s4866_s25, %s4867_s26  }
  0x35   :  { %s4812_s17 = scalar_lea.hbm %s6176_s8, 2048 }
  0x36   :  { %p4813_p10 = scmp.ne.s32.totalorder %s6176_s8, %s4812_s17  ;;  %p4816_p11 = scmp.lt.u32.totalorder %s4812_s17, %s6176_s8 }
  0x38   :  { %p4818_p12 = pnand %p4816_p11, %p4813_p10 }
  0x3a   :  { %4821 = shalt.err (!%p4818_p12)
}
  0x3b   :  { %s4822_s21 = scalar_lea.vmem %s4970_s22, 2048  ;;  %p4827_p0 = scmp.lt.s32.totalorder %s4970_s22, %s4970_s22 }
  0x3c   :  { %p4823_p13 = scmp.ne.s32.totalorder %s4970_s22, %s4822_s21  ;;  %p4828_p1 = scmp.lt.s32.totalorder %s4822_s21, %s4822_s21 }
  0x3e   :  { %p4829_p2 = por %p4828_p1, %p4827_p0 }
  0x40   :  { %p4830_p3 = pnand %p4829_p2, %p4823_p13 }
  0x42   :  { %4833 = shalt.err (!%p4830_p3)
}
  0x43   :  { %76 = dma.hbm_to_vmem [thread:$0]  %s6176_s8, 2048, %s4970_s22, [#allocation10], %s4866_s25, %s4866_s25, %s4867_s26  }
  0x44   :  { %4856 = dma.done.wait [#allocation4], 256  }
  0x45   :  { %4857 = vsyncadd [#allocation4], 4294967040 }
  0x46   :  { %4858 = dma.done.wait [#allocation7], 1280  }
  0x47   :  { %4859 = vsyncadd [#allocation7], 4294966016 }
  0x48   :  { %4860 = dma.done.wait [#allocation10], 2048  }
  0x49   :  { %4861 = vsyncadd [#allocation10], 4294965248  ;;  %v6204_v0 = vmov 1.0|1.0   ;;  %vm6181_vm0 = vcmask 261120   ;;  %v5014_v1 = vld [vmem:[%s6169_s1] sm:$0xff]  ;;  %v106_v55 = vlaneseq }
  0x4a   :  { %4385 = vmatprep.subr.bf16.mxu0 %v6204_v0  ;;  %v5019_v2 = vld [vmem:[%s6169_s1 + $0x8] sm:$0xff]  ;;  %v5024_v3 = vld [vmem:[%s6169_s1 + $0x10] sm:$0xff]  ;;  %vm227_vm1 = vcmask 130048   ;;  %4041 = vmatprep.mubr.msk.f32.mxu0 %vm6181_vm0, %v5014_v1  ;;  %v91_v7 = vld [vmem:[%s6168_s0] sm:$0xff]  ;;  %v6202_v12 = vmov 0   ;;  %vm6179_vm6 = vcmask 519171  }
  0x4b   :  { %4386 = vmatpush3.bf16.msra.mxu0 %v6204_v0  ;;  %v115_v4 = vld [vmem:[#allocation3] sm:$0xff]  ;;  %v116_v5 = vld [vmem:[#allocation3 + $0x8] sm:$0xff]  ;;  %v5038_v8 = vld [vmem:[%s6169_s1 + $0x18] sm:$0xff]  ;;  %4051 = vmatprep.mubr.msk.f32.mxu1 %vm227_vm1, %v91_v7  ;;  %v6208_v46 = vmov 0.0|0.0   ;;  %vm6194_vm7 = vcmask 15360   ;;  %v6219_v50 = vmov 0 }
  0x4c   :  { %4387 = vmatprep.subr.bf16.mxu0 %v6204_v0  ;;  %v4389_v6 = vpack.c.bf16 %v116_v5, %v115_v4  ;;  %v92_v9 = vld [vmem:[%s6168_s0 + $0x8] sm:$0xff]  ;;  %v93_v10 = vld [vmem:[%s6168_s0 + $0x10] sm:$0xff]  ;;  %v94_v11 = vld [vmem:[%s6168_s0 + $0x18] sm:$0xff]  ;;  %4603 = vset.pattern.permute.xlu0 %v6202_v12  ;;  %vm6186_vm9 = vmmov 0   ;;  %v6206_v51 = vmov 0.0   ;;  %v5129_v56 = vshrl.u32 %v106_v55, 7 }
  0x4d   :  { %4604 = vset.pattern.permute.xlu1 %v6202_v12  ;;  %v5068_v43 = vld [vmem:[#allocation8] sm:$0xff]  ;;  %v5080_v47 = vld [vmem:[%s6171_s3] sm:$0xff]  ;;  %v5085_v48 = vld [vmem:[%s6171_s3 + $0x8] sm:$0xff]  ;;  %vm6180_vm10 = vcmask 523264   ;;  %vm6184_vm12 = vcmask 1041408  }
  0x4e   :  { %4390 = vmatprep.subr.bf16.mxu1 %v4389_v6  ;;  %v5072_v44 = vmul.f32 %v5068_v43, %v5068_v43  ;;  %v4409_v49 = vpack.c.bf16 %v5085_v48, %v5080_v47  ;;  %vm5091_vm8 = vmpackc.low %vm6194_vm7, %vm6194_vm7  ;;  %v5106_v52 = vld [vmem:[%s6171_s3 + $0x10] sm:$0xff]  ;;  %v5111_v53 = vld [vmem:[%s6171_s3 + $0x18] sm:$0xff]  ;;  %v5132_v57 = vsub.s32 0, %v5129_v56 }
  0x4f   :  { %4388 = vmatpush3.bf16.msra.mxu0 %v6204_v0  ;;  %4392 = vmatpush3.bf16.msra.mxu1 %v4389_v6  ;;  %v6220_v50 = vsel %vm5091_vm8, 4294967295, %v6219_v50  ;;  %v4415_v54 = vpack.c.bf16 %v5111_v53, %v5106_v52  ;;  %vm5168_vm11 = vmpackc.low %vm6180_vm10, %vm6180_vm10 }
  0x50   :  { %v513_v45 = vsel %vm6179_vm6, %v5072_v44, 0.0  ;;  %4401 = vmatprep.subr.bf16.mxu0 %v6208_v46  ;;  %v441_v60 = vrot.slane %v5068_v43, %v5132_v57 }
  0x52   :  { %4042 = vmatmul.mubr.msk.f32.vlgmr.msra.gmra.mrb[0].mxu0 %vm6181_vm0, %v5019_v2  ;;  %4052 = vmatmul.mubr.msk.f32.vlgmr.msra.gmra.mrb[0].mxu1 %vm227_vm1, %v92_v9 }
  0x53   :  { %4044 = vmatprep.mubr.msk.f32.mxu0 %vm6181_vm0, %v5024_v3  ;;  %4054 = vmatprep.mubr.msk.f32.mxu1 %vm227_vm1, %v93_v10 }
  0x56   :  { %4045 = vmatmul.mubr.msk.f32.gmra.mrb[2].mxu0 %vm6181_vm0, %v5038_v8  ;;  %4055 = vmatmul.mubr.msk.f32.gmra.mrb[2].mxu1 %vm227_vm1, %v94_v11 }
  0x57   :  { %4065 = vmatprep.mubr.msk.f32.mxu1 %vm6181_vm0, %v5014_v1  ;;  %4079 = vmatprep.mubr.msk.f32.mxu0 %vm6186_vm9, %v6206_v51 }
 0x125   :  { %v4043_v13 = vpop.f32.mrb[0].mxu0  ;;  %v4053_v21 = vpop.f32.mrb[0].mxu1 }
 0x126   :  { %v196_v14 = vpop.f32.mrb[1].mxu0  ;;  %v202_v15 = vadd.f32 1.0, %v4043_v13  ;;  %v306_v24 = vpop.f32.mrb[1].mxu1 }
 0x127   :  { %v197_v16 = vadd.f32 1.0, %v196_v14 }
 0x128   :  { %vm216_vm3 = vcmp.gt.f32.partialorder %v202_v15, 0.0 }
 0x129   :  { %4656 = vrsqrt.f32 %v197_v16  ;;  %v4046_v17 = vpop.f32.mrb[2].mxu0  ;;  %vm215_vm2 = vcmp.gt.f32.partialorder %v197_v16, 0.0  ;;  %v4056_v26 = vpop.f32.mrb[2].mxu1 }
 0x12a   :  { %v206_v18 = vpop.f32.mrb[3].mxu0  ;;  %4658 = vrsqrt.f32 %v202_v15  ;;  %v212_v19 = vadd.f32 1.0, %v4046_v17  ;;  %v316_v30 = vpop.f32.mrb[3].mxu1 }
 0x12b   :  { %v207_v20 = vadd.f32 1.0, %v206_v18 }
 0x12c   :  { %vm218_vm5 = vcmp.gt.f32.partialorder %v212_v19, 0.0 }
 0x12d   :  { %4660 = vrsqrt.f32 %v207_v20  ;;  %vm217_vm4 = vcmp.gt.f32.partialorder %v207_v20, 0.0 }
 0x12e   :  { %4662 = vrsqrt.f32 %v212_v19 }
 0x133   :  { %v4657_v22 = vpop.eup %4656 }
 0x134   :  { %v223_v23 = vsel %vm215_vm2, %v4657_v22, 0.0  ;;  %v4659_v25 = vpop.eup %4658 }
 0x135   :  { %327 = vperm.xlu0 %4603, %v223_v23   ;;  %v224_v29 = vsel %vm216_vm3, %v4659_v25, 0.0 }
 0x137   :  { %v4661_v27 = vpop.eup %4660 }
 0x138   :  { %v225_v28 = vsel %vm217_vm4, %v4661_v27, 0.0  ;;  %v4663_v31 = vpop.eup %4662 }
 0x139   :  { %337 = vperm.xlu1 %4604, %v225_v28   ;;  %332 = vperm.xlu0 %4603, %v224_v29   ;;  %v226_v32 = vsel %vm218_vm5, %v4663_v31, 0.0 }
 0x13d   :  { %342 = vperm.xlu1 %4604, %v226_v32  }
 0x158   :  { %514 = vadd.xlane.f32.xlu0 %v513_v45 }
 0x1b4   :  { %v328_v33 = vpop.permute.xlu0 %327 }
 0x1b5   :  { %v345_v36 = vmul.f32 %v328_v33, %v306_v24 }
 0x1b8   :  { %v5059_v34 = vpop.permute.xlu1 %337  ;;  %v333_v35 = vpop.permute.xlu0 %332 }
 0x1b9   :  { %v346_v37 = vmul.f32 %v4053_v21, %v333_v35  ;;  %v347_v40 = vmul.f32 %v5059_v34, %v316_v30 }
 0x1bb   :  { %v4393_v38 = vpack.c.bf16 %v346_v37, %v345_v36 }
 0x1bc   :  { %v343_v39 = vpop.permute.xlu1 %342 }
 0x1bd   :  { %v348_v41 = vmul.f32 %v4056_v26, %v343_v39  ;;  %4394 = vmatprep.subr.bf16.mxu1 %v4393_v38 }
 0x1be   :  { %4396 = vmatpush3.bf16.msra.mxu1 %v4393_v38 }
 0x1bf   :  { %v4397_v42 = vpack.c.bf16 %v348_v41, %v347_v40 }
 0x1c1   :  { %4398 = vmatprep.subr.bf16.mxu1 %v4397_v42 }
 0x1c2   :  { %4400 = vmatpush3.bf16.msra.mxu1 %v4397_v42 }
 0x1c3   :  { %4411 = vmatprep.subr.msk.bf16.mxu1 %vm5091_vm8, %v4409_v49 }
 0x1c5   :  { %4066 = vmatmul.mubr.msk.f32.vlgmr.msra.gmra.mrb[4].mxu1 %vm6181_vm0, %v5019_v2 }
 0x1c6   :  { %4068 = vmatprep.mubr.msk.f32.mxu1 %vm6181_vm0, %v5024_v3 }
 0x1c9   :  { %4069 = vmatmul.mubr.msk.f32.gmra.mrb[6].mxu1 %vm6181_vm0, %v5038_v8 }
 0x1ca   :  { %4090 = vmatprep.mubr.msk.f32.mxu1 %vm6194_vm7, %v5080_v47 }
 0x1cb   :  { %4414 = vmatpush3.bf16.xpose.msk.msra.mxu1 %vm5091_vm8, %v4409_v49 }
 0x1cc   :  { %4417 = vmatprep.subr.msk.bf16.mxu1 %vm5091_vm8, %v4415_v54 }
 0x1d3   :  { %4420 = vmatpush3.bf16.xpose.msk.msra.mxu1 %vm5091_vm8, %v4415_v54 }
 0x1d4   :  { %4425 = vmatprep.subr.bf16.mxu1 %v6208_v46 }
 0x1da   :  { %4091 = vmatmul.mubr.msk.f32.vlgmr.msra.gmra.mrb[8].mxu1 %vm6194_vm7, %v5085_v48 }
 0x1db   :  { %4093 = vmatprep.mubr.msk.f32.mxu1 %vm6194_vm7, %v5106_v52 }
 0x1de   :  { %4094 = vmatmul.mubr.msk.f32.gmra.mrb[10].mxu1 %vm6194_vm7, %v5111_v53 }
 0x1df   :  { %4123 = vmatprep.mubr.msk.f32.mxu1 %vm6186_vm9, %v6206_v51 }
 0x298   :  { %v4067_v58 = vpop.f32.mrb[4].mxu1 }
 0x299   :  { %v421_v59 = vadd.f32 %v4067_v58, %v346_v37  ;;  %v415_v61 = vpop.f32.mrb[5].mxu1 }
 0x29a   :  { %v416_v62 = vadd.f32 %v415_v61, %v345_v36 }
 0x29b   :  { %v435_v63 = vmul.f32 %v421_v59, %v333_v35 }
 0x29c   :  { %v434_v4 = vmul.f32 %v416_v62, %v328_v33  ;;  %v4070_v5 = vpop.f32.mrb[6].mxu1 }
 0x29d   :  { %v443_v6 = vadd.f32 %v441_v60, %v435_v63  ;;  %v431_v7 = vadd.f32 %v4070_v5, %v348_v41  ;;  %v425_v9 = vpop.f32.mrb[7].mxu1 }
 0x29e   :  { %v442_v10 = vadd.f32 %v441_v60, %v434_v4  ;;  %v426_v11 = vadd.f32 %v425_v9, %v347_v40 }
 0x29f   :  { %v450_v13 = vsel %vm6180_vm10, %v443_v6, 0.0  ;;  %v437_v14 = vmul.f32 %v431_v7, %v343_v39  ;;  %v6210_v7 = vsub.s32 2, %v5129_v56 }
 0x2a0   :  { %v449_v15 = vsel %vm6180_vm10, %v442_v10, 0.0  ;;  %v436_v16 = vmul.f32 %v426_v11, %v5059_v34 }
 0x2a1   :  { %v451_v17 = vadd.f32 %v450_v13, %v449_v15  ;;  %v445_v18 = vadd.f32 %v441_v60, %v437_v14  ;;  %v502_v11 = vrot.slane %v5068_v43, %v6210_v7  ;;  %v5154_v13 = vsub.s32 3, %v5129_v56 }
 0x2a2   :  { %v444_v19 = vadd.f32 %v441_v60, %v436_v16 }
 0x2a3   :  { %v454_v22 = vsel %vm6180_vm10, %v445_v18, 0.0 }
 0x2a4   :  { %v452_v20 = vsel %vm6180_vm10, %v444_v19, 0.0 }
 0x2a5   :  { %v453_v21 = vadd.f32 %v452_v20, %v451_v17 }
 0x2a7   :  { %v455_v23 = vadd.f32 %v454_v22, %v453_v21  ;;  %v521_v22 = vrot.slane %v5068_v43, %v5154_v13 }
 0x2a9   :  { %v456_v24 = vrot.slane %v455_v23, 4 }
 0x2ab   :  { %v457_v25 = vadd.f32 %v456_v24, %v455_v23 }
 0x2ad   :  { %v458_v26 = vrot.slane %v457_v25, 2 }
 0x2af   :  { %v459_v27 = vadd.f32 %v458_v26, %v457_v25 }
 0x2b1   :  { %v460_v28 = vrot.slane %v459_v27, 1 }
 0x2b3   :  { %v461_v29 = vadd.f32 %v460_v28, %v459_v27 }
 0x2b5   :  { %v462_v30 = vmul.f32 0.03125, %v461_v29 }
 0x2b7   :  { %v463_v31 = vsub.f32 %v442_v10, %v462_v30  ;;  %v464_v32 = vsub.f32 %v443_v6, %v462_v30  ;;  %v465_v33 = vsub.f32 %v444_v19, %v462_v30  ;;  %v466_v34 = vsub.f32 %v445_v18, %v462_v30 }
 0x2b8   :  { %v6211_v6 = vsub.s32 1, %v5129_v56 }
 0x2b9   :  { %v467_v35 = vmul.f32 %v463_v31, %v463_v31  ;;  %v468_v36 = vmul.f32 %v464_v32, %v464_v32  ;;  %v469_v37 = vmul.f32 %v465_v33, %v465_v33  ;;  %v470_v38 = vmul.f32 %v466_v34, %v466_v34 }
 0x2ba   :  { %v494_v9 = vrot.slane %v5068_v43, %v6211_v6 }
 0x2bb   :  { %v471_v39 = vsel %vm6180_vm10, %v467_v35, 0.0  ;;  %v472_v40 = vsel %vm6180_vm10, %v468_v36, 0.0  ;;  %v474_v42 = vsel %vm6180_vm10, %v469_v37, 0.0  ;;  %v476_v49 = vsel %vm6180_vm10, %v470_v38, 0.0 }
 0x2bc   :  { %v473_v41 = vadd.f32 %v472_v40, %v471_v39 }
 0x2be   :  { %v475_v45 = vadd.f32 %v474_v42, %v473_v41  ;;  %v551_v42 = vrot.slane %v5068_v43, 3 }
 0x2c0   :  { %v477_v54 = vadd.f32 %v476_v49, %v475_v45  ;;  %v5200_v45 = vld [vmem:[%s6170_s2] sm:$0x3]  ;;  %v4092_v49 = vpop.f32.mrb[8].mxu1 }
 0x2c1   :  { %vm904_vm13 = vcmp.gt.f32.partialorder %v4092_v49, 0.5 }
 0x2c2   :  { %v478_v58 = vrot.slane %v477_v54, 4 }
 0x2c4   :  { %v479_v59 = vadd.f32 %v478_v58, %v477_v54  ;;  %v720_v54 = vpop.f32.mrb[9].mxu1 }
 0x2c5   :  { %v4095_v58 = vpop.f32.mrb[10].mxu1  ;;  %vm903_vm15 = vcmp.gt.f32.partialorder %v720_v54, 0.5 }
 0x2c6   :  { %v480_v60 = vrot.slane %v479_v59, 2  ;;  %vm906_vm5 = vcmp.gt.f32.partialorder %v4095_v58, 0.5 }
 0x2c8   :  { %v481_v61 = vadd.f32 %v480_v60, %v479_v59  ;;  %v730_v59 = vpop.f32.mrb[11].mxu1  ;;  %v515_v60 = vpop.xlane.xlu0 %514 }
 0x2c9   :  { %vm905_vm2 = vcmp.gt.f32.partialorder %v730_v59, 0.5 }
 0x2ca   :  { %v482_v62 = vrot.slane %v481_v61, 1 }
 0x2cc   :  { %v483_v63 = vadd.f32 %v482_v62, %v481_v61  ;;  %v516_v61 = vadd.f32 1e-24, %v515_v60 }
 0x2ce   :  { %v484_v4 = vmul.f32 0.03125, %v483_v63 }
 0x2d0   :  { %v485_v5 = vadd.f32 1e-05, %v484_v4 }
 0x2d2   :  { %4664 = vrsqrt.f32 %v485_v5 }
 0x2d3   :  { %4666 = vrsqrt.f32 %v516_v61 }
 0x2dc   :  { %v4665_v10 = vpop.eup %4664 }
 0x2dd   :  { %v487_v14 = vmul.f32 %v4665_v10, %v463_v31  ;;  %v488_v15 = vmul.f32 %v4665_v10, %v464_v32  ;;  %v489_v16 = vmul.f32 %v4665_v10, %v465_v33  ;;  %v490_v17 = vmul.f32 %v4665_v10, %v466_v34  ;;  %v4667_v62 = vpop.eup %4666 }
 0x2de   :  { %v6221_v31 = vmov 0  ;;  %v541_v4 = vrot.slane %v4667_v62, %v5154_v13  ;;  %v637_v5 = vrot.slane %v4667_v62, 3 }
 0x2df   :  { %v495_v18 = vmul.f32 %v494_v9, %v487_v14  ;;  %v496_v19 = vmul.f32 %v494_v9, %v488_v15  ;;  %v497_v20 = vmul.f32 %v494_v9, %v489_v16  ;;  %v498_v21 = vmul.f32 %v494_v9, %v490_v17 }
 0x2e0   :  { %v6222_v31 = vsel %vm5168_vm11, 4294967295, %v6221_v31 }
 0x2e1   :  { %v503_v23 = vadd.f32 %v502_v11, %v495_v18  ;;  %v504_v24 = vadd.f32 %v502_v11, %v496_v19  ;;  %v505_v25 = vadd.f32 %v502_v11, %v497_v20  ;;  %v506_v26 = vadd.f32 %v502_v11, %v498_v21 }
 0x2e2   :  { %v5208_v20 = vadd.s32 8, %v5129_v56  ;;  %v5211_v21 = vand.u32 127, %v106_v55 }
 0x2e3   :  { %v5158_v27 = vmax.f32 %v503_v23, 0.0  ;;  %v5160_v28 = vmax.f32 %v504_v24, 0.0  ;;  %v5162_v29 = vmax.f32 %v505_v25, 0.0  ;;  %v5164_v30 = vmax.f32 %v506_v26, 0.0 }
 0x2e4   :  { %v5214_v26 = vadd.s32 16, %v5129_v56  ;;  %vm6183_vm14 = vcmp.ne.s32.totalorder %v5211_v21, %v5208_v20  ;;  %vm6182_vm1 = vcmp.ne.s32.totalorder %v5211_v21, %v5129_v56 }
 0x2e5   :  { %v4402_v32 = vpack.c.bf16 %v5160_v28, %v5158_v27  ;;  %v523_v33 = vmul.f32 %v521_v22, %v5160_v28  ;;  %v522_v34 = vmul.f32 %v521_v22, %v5158_v27  ;;  %v524_v37 = vmul.f32 %v521_v22, %v5162_v29  ;;  %vm5230_vm4 = vmand %vm904_vm13, %vm6183_vm14 }
 0x2e6   :  { %v525_v38 = vmul.f32 %v521_v22, %v5164_v30  ;;  %v4406_v41 = vpack.c.bf16 %v5164_v30, %v5162_v29  ;;  %vm6185_vm3 = vcmp.ne.s32.totalorder %v5211_v21, %v5214_v26 }
 0x2e7   :  { %4404 = vmatpush3.bf16.xpose.msk.msra.mxu0 %vm5168_vm11, %v4402_v32  ;;  %v529_v35 = vsel %vm6180_vm10, %v523_v33, 0.0  ;;  %v526_v36 = vsel %vm6180_vm10, %v522_v34, 0.0  ;;  %v532_v39 = vsel %vm6180_vm10, %v524_v37, 0.0  ;;  %v5217_v32 = vadd.s32 24, %v5129_v56  ;;  %vm5252_vm13 = vmand %vm905_vm2, %vm6185_vm3 }
 0x2e8   :  { %530 = vadd.xlane.f32.xlu0 %v529_v35  ;;  %527 = vadd.xlane.f32.xlu1 %v526_v36  ;;  %v535_v40 = vsel %vm6180_vm10, %v525_v38, 0.0  ;;  %vm6195_vm3 = vcmp.lt.s32.totalorder %v5211_v21, %v5129_v56 }
 0x2e9   :  { %4405 = vmatprep.subr.bf16.mxu0 %v6208_v46  ;;  %vm6190_vm6 = vcmp.ne.s32.totalorder %v5211_v21, %v5217_v32 }
 0x2ea   :  { %vm5261_vm14 = vmand %vm906_vm5, %vm6190_vm6 }
 0x2ec   :  { %533 = vadd.xlane.f32.xlu0 %v532_v39  ;;  %536 = vadd.xlane.f32.xlu1 %v535_v40  ;;  %v1277_v39 = vld [vmem:[%s6173_s5] sm:$0xff]  ;;  %v1278_v40 = vld [vmem:[%s6173_s5 + $0x8] sm:$0xff] }
 0x2ef   :  { %4408 = vmatpush3.bf16.xpose.msk.msra.mxu0 %vm5168_vm11, %v4406_v41 }
 0x2f0   :  { %4421 = vmatprep.subr.bf16.mxu0 %v6208_v46 }
 0x2f6   :  { %4080 = vmatmul.mubr.msk.f32.vlgmr.msra.gmra.mrb[4].mxu0 %vm6180_vm10, %v551_v42  ;;  %vm6191_vm10 = vcmp.lt.s32.totalorder %v5211_v21, %v5208_v20 }
 0x2f7   :  { %4422 = vmatpush3.bf16.msra.mxu0 %v6204_v0  ;;  %4104 = vmatprep.mubr.msk.f32.mxu0 %vm6186_vm9, %v6206_v51 }
 0x2f8   :  { %4423 = vmatprep.subr.bf16.mxu0 %v6208_v46 }
 0x2fb   :  { %4424 = vmatpush3.bf16.msra.mxu0 %v6204_v0 }
 0x2fe   :  { %4105 = vmatmul.mubr.msk.f32.vlgmr.msra.gmra.mrb[6].mxu0 %vm6181_vm0, %v5200_v45  ;;  %vm5242_vm0 = vmand %vm903_vm15, %vm6182_vm1 }
 0x2ff   :  { %4109 = vmatprep.mubr.msk.f32.mxu0 %vm6194_vm7, %v5080_v47 }
 0x375   :  { %v531_v63 = vpop.xlane.xlu0 %530  ;;  %v528_v9 = vpop.xlane.xlu1 %527 }
 0x376   :  { %v543_v11 = vmul.f32 %v541_v4, %v531_v63  ;;  %v542_v16 = vmul.f32 %v541_v4, %v528_v9 }
 0x379   :  { %v534_v17 = vpop.xlane.xlu0 %533  ;;  %v537_v19 = vpop.xlane.xlu1 %536 }
 0x37a   :  { %v544_v18 = vmul.f32 %v541_v4, %v534_v17  ;;  %v545_v22 = vmul.f32 %v541_v4, %v537_v19 }
 0x3c9   :  { %v632_v10 = vpop.f32.mrb[4].mxu0 }
 0x3ca   :  { %v639_v14 = vmul.f32 %v637_v5, %v632_v10  ;;  %v4081_v15 = vpop.f32.mrb[5].mxu0 }
 0x3cc   :  { %4668 = vtanh.f32 %v639_v14 }
 0x3cd   :  { %4670 = vtanh.f32 %v543_v11 }
 0x3ce   :  { %4672 = vtanh.f32 %v542_v16 }
 0x3cf   :  { %4674 = vtanh.f32 %v544_v18 }
 0x3d0   :  { %4676 = vtanh.f32 %v545_v22 }
 0x3d1   :  { %v808_v23 = vpop.f32.mrb[6].mxu0 }
 0x3d2   :  { %v812_v24 = vmul.f32 0.8, %v808_v23  ;;  %v4106_v25 = vpop.f32.mrb[7].mxu0 }
 0x3d4   :  { %v813_v33 = vceil.f32 %v812_v24 }
 0x3d6   :  { %v4669_v55 = vpop.eup %4668  ;;  %4107 = vmatprep.subr.msk.mxu0 %vm6184_vm12, %v813_v33 }
 0x3d7   :  { %v918_v34 = vrot.slane %v4669_v55, %v5132_v57  ;;  %4108 = vmatpush3.msk.msra.mxu0 %vm6184_vm12, %v813_v33  ;;  %v4671_v36 = vpop.eup %4670 }
 0x3d8   :  { %4110 = vmatmul.mubr.msk.f32.vlgmr.msra.gmra.mrb[8].mxu0 %vm6194_vm7, %v5085_v48  ;;  %4431 = vmatprep.subr.bf16.mxu0 %v6208_v46  ;;  %v4673_v38 = vpop.eup %4672 }
 0x3d9   :  { %4112 = vmatprep.mubr.msk.f32.mxu0 %vm6194_vm7, %v5106_v52  ;;  %vm920_vm15 = vcmp.gt.f32.partialorder %v918_v34, %v4671_v36  ;;  %vm924_vm1 = vcmp.eq.f32.partialorder %v918_v34, %v4671_v36  ;;  %vm923_vm2 = vcmp.eq.f32.partialorder %v918_v34, %v4673_v38  ;;  %vm919_vm11 = vcmp.gt.f32.partialorder %v918_v34, %v4673_v38  ;;  %v4675_v41 = vpop.eup %4674 }
 0x3da   :  { %vm932_vm12 = vmand %vm924_vm1, %vm6191_vm10  ;;  %vm925_vm1 = vcmp.eq.f32.partialorder %v918_v34, %v4675_v41  ;;  %vm6198_vm10 = vcmp.lt.s32.totalorder %v5211_v21, %v5214_v26  ;;  %v4677_v54 = vpop.eup %4676 }
 0x3db   :  { %vm936_vm9 = vmor %vm920_vm15, %vm932_vm12  ;;  %vm6231_vm12 = vmmov 0   ;;  %vm6232_vm15 = vcmask 261120  }
 0x3dc   :  { %4113 = vmatmul.mubr.msk.f32.gmra.mrb[10].mxu0 %vm6194_vm7, %v5111_v53  ;;  %vm940_vm5 = vmand %vm5230_vm4, %vm936_vm9  ;;  %vm921_vm7 = vcmp.gt.f32.partialorder %v918_v34, %v4675_v41 }
 0x3dd   :  { %v3748_v42 = vsel %vm940_vm5, 1.0, %v6206_v51  ;;  %vm931_vm6 = vmand %vm923_vm2, %vm6195_vm3  ;;  %4134 = vmatprep.mubr.msk.f32.mxu0 %vm6231_vm12, %v6206_v51  ;;  %vm926_vm2 = vcmp.eq.f32.partialorder %v918_v34, %v4677_v54  ;;  %vm6197_vm5 = vcmp.lt.s32.totalorder %v5211_v21, %v5217_v32 }
 0x3de   :  { %v954_v49 = vsel %vm6232_vm15, %v3748_v42, 0.0  ;;  %vm935_vm8 = vmor %vm919_vm11, %vm931_vm6  ;;  %vm922_vm6 = vcmp.gt.f32.partialorder %v918_v34, %v4677_v54 }
 0x3df   :  { %955 = vadd.xlane.f32.xlu1 %v954_v49  ;;  %vm939_vm9 = vmand %vm5242_vm0, %vm935_vm8 }
 0x3e0   :  { %v3747_v58 = vsel %vm939_vm9, 1.0, %v6206_v51  ;;  %vm933_vm4 = vmand %vm925_vm1, %vm6198_vm10 }
 0x3e1   :  { %vm6233_vm3 = vmmov %vm6232_vm15 }
 0x3e2   :  { %v951_v59 = vsel %vm6233_vm3, %v3747_v58, 0.0  ;;  %vm937_vm15 = vmor %vm921_vm7, %vm933_vm4  ;;  %v1280_v58 = vld [vmem:[%s6173_s5 + $0x18] sm:$0xff] }
 0x3e3   :  { %952 = vadd.xlane.f32.xlu0 %v951_v59  ;;  %vm941_vm11 = vmand %vm5252_vm13, %vm937_vm15  ;;  %v1282_v59 = vld [vmem:[%s6173_s5 + $0x28] sm:$0xff] }
 0x3e4   :  { %v3749_v60 = vsel %vm941_vm11, 1.0, %v6206_v51  ;;  %vm934_vm0 = vmand %vm926_vm2, %vm6197_vm5 }
 0x3e5   :  { %vm938_vm8 = vmor %vm922_vm6, %vm934_vm0 }
 0x3e6   :  { %vm6234_vm1 = vmmov %vm6233_vm3 }
 0x3e7   :  { %v957_v61 = vsel %vm6234_vm1, %v3749_v60, 0.0  ;;  %vm942_vm9 = vmand %vm5261_vm14, %vm938_vm8 }
 0x3e8   :  { %958 = vadd.xlane.f32.xlu0 %v957_v61  ;;  %v3750_v62 = vsel %vm942_vm9, 1.0, %v6206_v51  ;;  %vm6235_vm7 = vmmov %vm6234_vm1  ;;  %v1283_v61 = vld [vmem:[%s6173_s5 + $0x30] sm:$0xff] }
 0x3e9   :  { %v960_v63 = vsel %vm6235_vm7, %v3750_v62, 0.0  ;;  %vm6238_vm6 = vmmov %vm6234_vm1  ;;  %v1284_v62 = vld [vmem:[%s6173_s5 + $0x38] sm:$0xff] }
 0x3ea   :  { %961 = vadd.xlane.f32.xlu1 %v960_v63  ;;  %vm6239_vm11 = vmmov %vm6234_vm1  ;;  %v4457_v63 = vpack.c.bf16 %v1284_v62, %v1283_v61 }
 0x3eb   :  { %vm6240_vm0 = vmmov %vm6234_vm1 }
 0x3ec   :  { %vm6241_vm8 = vmmov %vm6240_vm0 }
 0x3ed   :  { %vm6242_vm1 = vmmov %vm6240_vm0 }
 0x3ee   :  { %vm6243_vm9 = vmmov %vm6240_vm0 }
 0x3ef   :  { %vm6244_vm7 = vmmov %vm6240_vm0 }
 0x46c   :  { %v956_v4 = vpop.xlane.xlu1 %955 }
 0x470   :  { %v953_v5 = vpop.xlane.xlu0 %952 }
 0x475   :  { %v959_v22 = vpop.xlane.xlu0 %958 }
 0x477   :  { %v962_v17 = vpop.xlane.xlu1 %961 }
 0x4ab   :  { %v4111_v9 = vpop.f32.mrb[8].mxu0 }
 0x4ac   :  { %vm965_vm3 = vcmp.lt.f32.partialorder %v956_v4, %v4111_v9  ;;  %v884_v10 = vpop.f32.mrb[9].mxu0 }
 0x4ad   :  { %v5304_v11 = vsel %vm965_vm3, 1.0, %v6206_v51  ;;  %vm964_vm13 = vcmp.lt.f32.partialorder %v953_v5, %v884_v10 }
 0x4ae   :  { %v5307_v14 = vsel %vm964_vm13, 1.0, %v6206_v51  ;;  %vm5309_vm4 = vmpackc.low %vm965_vm3, %vm964_vm13  ;;  %v977_v16 = vmul.f32 %v4671_v36, %v5304_v11  ;;  %vm6245_vm3 = vcmask 523264  }
 0x4af   :  { %v4114_v18 = vpop.f32.mrb[10].mxu0  ;;  %4427 = vmatpush3.bf16.msk.msra.mxu1 %vm5309_vm4, %v6204_v0  ;;  %v976_v19 = vmul.f32 %v4673_v38, %v5307_v14  ;;  %vm6246_vm13 = vmmov %vm6245_vm3 }
 0x4b0   :  { %vm967_vm14 = vcmp.lt.f32.partialorder %v962_v17, %v4114_v18  ;;  %v894_v23 = vpop.f32.mrb[11].mxu0  ;;  %987 = vperm.xlu1 %4604, %v977_v16   ;;  %4428 = vmatprep.subr.bf16.mxu1 %v6208_v46 }
 0x4b1   :  { %v5320_v24 = vsel %vm967_vm14, 1.0, %v6206_v51  ;;  %vm966_vm2 = vcmp.lt.f32.partialorder %v959_v22, %v894_v23  ;;  %982 = vperm.xlu0 %4603, %v976_v19  }
 0x4b2   :  { %v5323_v25 = vsel %vm966_vm2, 1.0, %v6206_v51  ;;  %vm4429_vm15 = vmpackc.low %vm967_vm14, %vm966_vm2  ;;  %v979_v33 = vmul.f32 %v4677_v54, %v5320_v24  ;;  %v1279_v54 = vld [vmem:[%s6173_s5 + $0x10] sm:$0xff]  ;;  %vm6196_vm2 = vcmask 7168  }
 0x4b3   :  { %4430 = vmatpush3.bf16.msk.msra.mxu1 %vm4429_vm15, %v6204_v0  ;;  %v978_v55 = vmul.f32 %v4675_v41, %v5323_v25  ;;  %vm6248_vm14 = vmmov %vm6245_vm3  ;;  %v1626_v4 = vsel %vm6196_vm2, %v5304_v11, 0.0  ;;  %v1625_v5 = vsel %vm6196_vm2, %v5307_v14, 0.0  ;;  %v1628_v9 = vsel %vm6196_vm2, %v5323_v25, 0.0 }
 0x4b4   :  { %4438 = vmatprep.subr.msk.bf16.mxu1 %vm5309_vm4, %v6204_v0  ;;  %v1627_v10 = vadd.f32 %v1626_v4, %v1625_v5  ;;  %v1630_v16 = vsel %vm6196_vm2, %v5320_v24, 0.0  ;;  %vm6285_vm2 = vcmp.lt.s32.totalorder %v5211_v21, %v5129_v56 }
 0x4b5   :  { %992 = vperm.xlu1 %4604, %v978_v55   ;;  %997 = vperm.xlu0 %4603, %v979_v33  }
 0x4b6   :  { %4124 = vmatmul.mubr.msk.f32.vlgmr.msra.gmra.mrb[12].mxu1 %vm6238_vm6, %v5200_v45  ;;  %v1629_v15 = vadd.f32 %v1628_v9, %v1627_v10 }
 0x4b7   :  { %4440 = vmatpush3.bf16.msk.msra.mxu1 %vm5309_vm4, %v6204_v0  ;;  %4145 = vmatprep.mubr.msk.f32.mxu1 %vm6239_vm11, %v5014_v1  ;;  %vm6247_vm4 = vmmov %vm6245_vm3 }
 0x4b8   :  { %4442 = vmatprep.subr.msk.bf16.mxu1 %vm4429_vm15, %v6204_v0  ;;  %v1631_v17 = vadd.f32 %v1630_v16, %v1629_v15  ;;  %v5415_v16 = vpack.i.bf16 %v5304_v11, %v5307_v14 }
 0x4ba   :  { %v1632_v18 = vrot.slane %v1631_v17, 4 }
 0x4bb   :  { %4444 = vmatpush3.bf16.msk.msra.mxu1 %vm4429_vm15, %v6204_v0 }
 0x4bc   :  { %v1633_v23 = vadd.f32 %v1632_v18, %v1631_v17 }
 0x4be   :  { %4146 = vmatmul.mubr.msk.f32.vlgmr.msra.gmra.mrb[14].mxu1 %vm6240_vm0, %v5019_v2  ;;  %v1634_v33 = vrot.slane %v1633_v23, 2 }
 0x4bf   :  { %4148 = vmatprep.mubr.msk.f32.mxu1 %vm6241_vm8, %v5024_v3  ;;  %vm6250_vm8 = vmmov %vm6242_vm1 }
 0x4c2   :  { %4149 = vmatmul.mubr.msk.f32.gmra.mrb[16].mxu1 %vm6242_vm1, %v5038_v8  ;;  %vm6251_vm1 = vcmask 15360  }
 0x4c3   :  { %4181 = vmatprep.mubr.msk.f32.mxu1 %vm6243_vm9, %v5014_v1  ;;  %vm6252_vm9 = vmmov %vm6244_vm7 }
 0x52f   :  { %v988_v34 = vpop.permute.xlu1 %987 }
 0x530   :  { %v5349_v35 = vmul.f32 %v988_v34, %v5160_v28  ;;  %v983_v36 = vpop.permute.xlu0 %982 }
 0x531   :  { %v5352_v37 = vmul.f32 %v983_v36, %v5158_v27  ;;  %v4445_v27 = vpack.c.bf16 %v1278_v40, %v1277_v39 }
 0x533   :  { %v4432_v38 = vpack.c.bf16 %v5349_v35, %v5352_v37 }
 0x534   :  { %v998_v1 = vpop.permute.xlu0 %997  ;;  %v993_v41 = vpop.permute.xlu1 %992 }
 0x535   :  { %v5363_v28 = vmul.f32 %v998_v1, %v5164_v30  ;;  %v5366_v42 = vmul.f32 %v993_v41, %v5162_v29  ;;  %4433 = vmatpush3.bf16.msra.mxu0 %v4432_v38  ;;  %v4449_v30 = vpack.c.bf16 %v1280_v58, %v1279_v54  ;;  %v1281_v29 = vld [vmem:[%s6173_s5 + $0x20] sm:$0xff]  ;;  %v1635_v38 = vadd.f32 %v1634_v33, %v1633_v23  ;;  %s4877_s5 = smov [#allocation11]  }
 0x536   :  { %4434 = vmatprep.subr.bf16.mxu0 %v6208_v46  ;;  %v4453_v60 = vpack.c.bf16 %v1282_v59, %v1281_v29  ;;  %s3705_s17 = sshll.u32 %s4877_s5, 4  ;;  %s3706_s17 = int_to_ptr.vmem [resolvable:$true] %s3705_s17 }
 0x537   :  { %v4435_v49 = vpack.c.bf16 %v5363_v28, %v5366_v42  ;;  %v1636_v54 = vrot.slane %v1635_v38, 1  ;;  %s4834_s18 = scalar_lea.vmem %s3706_s17, 32  ;;  %p4839_p5 = scmp.lt.s32.totalorder %s3706_s17, %s3706_s17 }
 0x538   :  { %p4835_p4 = scmp.ne.s32.totalorder %s3706_s17, %s4834_s18  ;;  %p4840_p6 = scmp.lt.s32.totalorder %s4834_s18, %s4834_s18 }
 0x539   :  { %4436 = vmatpush3.bf16.msra.mxu0 %v4435_v49  ;;  %v1637_v59 = vadd.f32 %v1636_v54, %v1635_v38 }
 0x53a   :  { %4446 = vmatprep.subr.bf16.mxu0 %v4445_v27  ;;  %p4841_p7 = por %p4840_p6, %p4839_p5 }
 0x53c   :  { %4135 = vmatmul.mubr.msk.f32.vlgmr.msra.gmra.mrb[12].mxu0 %vm6244_vm7, %v5200_v45  ;;  %vm6253_vm7 = vnez %v6220_v50  ;;  %p4842_p8 = pnand %p4841_p7, %p4835_p4 }
 0x53d   :  { %4448 = vmatpush3.bf16.msra.mxu0 %v4445_v27  ;;  %4167 = vmatprep.mubr.msk.f32.mxu0 %vm6245_vm3, %v5352_v37  ;;  %vm6254_vm3 = vmmov %vm6250_vm8 }
 0x53e   :  { %4450 = vmatprep.subr.bf16.mxu0 %v4449_v30 }
 0x541   :  { %4452 = vmatpush3.bf16.msra.mxu0 %v4449_v30 }
 0x542   :  { %4454 = vmatprep.subr.bf16.mxu0 %v4453_v60 }
 0x545   :  { %4456 = vmatpush3.bf16.msra.mxu0 %v4453_v60  ;;  %v1638_v60 = vmax.f32 %v1637_v59, 1.0 }
 0x546   :  { %4458 = vmatprep.subr.bf16.mxu0 %v4457_v63 }
 0x549   :  { %4460 = vmatpush3.bf16.msra.mxu0 %v4457_v63 }
 0x54c   :  { %4168 = vmatmul.mubr.msk.f32.vlgmr.msra.gmra.mrb[14].mxu0 %vm6246_vm13, %v5349_v35  ;;  %vm6255_vm13 = vmmov %vm6251_vm1 }
 0x54d   :  { %4170 = vmatprep.mubr.msk.f32.mxu0 %vm6247_vm4, %v5366_v42  ;;  %vm6256_vm4 = vmmov %vm6251_vm1 }
 0x550   :  { %4171 = vmatmul.mubr.msk.f32.gmra.mrb[16].mxu0 %vm6248_vm14, %v5363_v28  ;;  %vm6257_vm14 = vmmov %vm6251_vm1 }
 0x589   :  { %v5407_v19 = vpop.f32.mrb[12].mxu1 }
 0x58a   :  { %v4125_v22 = vpop.f32.mrb[13].mxu1 }
 0x591   :  { %v4147_v55 = vpop.f32.mrb[14].mxu1 }
 0x592   :  { %v1357_v34 = vadd.f32 1.0, %v4147_v55  ;;  %v1351_v36 = vpop.f32.mrb[15].mxu1 }
 0x593   :  { %v1352_v39 = vadd.f32 1.0, %v1351_v36 }
 0x594   :  { %v1371_v40 = vmul.f32 %v1357_v34, %v5304_v11 }
 0x595   :  { %v1370_v1 = vmul.f32 %v1352_v39, %v5307_v14  ;;  %v4150_v41 = vpop.f32.mrb[16].mxu1 }
 0x596   :  { %4678 = vrsqrt.f32 %v1371_v40  ;;  %v1367_v27 = vadd.f32 1.0, %v4150_v41  ;;  %v1361_v49 = vpop.f32.mrb[17].mxu1  ;;  %vm1375_vm15 = vcmp.gt.f32.partialorder %v1371_v40, 0.0 }
 0x597   :  { %4680 = vrsqrt.f32 %v1370_v1  ;;  %v1362_v58 = vadd.f32 1.0, %v1361_v49  ;;  %vm1374_vm6 = vcmp.gt.f32.partialorder %v1370_v1, 0.0 }
 0x598   :  { %v1373_v30 = vmul.f32 %v1367_v27, %v5320_v24 }
 0x599   :  { %v1372_v29 = vmul.f32 %v1362_v58, %v5323_v25 }
 0x59a   :  { %4682 = vrsqrt.f32 %v1373_v30  ;;  %vm1377_vm11 = vcmp.gt.f32.partialorder %v1373_v30, 0.0 }
 0x59b   :  { %4684 = vrsqrt.f32 %v1372_v29  ;;  %vm1376_vm0 = vcmp.gt.f32.partialorder %v1372_v29, 0.0 }
 0x59c   :  { %4686 = vrcp.f32 %v1638_v60 }
 0x5a0   :  { %v4679_v61 = vpop.eup %4678 }
 0x5a1   :  { %v4681_v62 = vpop.eup %4680  ;;  %v1383_v63 = vsel %vm1375_vm15, %v4679_v61, 0.0  ;;  %vm1715_vm15 = vcmask 523271  }
 0x5a2   :  { %1490 = vperm.xlu0 %4603, %v1383_v63   ;;  %v1382_v4 = vsel %vm1374_vm6, %v4681_v62, 0.0  ;;  %vm6258_vm6 = vcmask 523264  }
 0x5a3   :  { %1485 = vperm.xlu1 %4604, %v1382_v4  }
 0x5a4   :  { %v4683_v5 = vpop.eup %4682 }
 0x5a5   :  { %v4685_v9 = vpop.eup %4684  ;;  %v1385_v10 = vsel %vm1377_vm11, %v4683_v5, 0.0  ;;  %vm6259_vm11 = vmmov %vm6258_vm6 }
 0x5a6   :  { %1500 = vperm.xlu0 %4603, %v1385_v10   ;;  %v1384_v15 = vsel %vm1376_vm0, %v4685_v9, 0.0  ;;  %v4687_v17 = vpop.eup %4686  ;;  %vm6260_vm0 = vmmov %vm6258_vm6 }
 0x5a7   :  { %1495 = vperm.xlu1 %4604, %v1384_v15  }
 0x5aa   :  { %1613 = vperm.xlu0 %4603, %v5323_v25  }
 0x5ab   :  { %4606 = vperm.xlu1 %4604, %v5415_v16  }
 0x5ae   :  { %1655 = vperm.xlu0 %4603, %v4687_v17  }
 0x5af   :  { %1617 = vperm.xlu1 %4604, %v5320_v24  }
 0x60f   :  { %v5420_v18 = vpop.f32.mrb[12].mxu0 }
 0x610   :  { %6249 = vst [vmem:[#allocation16_spill] sm:$0xff] %v5420_v18  ;;  %v4136_v22 = vpop.f32.mrb[13].mxu0 }
 0x61f   :  { %v4169_v23 = vpop.f32.mrb[14].mxu0 }
 0x620   :  { %v1464_v33 = vpop.f32.mrb[15].mxu0 }
 0x621   :  { %v1491_v55 = vpop.permute.xlu0 %1490 }
 0x622   :  { %v1504_v34 = vmul.f32 %v4169_v23, %v1491_v55  ;;  %v1486_v36 = vpop.permute.xlu1 %1485 }
 0x623   :  { %v1503_v38 = vmul.f32 %v1486_v36, %v1464_v33  ;;  %v4172_v39 = vpop.f32.mrb[16].mxu0 }
 0x624   :  { %v1474_v40 = vpop.f32.mrb[17].mxu0 }
 0x625   :  { %v4461_v1 = vpack.c.bf16 %v1504_v34, %v1503_v38  ;;  %v1501_v41 = vpop.permute.xlu0 %1500 }
 0x626   :  { %v1506_v27 = vmul.f32 %v4172_v39, %v1501_v41  ;;  %v1496_v49 = vpop.permute.xlu1 %1495 }
 0x627   :  { %v1505_v54 = vmul.f32 %v1496_v49, %v1474_v40  ;;  %4462 = vmatprep.subr.bf16.mxu1 %v4461_v1 }
 0x628   :  { %4464 = vmatpush3.bf16.msra.mxu1 %v4461_v1 }
 0x629   :  { %v4465_v58 = vpack.c.bf16 %v1506_v27, %v1505_v54  ;;  %v5426_v60 = vpop.permute.xlu0 %1613 }
 0x62a   :  { %v4607_v30 = vpop.permute.xlu1 %4606  ;;  %v1845_v4 = vmul.f32 %v5426_v60, %v5106_v52 }
 0x62b   :  { %v5422_v29 = vunpack.i.h.bf16 %v4607_v30  ;;  %v5424_v59 = vunpack.i.l.bf16 %v4607_v30  ;;  %4466 = vmatprep.subr.bf16.mxu1 %v4465_v58 }
 0x62c   :  { %4468 = vmatpush3.bf16.msra.mxu1 %v4465_v58 }
 0x62d   :  { %v1843_v61 = vmul.f32 %v5424_v59, %v5080_v47  ;;  %v1844_v62 = vmul.f32 %v5422_v29, %v5085_v48  ;;  %4469 = vmatprep.subr.bf16.mxu1 %v6208_v46 }
 0x62e   :  { %v5433_v63 = vpop.permute.xlu1 %1617 }
 0x62f   :  { %v1846_v5 = vmul.f32 %v5433_v63, %v5111_v53  ;;  %4182 = vmatmul.mubr.msk.f32.vlgmr.msra.gmra.mrb[18].mxu1 %vm6250_vm8, %v5019_v2  ;;  %4206 = vmatprep.mubr.msk.f32.mxu0 %vm6251_vm1, %v1843_v61  ;;  %v4477_v9 = vpack.c.bf16 %v1844_v62, %v1843_v61  ;;  %v1716_v2 = vsel %vm1715_vm15, %v5072_v44, 0.0  ;;  %vm6261_vm8 = vmmov %vm6260_vm0 }
 0x630   :  { %4184 = vmatprep.mubr.msk.f32.mxu1 %vm6252_vm9, %v5024_v3  ;;  %1717 = vadd.xlane.f32.xlu1 %v1716_v2  ;;  %v1598_v3 = vsub.s32 4, %v5129_v56  ;;  %vm6262_vm1 = vmmov %vm6260_vm0 }
 0x631   :  { %4479 = vmatprep.subr.msk.bf16.mxu0 %vm6253_vm7, %v4477_v9  ;;  %v4483_v47 = vpack.c.bf16 %v1846_v5, %v1845_v4  ;;  %vm6263_vm9 = vmmov %vm6260_vm0 }
 0x632   :  { %4482 = vmatpush3.bf16.xpose.msk.msra.mxu0 %vm6253_vm7, %v4477_v9  ;;  %v1599_v52 = vrot.slane %v5068_v43, %v1598_v3  ;;  %vm6268_vm15 = vmmov %vm6260_vm0 }
 0x633   :  { %4185 = vmatmul.mubr.msk.f32.gmra.mrb[20].mxu1 %vm6254_vm3, %v5038_v8  ;;  %4485 = vmatprep.subr.msk.bf16.mxu0 %vm6253_vm7, %v4483_v47  ;;  %vm6264_vm3 = vmmov %vm6260_vm0 }
 0x634   :  { %4195 = vmatprep.mubr.msk.f32.mxu1 %vm6231_vm12, %v6206_v51 }
 0x63a   :  { %4488 = vmatpush3.bf16.xpose.msk.msra.mxu0 %vm6253_vm7, %v4483_v47 }
 0x63b   :  { %4495 = vmatprep.subr.bf16.mxu0 %v6208_v46 }
 0x641   :  { %4207 = vmatmul.mubr.msk.f32.vlgmr.msra.gmra.mrb[18].mxu0 %vm6255_vm13, %v1844_v62  ;;  %vm6265_vm13 = vmmov %vm6260_vm0 }
 0x642   :  { %4209 = vmatprep.mubr.msk.f32.mxu0 %vm6256_vm4, %v1845_v4  ;;  %vm6266_vm4 = vnez %v6222_v31 }
 0x645   :  { %4210 = vmatmul.mubr.msk.f32.gmra.mrb[20].mxu0 %vm6257_vm14, %v1846_v5  ;;  %vm6267_vm14 = vmmov %vm6260_vm0 }
 0x646   :  { %4239 = vmatprep.mubr.msk.f32.mxu0 %vm6231_vm12, %v6206_v51 }
 0x702   :  { %v4183_v8 = vpop.f32.mrb[18].mxu1 }
 0x703   :  { %v1579_v48 = vadd.f32 %v4183_v8, %v1504_v34  ;;  %v1573_v53 = vpop.f32.mrb[19].mxu1 }
 0x704   :  { %v1574_v10 = vadd.f32 %v1573_v53, %v1503_v38 }
 0x705   :  { %v1593_v15 = vmul.f32 %v1579_v48, %v1491_v55 }
 0x706   :  { %v1592_v17 = vmul.f32 %v1574_v10, %v1486_v36  ;;  %v4186_v22 = vpop.f32.mrb[20].mxu1 }
 0x707   :  { %v1601_v23 = vadd.f32 %v1599_v52, %v1593_v15  ;;  %v1589_v33 = vadd.f32 %v4186_v22, %v1506_v27  ;;  %v1583_v39 = vpop.f32.mrb[21].mxu1 }
 0x708   :  { %v1600_v40 = vadd.f32 %v1599_v52, %v1592_v17  ;;  %v1584_v1 = vadd.f32 %v1583_v39, %v1505_v54  ;;  %v1656_v17 = vpop.permute.xlu0 %1655 }
 0x709   :  { %v1621_v58 = vmul.f32 %v5422_v29, %v1601_v23  ;;  %v1595_v44 = vmul.f32 %v1589_v33, %v1501_v41 }
 0x70a   :  { %v1620_v30 = vmul.f32 %v5424_v59, %v1600_v40  ;;  %v1594_v61 = vmul.f32 %v1584_v1, %v1496_v49 }
 0x70b   :  { %v1641_v34 = vsel %vm6258_vm6, %v1621_v58, 0.0  ;;  %v1603_v62 = vadd.f32 %v1599_v52, %v1595_v44  ;;  %vm6269_vm6 = vmmov %vm6260_vm0 }
 0x70c   :  { %v1640_v4 = vsel %vm6259_vm11, %v1620_v30, 0.0  ;;  %v1602_v38 = vadd.f32 %v1599_v52, %v1594_v61  ;;  %vm6270_vm11 = vmmov %vm6260_vm0 }
 0x70d   :  { %v1642_v55 = vadd.f32 %v1641_v34, %v1640_v4  ;;  %v1623_v36 = vmul.f32 %v5433_v63, %v1603_v62 }
 0x70e   :  { %v1622_v27 = vmul.f32 %v5426_v60, %v1602_v38 }
 0x70f   :  { %v1645_v9 = vsel %vm6261_vm8, %v1623_v36, 0.0  ;;  %vm6272_vm8 = vmmov %vm6262_vm1 }
 0x710   :  { %v1643_v5 = vsel %vm6260_vm0, %v1622_v27, 0.0  ;;  %vm6271_vm0 = vcmask 1041408  }
 0x711   :  { %v1644_v54 = vadd.f32 %v1643_v5, %v1642_v55 }
 0x713   :  { %v1646_v41 = vadd.f32 %v1645_v9, %v1644_v54 }
 0x714   :  { %v5473_v47 = vpop.f32.mrb[18].mxu0 }
 0x715   :  { %v1647_v49 = vrot.slane %v1646_v41, 4  ;;  %v5475_v2 = vpop.f32.mrb[19].mxu0 }
 0x717   :  { %v1648_v3 = vadd.f32 %v1647_v49, %v1646_v41 }
 0x718   :  { %v5477_v8 = vpop.f32.mrb[20].mxu0 }
 0x719   :  { %v1649_v48 = vrot.slane %v1648_v3, 2  ;;  %v5479_v52 = vpop.f32.mrb[21].mxu0 }
 0x71b   :  { %v1650_v53 = vadd.f32 %v1649_v48, %v1648_v3 }
 0x71d   :  { %v1651_v10 = vrot.slane %v1650_v53, 1 }
 0x71f   :  { %v1652_v15 = vadd.f32 %v1651_v10, %v1650_v53 }
 0x721   :  { %v1658_v22 = vmul.f32 %v1656_v17, %v1652_v15 }
 0x723   :  { %v1659_v23 = vsub.f32 %v1620_v30, %v1658_v22  ;;  %v1660_v33 = vsub.f32 %v1621_v58, %v1658_v22  ;;  %v1661_v39 = vsub.f32 %v1622_v27, %v1658_v22  ;;  %v1662_v40 = vsub.f32 %v1623_v36, %v1658_v22 }
 0x725   :  { %v1663_v1 = vmul.f32 %v1659_v23, %v1659_v23  ;;  %v1664_v44 = vmul.f32 %v1660_v33, %v1660_v33  ;;  %v1665_v61 = vmul.f32 %v1661_v39, %v1661_v39  ;;  %v1666_v34 = vmul.f32 %v1662_v40, %v1662_v40 }
 0x727   :  { %v1667_v62 = vmul.f32 %v5424_v59, %v1663_v1  ;;  %v1668_v4 = vmul.f32 %v5422_v29, %v1664_v44  ;;  %v1669_v38 = vmul.f32 %v1665_v61, %v5426_v60  ;;  %v1670_v55 = vmul.f32 %v1666_v34, %v5433_v63 }
 0x728   :  { %v1693_v1 = vsub.s32 5, %v5129_v56  ;;  %v1701_v44 = vsub.s32 6, %v5129_v56 }
 0x729   :  { %v1671_v5 = vsel %vm6262_vm1, %v1667_v62, 0.0  ;;  %v1672_v54 = vsel %vm6263_vm9, %v1668_v4, 0.0  ;;  %v1674_v58 = vsel %vm6264_vm3, %v1669_v38, 0.0  ;;  %v1676_v27 = vsel %vm6265_vm13, %v1670_v55, 0.0  ;;  %vm6273_vm1 = vmmov %vm6271_vm0 }
 0x72a   :  { %v1673_v30 = vadd.f32 %v1672_v54, %v1671_v5  ;;  %v1694_v61 = vrot.slane %v5068_v43, %v1693_v1  ;;  %v1702_v62 = vrot.slane %v5068_v43, %v1701_v44  ;;  %v1723_v54 = vsub.s32 7, %v5129_v56 }
 0x72b   :  { %v1944_v44 = vmul.f32 0.8, %v5407_v19  ;;  %vm6274_vm9 = vcmask 15360  }
 0x72c   :  { %v1675_v36 = vadd.f32 %v1674_v58, %v1673_v30  ;;  %vm6275_vm3 = vmmov %vm6274_vm9 }
 0x72d   :  { %vm6276_vm13 = vmmov %vm6275_vm3 }
 0x72e   :  { %v1677_v9 = vadd.f32 %v1676_v27, %v1675_v36 }
 0x730   :  { %v1678_v41 = vrot.slane %v1677_v9, 4 }
 0x732   :  { %v1679_v49 = vadd.f32 %v1678_v41, %v1677_v9 }
 0x734   :  { %v1680_v3 = vrot.slane %v1679_v49, 2 }
 0x736   :  { %v1681_v48 = vadd.f32 %v1680_v3, %v1679_v49 }
 0x738   :  { %v1682_v53 = vrot.slane %v1681_v48, 1 }
 0x73a   :  { %v1683_v10 = vadd.f32 %v1682_v53, %v1681_v48 }
 0x73c   :  { %v1684_v15 = vmul.f32 %v1683_v10, %v1656_v17  ;;  %v1724_v10 = vrot.slane %v5068_v43, %v1723_v54 }
 0x73e   :  { %v1685_v22 = vadd.f32 1e-05, %v1684_v15 }
 0x740   :  { %4688 = vrsqrt.f32 %v1685_v22 }
 0x74a   :  { %v4689_v34 = vpop.eup %4688 }
 0x74b   :  { %v1689_v4 = vmul.f32 %v4689_v34, %v1661_v39  ;;  %v1687_v38 = vmul.f32 %v4689_v34, %v1659_v23  ;;  %v1688_v55 = vmul.f32 %v4689_v34, %v1660_v33  ;;  %v1690_v5 = vmul.f32 %v4689_v34, %v1662_v40 }
 0x74d   :  { %v1695_v30 = vmul.f32 %v1694_v61, %v1687_v38  ;;  %v1696_v58 = vmul.f32 %v1694_v61, %v1688_v55  ;;  %v1697_v17 = vmul.f32 %v1694_v61, %v1689_v4  ;;  %v1698_v36 = vmul.f32 %v1694_v61, %v1690_v5  ;;  %v4732_v38 = vld [vmem:[#allocation8] sm:$0xff]  ;;  %v5531_v5 = vld [vmem:[%s6171_s3] sm:$0xff] }
 0x74e   :  { %v1753_v55 = vrot.slane %v4732_v38, 7 }
 0x74f   :  { %v1703_v27 = vadd.f32 %v1702_v62, %v1695_v30  ;;  %v1704_v9 = vadd.f32 %v1702_v62, %v1696_v58  ;;  %v1705_v41 = vadd.f32 %v1702_v62, %v1697_v17  ;;  %v1706_v49 = vadd.f32 %v1702_v62, %v1698_v36  ;;  %v5539_v30 = vld [vmem:[%s6171_s3 + $0x8] sm:$0xff]  ;;  %v5546_v58 = vld [vmem:[%s6171_s3 + $0x10] sm:$0xff]  ;;  %v5553_v17 = vld [vmem:[%s6171_s3 + $0x18] sm:$0xff]  ;;  %v1718_v36 = vpop.xlane.xlu1 %1717 }
 0x750   :  { %v1945_v62 = vceil.f32 %v1944_v44 }
 0x751   :  { %v1707_v3 = vmax.f32 %v1703_v27, 0.0  ;;  %v1708_v48 = vmax.f32 %v1704_v9, 0.0  ;;  %v1709_v53 = vmax.f32 %v1705_v41, 0.0  ;;  %v1710_v33 = vmax.f32 %v1706_v49, 0.0 }
 0x752   :  { %v1719_v27 = vadd.f32 1e-24, %v1718_v36 }
 0x753   :  { %v5496_v39 = vmul.f32 %v5424_v59, %v1707_v3  ;;  %v5499_v23 = vmul.f32 %v5422_v29, %v1708_v48  ;;  %v5502_v40 = vmul.f32 %v1709_v53, %v5426_v60  ;;  %v5511_v43 = vmul.f32 %v1710_v33, %v5433_v63 }
 0x754   :  { %4690 = vrsqrt.f32 %v1719_v27 }
 0x755   :  { %v4470_v15 = vpack.c.bf16 %v5499_v23, %v5496_v39  ;;  %v1727_v22 = vmul.f32 %v1724_v10, %v5502_v40  ;;  %v1725_v1 = vmul.f32 %v1724_v10, %v5496_v39  ;;  %v1726_v60 = vmul.f32 %v1724_v10, %v5499_v23 }
 0x756   :  { %v1728_v34 = vmul.f32 %v1724_v10, %v5511_v43  ;;  %v4474_v63 = vpack.c.bf16 %v5511_v43, %v5502_v40 }
 0x757   :  { %4472 = vmatpush3.bf16.xpose.msk.msra.mxu1 %vm6266_vm4, %v4470_v15  ;;  %v1735_v29 = vsel %vm6267_vm14, %v1727_v22, 0.0  ;;  %v1729_v59 = vsel %vm6268_vm15, %v1725_v1, 0.0  ;;  %v1732_v61 = vsel %vm6269_vm6, %v1726_v60, 0.0  ;;  %vm6277_vm14 = vmmov %vm6275_vm3  ;;  %vm2035_vm15 = vcmp.gt.f32.partialorder %v5473_v47, 0.5 }
 0x758   :  { %1736 = vadd.xlane.f32.xlu1 %v1735_v29  ;;  %1730 = vadd.xlane.f32.xlu0 %v1729_v59  ;;  %v1738_v4 = vsel %vm6270_vm11, %v1728_v34, 0.0  ;;  %vm2034_vm6 = vcmp.gt.f32.partialorder %v5475_v2, 0.5  ;;  %vm2036_vm11 = vcmp.gt.f32.partialorder %v5479_v52, 0.5  ;;  %v6283_v2 = vmov 0 }
 0x759   :  { %4473 = vmatprep.subr.bf16.mxu1 %v6208_v46 }
 0x75c   :  { %1733 = vadd.xlane.f32.xlu0 %v1732_v61 }
 0x75e   :  { %v4691_v41 = vpop.eup %4690 }
 0x75f   :  { %4476 = vmatpush3.bf16.xpose.msk.msra.mxu1 %vm6266_vm4, %v4474_v63  ;;  %v1744_v49 = vrot.slane %v4691_v41, %v1723_v54  ;;  %v1839_v3 = vrot.slane %v4691_v41, 7 }
 0x760   :  { %4212 = vmatprep.subr.msk.mxu1 %vm6271_vm0, %v1945_v62  ;;  %1739 = vadd.xlane.f32.xlu0 %v1738_v4  ;;  %vm6278_vm0 = vcmp.ne.s32.totalorder %v5211_v21, %v5208_v20 }
 0x766   :  { %4196 = vmatmul.mubr.msk.f32.vlgmr.msra.gmra.mrb[22].mxu1 %vm6272_vm8, %v1753_v55  ;;  %vm5567_vm8 = vmand %vm2035_vm15, %vm6278_vm0 }
 0x767   :  { %4213 = vmatpush3.msk.msra.mxu1 %vm6273_vm1, %v1945_v62  ;;  %4214 = vmatprep.mubr.msk.f32.mxu1 %vm6274_vm9, %v5531_v5  ;;  %vm6281_vm1 = vcmp.ne.s32.totalorder %v5211_v21, %v5129_v56 }
 0x768   :  { %4489 = vmatprep.subr.bf16.mxu1 %v6208_v46  ;;  %vm2038_vm9 = vmand %vm2034_vm6, %vm6281_vm1  ;;  %vm6286_vm6 = vcmp.ne.s32.totalorder %v5211_v21, %v5217_v32 }
 0x76a   :  { %4215 = vmatmul.mubr.msk.f32.vlgmr.msra.gmra.mrb[24].mxu1 %vm6275_vm3, %v5539_v30  ;;  %vm2037_vm3 = vcmp.gt.f32.partialorder %v5477_v8, 0.5 }
 0x76b   :  { %4217 = vmatprep.mubr.msk.f32.mxu1 %vm6276_vm13, %v5546_v58  ;;  %vm6282_vm13 = vcmp.ne.s32.totalorder %v5211_v21, %v5214_v26  ;;  %vm5589_vm1 = vmand %vm2037_vm3, %vm6286_vm6 }
 0x76e   :  { %4218 = vmatmul.mubr.msk.f32.gmra.mrb[26].mxu1 %vm6277_vm14, %v5553_v17  ;;  %vm5579_vm14 = vmand %vm2036_vm11, %vm6282_vm13  ;;  %vm6289_vm13 = vcmp.lt.s32.totalorder %v5211_v21, %v5208_v20 }
 0x76f   :  { %4228 = vmatprep.mubr.msk.f32.mxu1 %vm6231_vm12, %v6206_v51  ;;  %v6284_v2 = vsel %vm5579_vm14, 4294967295, %v6283_v2 }
 0x7e5   :  { %v1731_v9 = vpop.xlane.xlu0 %1730  ;;  %v1737_v22 = vpop.xlane.xlu1 %1736 }
 0x7e6   :  { %v1745_v10 = vmul.f32 %v1744_v49, %v1731_v9  ;;  %v1747_v59 = vmul.f32 %v1744_v49, %v1737_v22 }
 0x7e9   :  { %v1734_v48 = vpop.xlane.xlu0 %1733 }
 0x7ea   :  { %v1746_v1 = vmul.f32 %v1744_v49, %v1734_v48 }
 0x7ed   :  { %v1740_v60 = vpop.xlane.xlu0 %1739 }
 0x7ee   :  { %v1748_v61 = vmul.f32 %v1744_v49, %v1740_v60 }
 0x839   :  { %v1834_v53 = vpop.f32.mrb[22].mxu1 }
 0x83a   :  { %v1841_v33 = vmul.f32 %v1839_v3, %v1834_v53  ;;  %v4197_v15 = vpop.f32.mrb[23].mxu1 }
 0x83c   :  { %4692 = vtanh.f32 %v1841_v33 }
 0x83d   :  { %v5559_v29 = vpop.f32.mrb[24].mxu1  ;;  %4694 = vtanh.f32 %v1745_v10 }
 0x83e   :  { %v2015_v44 = vpop.f32.mrb[25].mxu1  ;;  %4696 = vtanh.f32 %v1746_v1 }
 0x83f   :  { %4698 = vtanh.f32 %v1747_v59  ;;  %v5702_v59 = vld [vmem:[%s6170_s2] sm:$0x3]  ;;  %s4875_s2 = smov 1  }
 0x840   :  { %4700 = vtanh.f32 %v1748_v61 }
 0x841   :  { %v4219_v48 = vpop.f32.mrb[26].mxu1 }
 0x842   :  { %v2025_v53 = vpop.f32.mrb[27].mxu1 }
 0x846   :  { %v4693_v54 = vpop.eup %4692 }
 0x847   :  { %v2045_v63 = vrot.slane %v4693_v54, %v5132_v57  ;;  %v4695_v62 = vpop.eup %4694 }
 0x848   :  { %v4697_v47 = vpop.eup %4696 }
 0x849   :  { %vm2046_vm15 = vcmp.gt.f32.partialorder %v2045_v63, %v4695_v62  ;;  %vm2050_vm0 = vcmp.eq.f32.partialorder %v2045_v63, %v4695_v62  ;;  %vm2051_vm10 = vcmp.eq.f32.partialorder %v2045_v63, %v4697_v47  ;;  %vm2047_vm12 = vcmp.gt.f32.partialorder %v2045_v63, %v4697_v47  ;;  %v4699_v52 = vpop.eup %4698 }
 0x84a   :  { %vm2054_vm5 = vmand %vm2050_vm0, %vm6285_vm2  ;;  %vm2052_vm14 = vcmp.eq.f32.partialorder %v2045_v63, %v4699_v52  ;;  %vm6290_vm2 = vcmask 261120   ;;  %v4701_v55 = vpop.eup %4700 }
 0x84b   :  { %vm2058_vm4 = vmor %vm2046_vm15, %vm2054_vm5  ;;  %vm2048_vm15 = vcmp.gt.f32.partialorder %v2045_v63, %v4699_v52  ;;  %vm2053_vm0 = vcmp.eq.f32.partialorder %v2045_v63, %v4701_v55 }
 0x84c   :  { %vm2062_vm11 = vmand %vm2038_vm9, %vm2058_vm4  ;;  %vm6291_vm4 = vcmp.lt.s32.totalorder %v5211_v21, %v5214_v26 }
 0x84d   :  { %v3791_v4 = vsel %vm2062_vm11, 1.0, %v6206_v51  ;;  %vm2055_vm7 = vmand %vm2051_vm10, %vm6289_vm13  ;;  %vm2049_vm11 = vcmp.gt.f32.partialorder %v2045_v63, %v4701_v55 }
 0x84e   :  { %v2074_v38 = vsel %vm6290_vm2, %v3791_v4, 0.0  ;;  %vm2059_vm5 = vmor %vm2047_vm12, %vm2055_vm7  ;;  %vm6293_vm12 = vnez %v6284_v2  ;;  %v5677_v2 = vld [vmem:[%s6169_s1 + $0x18] sm:$0xff] }
 0x84f   :  { %2075 = vadd.xlane.f32.xlu1 %v2074_v38  ;;  %vm2063_vm3 = vmand %vm5567_vm8, %vm2059_vm5  ;;  %vm6294_vm8 = vcmp.lt.s32.totalorder %v5211_v21, %v5217_v32 }
 0x850   :  { %v3792_v36 = vsel %vm2063_vm3, 1.0, %v6206_v51  ;;  %vm2056_vm9 = vmand %vm2052_vm14, %vm6291_vm4  ;;  %vm2086_vm3 = vcmp.gt.f32.partialorder %v5307_v14, 0.5 }
 0x851   :  { %vm6292_vm6 = vmmov %vm6290_vm2 }
 0x852   :  { %v2077_v27 = vsel %vm6292_vm6, %v3792_v36, 0.0  ;;  %vm2060_vm10 = vmor %vm2048_vm15, %vm2056_vm9 }
 0x853   :  { %2078 = vadd.xlane.f32.xlu0 %v2077_v27  ;;  %vm2064_vm7 = vmand %vm6293_vm12, %vm2060_vm10  ;;  %v2402_v27 = vld [vmem:[#allocation6] sm:$0xff] }
 0x854   :  { %v3793_v9 = vsel %vm2064_vm7, 1.0, %v6206_v51  ;;  %vm2057_vm13 = vmand %vm2053_vm0, %vm6294_vm8  ;;  %vm2087_vm0 = vcmp.gt.f32.partialorder %v5304_v11, 0.5  ;;  %vm2089_vm8 = vcmp.gt.f32.partialorder %v5320_v24, 0.5 }
 0x855   :  { %v2080_v41 = vsel %vm6290_vm2, %v3793_v9, 0.0  ;;  %vm2061_vm5 = vmor %vm2049_vm11, %vm2057_vm13  ;;  %vm2088_vm11 = vcmp.gt.f32.partialorder %v5323_v25, 0.5  ;;  %v2403_v9 = vld [vmem:[#allocation6 + $0x8] sm:$0xff] }
 0x856   :  { %2081 = vadd.xlane.f32.xlu1 %v2080_v41  ;;  %vm2065_vm14 = vmand %vm5589_vm1, %vm2061_vm5 }
 0x857   :  { %v3794_v49 = vsel %vm2065_vm14, 1.0, %v6206_v51  ;;  %vm6295_vm15 = vmmov %vm6290_vm2 }
 0x858   :  { %v2083_v3 = vsel %vm6295_vm15, %v3794_v49, 0.0  ;;  %vm6298_vm14 = vmmov %vm6295_vm15 }
 0x859   :  { %2084 = vadd.xlane.f32.xlu0 %v2083_v3  ;;  %vm6299_vm15 = vmmov %vm6298_vm14  ;;  %v4509_v3 = vpack.c.bf16 %v2403_v9, %v2402_v27 }
 0x8dc   :  { %v2076_v10 = vpop.xlane.xlu1 %2075 }
 0x8dd   :  { %vm2090_vm4 = vcmp.lt.f32.partialorder %v2076_v10, %v2015_v44 }
 0x8de   :  { %vm2094_vm9 = vmand %vm2086_vm3, %vm2090_vm4 }
 0x8df   :  { %v5618_v33 = vsel %vm2094_vm9, 1.0, %v6206_v51  ;;  %vm6300_vm3 = vmmov %vm6298_vm14 }
 0x8e0   :  { %v2079_v15 = vpop.xlane.xlu0 %2078  ;;  %v2102_v22 = vmul.f32 %v4695_v62, %v5618_v33  ;;  %v4737_v62 = vld [vmem:[%s6169_s1] sm:$0xff]  ;;  %vm6301_vm4 = vmmov %vm6300_vm3 }
 0x8e1   :  { %vm2091_vm1 = vcmp.lt.f32.partialorder %v2079_v15, %v5559_v29  ;;  %v2406_v15 = vld [vmem:[#allocation6 + $0x20] sm:$0xff] }
 0x8e2   :  { %vm2095_vm6 = vmand %vm2087_vm0, %vm2091_vm1  ;;  %2108 = vperm.xlu1 %4604, %v2102_v22   ;;  %v2407_v22 = vld [vmem:[#allocation6 + $0x28] sm:$0xff] }
 0x8e3   :  { %v5624_v1 = vsel %vm2095_vm6, 1.0, %v6206_v51  ;;  %vm5626_vm10 = vmpackc.low %vm2095_vm6, %vm2094_vm9  ;;  %v2082_v60 = vpop.xlane.xlu1 %2081  ;;  %vm6308_vm6 = vcmask 523264  }
 0x8e4   :  { %vm2092_vm12 = vcmp.lt.f32.partialorder %v2082_v60, %v2025_v53  ;;  %4491 = vmatpush3.bf16.msk.msra.mxu1 %vm5626_vm10, %v6204_v0  ;;  %v2103_v29 = vmul.f32 %v4697_v47, %v5624_v1  ;;  %v5663_v47 = vld [vmem:[%s6169_s1 + $0x8] sm:$0xff]  ;;  %vm6302_vm9 = vmmov %vm6300_vm3 }
 0x8e5   :  { %vm2096_vm7 = vmand %vm2088_vm11, %vm2092_vm12  ;;  %4492 = vmatprep.subr.bf16.mxu1 %v6208_v46  ;;  %v2405_v53 = vld [vmem:[#allocation6 + $0x18] sm:$0xff] }
 0x8e6   :  { %v5637_v44 = vsel %vm2096_vm7, 1.0, %v6206_v51  ;;  %v2085_v61 = vpop.xlane.xlu0 %2084  ;;  %2113 = vperm.xlu0 %4603, %v2103_v29   ;;  %vm6303_vm0 = vmmov %vm6300_vm3  ;;  %v2409_v60 = vld [vmem:[#allocation6 + $0x38] sm:$0xff] }
 0x8e7   :  { %vm2093_vm13 = vcmp.lt.f32.partialorder %v2085_v61, %v4219_v48  ;;  %v2104_v54 = vmul.f32 %v4699_v52, %v5637_v44  ;;  %v2404_v48 = vld [vmem:[#allocation6 + $0x10] sm:$0xff]  ;;  %vm6307_vm1 = vmmov %vm6303_vm0 }
 0x8e8   :  { %vm2097_vm2 = vmand %vm2089_vm8, %vm2093_vm13  ;;  %v4513_v10 = vpack.c.bf16 %v2405_v53, %v2404_v48 }
 0x8e9   :  { %v5642_v34 = vsel %vm2097_vm2, 1.0, %v6206_v51  ;;  %vm4493_vm5 = vmpackc.low %vm2097_vm2, %vm2096_vm7  ;;  %2118 = vperm.xlu1 %4604, %v2104_v54   ;;  %vm6312_vm7 = vcmask 7168  }
 0x8ea   :  { %4494 = vmatpush3.bf16.msk.msra.mxu1 %vm4493_vm5, %v6204_v0  ;;  %v2105_v63 = vmul.f32 %v4701_v55, %v5642_v34  ;;  %vm6310_vm11 = vmmov %vm6308_vm6  ;;  %v2749_v61 = vsel %vm6312_vm7, %v5618_v33, 0.0 }
 0x8eb   :  { %4502 = vmatprep.subr.msk.bf16.mxu1 %vm5626_vm10, %v6204_v0  ;;  %vm6311_vm12 = vmmov %vm6308_vm6 }
 0x8ec   :  { %vm6313_vm8 = vmmov %vm6312_vm7 }
 0x8ed   :  { %4229 = vmatmul.mubr.msk.f32.vlgmr.msra.gmra.mrb[28].mxu1 %vm6298_vm14, %v5200_v45  ;;  %2123 = vperm.xlu1 %4604, %v2105_v63   ;;  %v5670_v45 = vld [vmem:[%s6169_s1 + $0x10] sm:$0xff]  ;;  %v2750_v54 = vsel %vm6313_vm8, %v5624_v1, 0.0  ;;  %vm6314_vm13 = vmmov %vm6312_vm7  ;;  %vm6325_vm8 = vcmask 519171  }
 0x8ee   :  { %4504 = vmatpush3.bf16.msk.msra.mxu1 %vm5626_vm10, %v6204_v0  ;;  %4250 = vmatprep.mubr.msk.f32.mxu1 %vm6299_vm15, %v4737_v62  ;;  %vm6309_vm10 = vmmov %vm6308_vm6  ;;  %v2752_v63 = vsel %vm6314_vm13, %v5637_v44, 0.0  ;;  %vm6326_vm13 = vcmask 523264  }
 0x8ef   :  { %4506 = vmatprep.subr.msk.bf16.mxu1 %vm4493_vm5, %v6204_v0  ;;  %vm6315_vm2 = vmmov %vm6312_vm7 }
 0x8f2   :  { %4508 = vmatpush3.bf16.msk.msra.mxu1 %vm4493_vm5, %v6204_v0 }
 0x8f5   :  { %4251 = vmatmul.mubr.msk.f32.vlgmr.msra.gmra.mrb[30].mxu1 %vm6300_vm3, %v5663_v47 }
 0x8f6   :  { %4253 = vmatprep.mubr.msk.f32.mxu1 %vm6301_vm4, %v5670_v45  ;;  %vm6317_vm4 = vcmask 15360  }
 0x8f7   :  { %vm6324_vm7 = vmmov %vm6317_vm4 }
 0x8f9   :  { %4254 = vmatmul.mubr.msk.f32.gmra.mrb[32].mxu1 %vm6302_vm9, %v5677_v2  ;;  %vm6318_vm9 = vmmov %vm6303_vm0 }
 0x8fa   :  { %4286 = vmatprep.mubr.msk.f32.mxu1 %vm6303_vm0, %v4737_v62  ;;  %v2751_v62 = vadd.f32 %v2750_v54, %v2749_v61 }
 0x961   :  { %v2109_v52 = vpop.permute.xlu1 %2108 }
 0x962   :  { %v5683_v8 = vmul.f32 %v2109_v52, %v5496_v39  ;;  %v2753_v52 = vadd.f32 %v2752_v63, %v2751_v62 }
 0x965   :  { %v2114_v4 = vpop.permute.xlu0 %2113 }
 0x966   :  { %v5686_v38 = vmul.f32 %v2114_v4, %v5499_v23  ;;  %v2754_v4 = vsel %vm6315_vm2, %v5642_v34, 0.0  ;;  %vm6327_vm2 = vmmov %vm6326_vm13 }
 0x968   :  { %6304 = vst [vmem:[#allocation17_spill] sm:$0xff] %v5686_v38  ;;  %v2119_v55 = vpop.permute.xlu1 %2118  ;;  %v4496_v36 = vpack.c.bf16 %v5686_v38, %v5683_v8 }
 0x969   :  { %v5692_v49 = vmul.f32 %v2119_v55, %v5502_v40  ;;  %v4517_v40 = vpack.c.bf16 %v2407_v22, %v2406_v15  ;;  %v2755_v55 = vadd.f32 %v2754_v4, %v2753_v52 }
 0x96a   :  { %4497 = vmatpush3.bf16.msra.mxu0 %v4496_v36 }
 0x96b   :  { %4498 = vmatprep.subr.bf16.mxu0 %v6208_v46  ;;  %6305 = vst [vmem:[#allocation18_spill] sm:$0xff] %v5692_v49  ;;  %v2756_v36 = vrot.slane %v2755_v55, 4 }
 0x96c   :  { %v2124_v41 = vpop.permute.xlu1 %2123 }
 0x96d   :  { %v5695_v39 = vmul.f32 %v2124_v41, %v5511_v43  ;;  %v2408_v43 = vld [vmem:[#allocation6 + $0x30] sm:$0xff]  ;;  %v2757_v41 = vadd.f32 %v2756_v36, %v2755_v55 }
 0x96e   :  { %v4521_v29 = vpack.c.bf16 %v2409_v60, %v2408_v43 }
 0x96f   :  { %6306 = vst [vmem:[#allocation19_spill] sm:$0xff] %v5695_v39  ;;  %v4499_v23 = vpack.c.bf16 %v5695_v39, %v5692_v49 }
 0x971   :  { %4500 = vmatpush3.bf16.msra.mxu0 %v4499_v23 }
 0x972   :  { %4510 = vmatprep.subr.bf16.mxu0 %v4509_v3 }
 0x974   :  { %4240 = vmatmul.mubr.msk.f32.vlgmr.msra.gmra.mrb[22].mxu0 %vm6307_vm1, %v5702_v59  ;;  %vm6319_vm1 = vnez %v6220_v50 }
 0x975   :  { %4512 = vmatpush3.bf16.msra.mxu0 %v4509_v3  ;;  %4272 = vmatprep.mubr.msk.f32.mxu0 %vm6308_vm6, %v5683_v8  ;;  %v2758_v3 = vrot.slane %v2757_v41, 2  ;;  %vm6320_vm6 = vmmov %vm6303_vm0 }
 0x976   :  { %4514 = vmatprep.subr.bf16.mxu0 %v4513_v10 }
 0x979   :  { %4516 = vmatpush3.bf16.msra.mxu0 %v4513_v10  ;;  %v2759_v10 = vadd.f32 %v2758_v3, %v2757_v41 }
 0x97a   :  { %4518 = vmatprep.subr.bf16.mxu0 %v4517_v40 }
 0x97b   :  { %v2760_v61 = vrot.slane %v2759_v10, 1 }
 0x97d   :  { %4520 = vmatpush3.bf16.msra.mxu0 %v4517_v40  ;;  %v2761_v52 = vadd.f32 %v2760_v61, %v2759_v10  ;;  %v5730_v10 = vpack.i.bf16 %v5624_v1, %v5618_v33 }
 0x97e   :  { %4522 = vmatprep.subr.bf16.mxu0 %v4521_v29 }
 0x97f   :  { %v2762_v4 = vmax.f32 %v2761_v52, 1.0 }
 0x981   :  { %4524 = vmatpush3.bf16.msra.mxu0 %v4521_v29 }
 0x984   :  { %4273 = vmatmul.mubr.msk.f32.vlgmr.msra.gmra.mrb[24].mxu0 %vm6309_vm10, %v5686_v38  ;;  %vm6321_vm10 = vmmov 0  }
 0x985   :  { %4275 = vmatprep.mubr.msk.f32.mxu0 %vm6310_vm11, %v5692_v49  ;;  %vm6322_vm11 = vmmov %vm6317_vm4 }
 0x988   :  { %4276 = vmatmul.mubr.msk.f32.gmra.mrb[26].mxu0 %vm6311_vm12, %v5695_v39  ;;  %vm6323_vm12 = vmmov %vm6317_vm4 }
 0x9c0   :  { %v5722_v27 = vpop.f32.mrb[28].mxu1 }
 0x9c1   :  { %v4230_v9 = vpop.f32.mrb[29].mxu1 }
 0x9c8   :  { %v4252_v23 = vpop.f32.mrb[30].mxu1 }
 0x9c9   :  { %v2482_v48 = vadd.f32 1.0, %v4252_v23  ;;  %v2476_v53 = vpop.f32.mrb[31].mxu1 }
 0x9ca   :  { %v2477_v15 = vadd.f32 1.0, %v2476_v53 }
 0x9cb   :  { %v2496_v22 = vmul.f32 %v2482_v48, %v5624_v1 }
 0x9cc   :  { %v2495_v40 = vmul.f32 %v2477_v15, %v5618_v33  ;;  %v4255_v43 = vpop.f32.mrb[32].mxu1 }
 0x9cd   :  { %4702 = vrsqrt.f32 %v2496_v22  ;;  %v2492_v60 = vadd.f32 1.0, %v4255_v43  ;;  %v2486_v29 = vpop.f32.mrb[33].mxu1  ;;  %vm2500_vm5 = vcmp.gt.f32.partialorder %v2496_v22, 0.0 }
 0x9ce   :  { %4704 = vrsqrt.f32 %v2495_v40  ;;  %v2487_v54 = vadd.f32 1.0, %v2486_v29  ;;  %vm2499_vm14 = vcmp.gt.f32.partialorder %v2495_v40, 0.0 }
 0x9cf   :  { %v2498_v63 = vmul.f32 %v2492_v60, %v5642_v34 }
 0x9d0   :  { %v2497_v62 = vmul.f32 %v2487_v54, %v5637_v44 }
 0x9d1   :  { %4706 = vrsqrt.f32 %v2498_v63  ;;  %vm2502_vm15 = vcmp.gt.f32.partialorder %v2498_v63, 0.0 }
 0x9d2   :  { %4708 = vrsqrt.f32 %v2497_v62  ;;  %vm2501_vm3 = vcmp.gt.f32.partialorder %v2497_v62, 0.0 }
 0x9d3   :  { %4710 = vrcp.f32 %v2762_v4 }
 0x9d7   :  { %v4703_v55 = vpop.eup %4702 }
 0x9d8   :  { %v4705_v36 = vpop.eup %4704  ;;  %v2508_v9 = vsel %vm2500_vm5, %v4703_v55, 0.0  ;;  %vm6328_vm5 = vmmov %vm6327_vm2 }
 0x9d9   :  { %2615 = vperm.xlu1 %4604, %v2508_v9   ;;  %v2507_v41 = vsel %vm2499_vm14, %v4705_v36, 0.0  ;;  %vm6329_vm14 = vmmov %vm6327_vm2 }
 0x9da   :  { %2610 = vperm.xlu0 %4603, %v2507_v41  }
 0x9db   :  { %v4707_v3 = vpop.eup %4706 }
 0x9dc   :  { %v4709_v23 = vpop.eup %4708  ;;  %v2510_v48 = vsel %vm2502_vm15, %v4707_v3, 0.0  ;;  %vm6330_vm15 = vmmov %vm6327_vm2 }
 0x9dd   :  { %2625 = vperm.xlu1 %4604, %v2510_v48   ;;  %v2509_v53 = vsel %vm2501_vm3, %v4709_v23, 0.0  ;;  %v4711_v15 = vpop.eup %4710  ;;  %vm6331_vm3 = vmmov %vm6327_vm2 }
 0x9de   :  { %2620 = vperm.xlu0 %4603, %v2509_v53  }
 0x9e1   :  { %2738 = vperm.xlu1 %4604, %v5637_v44  }
 0x9e2   :  { %4611 = vperm.xlu0 %4603, %v5730_v10  }
 0x9e5   :  { %2779 = vperm.xlu1 %4604, %v4711_v15  }
 0x9e6   :  { %2742 = vperm.xlu0 %4603, %v5642_v34  }
 0xa47   :  { %v5735_v22 = vpop.f32.mrb[22].mxu0 }
 0xa48   :  { %6316 = vst [vmem:[#allocation20_spill] sm:$0xff] %v5735_v22  ;;  %v4241_v40 = vpop.f32.mrb[23].mxu0 }
 0xa57   :  { %v4274_v43 = vpop.f32.mrb[24].mxu0 }
 0xa58   :  { %v2616_v60 = vpop.permute.xlu1 %2615  ;;  %v2589_v29 = vpop.f32.mrb[25].mxu0 }
 0xa59   :  { %v2611_v61 = vpop.permute.xlu0 %2610  ;;  %v2629_v54 = vmul.f32 %v4274_v43, %v2616_v60 }
 0xa5a   :  { %v2628_v63 = vmul.f32 %v2611_v61, %v2589_v29 }
 0xa5b   :  { %v4277_v62 = vpop.f32.mrb[26].mxu0 }
 0xa5c   :  { %v4525_v52 = vpack.c.bf16 %v2629_v54, %v2628_v63  ;;  %v2626_v4 = vpop.permute.xlu1 %2625  ;;  %v2599_v55 = vpop.f32.mrb[27].mxu0 }
 0xa5d   :  { %v2621_v36 = vpop.permute.xlu0 %2620  ;;  %v2631_v9 = vmul.f32 %v4277_v62, %v2626_v4 }
 0xa5e   :  { %v2630_v41 = vmul.f32 %v2621_v36, %v2599_v55  ;;  %4526 = vmatprep.subr.bf16.mxu1 %v4525_v52 }
 0xa5f   :  { %4528 = vmatpush3.bf16.msra.mxu1 %v4525_v52 }
 0xa60   :  { %v4529_v3 = vpack.c.bf16 %v2631_v9, %v2630_v41  ;;  %v5741_v15 = vpop.permute.xlu1 %2738 }
 0xa61   :  { %v4612_v23 = vpop.permute.xlu0 %4611  ;;  %v2970_v62 = vmul.f32 %v5546_v58, %v5741_v15 }
 0xa62   :  { %v5737_v48 = vunpack.i.h.bf16 %v4612_v23  ;;  %v5739_v53 = vunpack.i.l.bf16 %v4612_v23  ;;  %4530 = vmatprep.subr.bf16.mxu1 %v4529_v3 }
 0xa63   :  { %4532 = vmatpush3.bf16.msra.mxu1 %v4529_v3 }
 0xa64   :  { %v2968_v40 = vmul.f32 %v5531_v5, %v5739_v53  ;;  %v2969_v43 = vmul.f32 %v5539_v30, %v5737_v48  ;;  %4533 = vmatprep.subr.bf16.mxu1 %v6208_v46 }
 0xa65   :  { %v5748_v29 = vpop.permute.xlu0 %2742 }
 0xa66   :  { %v2971_v52 = vmul.f32 %v5553_v17, %v5748_v29  ;;  %4311 = vmatprep.mubr.msk.f32.mxu0 %vm6317_vm4, %v2968_v40  ;;  %4287 = vmatmul.mubr.msk.f32.vlgmr.msra.gmra.mrb[34].mxu1 %vm6318_vm9, %v5663_v47  ;;  %v4541_v55 = vpack.c.bf16 %v2969_v43, %v2968_v40  ;;  %v5777_v47 = vld [vmem:[#allocation8 + $0x8] sm:$0xf]  ;;  %vm6332_vm4 = vmmov %vm6327_vm2 }
 0xa67   :  { %4289 = vmatprep.mubr.msk.f32.mxu1 %vm6303_vm0, %v5670_v45  ;;  %v2839_v45 = vmul.f32 %v5777_v47, %v5777_v47  ;;  %v2724_v40 = vrot.slane %v5777_v47, %v5132_v57  ;;  %vm6333_vm9 = vmmov %vm6327_vm2  ;;  %vm6336_vm0 = vnez %v6222_v31  ;;  %v6349_v31 = vmov 0.0  }
 0xa68   :  { %4543 = vmatprep.subr.msk.bf16.mxu0 %vm6319_vm1, %v4541_v55  ;;  %v4547_v3 = vpack.c.bf16 %v2971_v52, %v2970_v62 }
 0xa69   :  { %4546 = vmatpush3.bf16.xpose.msk.msra.mxu0 %vm6319_vm1, %v4541_v55 }
 0xa6a   :  { %4549 = vmatprep.subr.msk.bf16.mxu0 %vm6319_vm1, %v4547_v3  ;;  %4290 = vmatmul.mubr.msk.f32.gmra.mrb[36].mxu1 %vm6320_vm6, %v5677_v2  ;;  %v2840_v2 = vsel %vm6325_vm8, %v2839_v45, 0.0 }
 0xa6b   :  { %4300 = vmatprep.mubr.msk.f32.mxu1 %vm6321_vm10, %v6206_v51  ;;  %2841 = vadd.xlane.f32.xlu0 %v2840_v2 }
 0xa71   :  { %4552 = vmatpush3.bf16.xpose.msk.msra.mxu0 %vm6319_vm1, %v4547_v3  ;;  %vm6337_vm1 = vmmov %vm6327_vm2 }
 0xa72   :  { %4553 = vmatprep.subr.bf16.mxu0 %v6208_v46  ;;  %vm6338_vm6 = vmmov %vm6337_vm1 }
 0xa73   :  { %vm6343_vm8 = vmmov %vm6337_vm1 }
 0xa78   :  { %4312 = vmatmul.mubr.msk.f32.vlgmr.msra.gmra.mrb[28].mxu0 %vm6322_vm11, %v2969_v43  ;;  %vm6340_vm11 = vmmov %vm6337_vm1 }
 0xa79   :  { %4314 = vmatprep.mubr.msk.f32.mxu0 %vm6323_vm12, %v2970_v62  ;;  %vm6341_vm12 = vmmov %vm6337_vm1 }
 0xa7c   :  { %4315 = vmatmul.mubr.msk.f32.gmra.mrb[30].mxu0 %vm6324_vm7, %v2971_v52  ;;  %vm6342_vm7 = vcmask 1041408  }
 0xa7d   :  { %4333 = vmatprep.mubr.msk.f32.mxu0 %vm6321_vm10, %v6206_v51 }
 0xb39   :  { %v4288_v50 = vpop.f32.mrb[34].mxu1 }
 0xb3a   :  { %v2704_v23 = vadd.f32 %v4288_v50, %v2629_v54  ;;  %v2698_v43 = vpop.f32.mrb[35].mxu1 }
 0xb3b   :  { %v2699_v62 = vadd.f32 %v2698_v43, %v2628_v63 }
 0xb3c   :  { %v2718_v55 = vmul.f32 %v2704_v23, %v2616_v60 }
 0xb3d   :  { %v2717_v52 = vmul.f32 %v2699_v62, %v2611_v61  ;;  %v4291_v3 = vpop.f32.mrb[36].mxu1 }
 0xb3e   :  { %v2726_v12 = vadd.f32 %v2724_v40, %v2718_v55  ;;  %v2714_v0 = vadd.f32 %v4291_v3, %v2631_v9  ;;  %v2708_v51 = vpop.f32.mrb[37].mxu1  ;;  %v2780_v55 = vpop.permute.xlu1 %2779 }
 0xb3f   :  { %v2725_v46 = vadd.f32 %v2724_v40, %v2717_v52  ;;  %v2709_v7 = vadd.f32 %v2708_v51, %v2630_v41 }
 0xb40   :  { %v2746_v6 = vmul.f32 %v5737_v48, %v2726_v12  ;;  %v2720_v22 = vmul.f32 %v2714_v0, %v2626_v4 }
 0xb41   :  { %v2745_v45 = vmul.f32 %v5739_v53, %v2725_v46  ;;  %v2719_v2 = vmul.f32 %v2709_v7, %v2621_v36 }
 0xb42   :  { %v2765_v54 = vsel %vm6326_vm13, %v2746_v6, 0.0  ;;  %v2728_v50 = vadd.f32 %v2724_v40, %v2720_v22  ;;  %vm6344_vm13 = vmmov %vm6342_vm7 }
 0xb43   :  { %v2764_v18 = vsel %vm6327_vm2, %v2745_v45, 0.0  ;;  %v2727_v63 = vadd.f32 %v2724_v40, %v2719_v2  ;;  %vm6345_vm2 = vcmask 15360  }
 0xb44   :  { %v2766_v60 = vadd.f32 %v2765_v54, %v2764_v18  ;;  %v2748_v61 = vmul.f32 %v5748_v29, %v2728_v50 }
 0xb45   :  { %v2747_v9 = vmul.f32 %v5741_v15, %v2727_v63 }
 0xb46   :  { %v2769_v12 = vsel %vm6329_vm14, %v2748_v61, 0.0  ;;  %vm6347_vm14 = vmmov %vm6345_vm2 }
 0xb47   :  { %v2767_v23 = vsel %vm6328_vm5, %v2747_v9, 0.0  ;;  %vm6346_vm5 = vmmov %vm6345_vm2 }
 0xb48   :  { %v2768_v51 = vadd.f32 %v2767_v23, %v2766_v60 }
 0xb4a   :  { %v2770_v0 = vadd.f32 %v2769_v12, %v2768_v51 }
 0xb4b   :  { %v5792_v4 = vpop.f32.mrb[28].mxu0 }
 0xb4c   :  { %v2771_v46 = vrot.slane %v2770_v0, 4  ;;  %v5794_v7 = vpop.f32.mrb[29].mxu0 }
 0xb4e   :  { %v2772_v22 = vadd.f32 %v2771_v46, %v2770_v0 }
 0xb4f   :  { %v5796_v36 = vpop.f32.mrb[30].mxu0 }
 0xb50   :  { %v2773_v41 = vrot.slane %v2772_v22, 2  ;;  %v5798_v18 = vpop.f32.mrb[31].mxu0 }
 0xb52   :  { %v2774_v40 = vadd.f32 %v2773_v41, %v2772_v22 }
 0xb54   :  { %v2775_v43 = vrot.slane %v2774_v40, 1 }
 0xb56   :  { %v2776_v62 = vadd.f32 %v2775_v43, %v2774_v40 }
 0xb58   :  { %v2782_v52 = vmul.f32 %v2780_v55, %v2776_v62 }
 0xb5a   :  { %v2783_v3 = vsub.f32 %v2745_v45, %v2782_v52  ;;  %v2784_v2 = vsub.f32 %v2746_v6, %v2782_v52  ;;  %v2785_v54 = vsub.f32 %v2747_v9, %v2782_v52  ;;  %v2786_v50 = vsub.f32 %v2748_v61, %v2782_v52 }
 0xb5c   :  { %v2787_v63 = vmul.f32 %v2783_v3, %v2783_v3  ;;  %v2788_v60 = vmul.f32 %v2784_v2, %v2784_v2  ;;  %v2789_v23 = vmul.f32 %v2785_v54, %v2785_v54  ;;  %v2790_v51 = vmul.f32 %v2786_v50, %v2786_v50 }
 0xb5e   :  { %v2791_v12 = vmul.f32 %v5739_v53, %v2787_v63  ;;  %v2792_v0 = vmul.f32 %v5737_v48, %v2788_v60  ;;  %v2793_v46 = vmul.f32 %v2789_v23, %v5741_v15  ;;  %v2794_v22 = vmul.f32 %v2790_v51, %v5748_v29 }
 0xb5f   :  { %v6334_v51 = vsub.s32 1, %v5129_v56 }
 0xb60   :  { %v2795_v41 = vsel %vm6330_vm15, %v2791_v12, 0.0  ;;  %v2796_v40 = vsel %vm6331_vm3, %v2792_v0, 0.0  ;;  %v2798_v6 = vsel %vm6332_vm4, %v2793_v46, 0.0  ;;  %v2800_v9 = vsel %vm6333_vm9, %v2794_v22, 0.0  ;;  %vm6348_vm15 = vmmov %vm6345_vm2 }
 0xb61   :  { %v2797_v45 = vadd.f32 %v2796_v40, %v2795_v41  ;;  %v2818_v12 = vrot.slane %v5777_v47, %v6334_v51  ;;  %v6335_v46 = vsub.s32 2, %v5129_v56  ;;  %vm3160_vm3 = vcmp.gt.f32.partialorder %v5792_v4, 0.5 }
 0xb62   :  { %vm3159_vm4 = vcmp.gt.f32.partialorder %v5794_v7, 0.5  ;;  %vm3161_vm9 = vcmp.gt.f32.partialorder %v5798_v18, 0.5 }
 0xb63   :  { %v2799_v61 = vadd.f32 %v2798_v6, %v2797_v45  ;;  %v2826_v41 = vrot.slane %v5777_v47, %v6335_v46 }
 0xb65   :  { %v2801_v43 = vadd.f32 %v2800_v9, %v2799_v61 }
 0xb67   :  { %v2802_v62 = vrot.slane %v2801_v43, 4 }
 0xb69   :  { %v2803_v52 = vadd.f32 %v2802_v62, %v2801_v43 }
 0xb6b   :  { %v2804_v63 = vrot.slane %v2803_v52, 2 }
 0xb6d   :  { %v2805_v39 = vadd.f32 %v2804_v63, %v2803_v52  ;;  %v2848_v52 = vrot.slane %v5777_v47, %v5154_v13 }
 0xb6f   :  { %v2806_v60 = vrot.slane %v2805_v39, 1 }
 0xb71   :  { %v2807_v49 = vadd.f32 %v2806_v60, %v2805_v39 }
 0xb73   :  { %v2808_v23 = vmul.f32 %v2807_v49, %v2780_v55 }
 0xb75   :  { %v2809_v38 = vadd.f32 1e-05, %v2808_v23 }
 0xb77   :  { %4712 = vrsqrt.f32 %v2809_v38 }
 0xb81   :  { %v4713_v0 = vpop.eup %4712 }
 0xb82   :  { %v2813_v22 = vmul.f32 %v4713_v0, %v2785_v54  ;;  %v2811_v40 = vmul.f32 %v4713_v0, %v2783_v3  ;;  %v2812_v45 = vmul.f32 %v4713_v0, %v2784_v2  ;;  %v2814_v6 = vmul.f32 %v4713_v0, %v2786_v50 }
 0xb84   :  { %v2819_v61 = vmul.f32 %v2818_v12, %v2811_v40  ;;  %v2820_v9 = vmul.f32 %v2818_v12, %v2812_v45  ;;  %v2821_v43 = vmul.f32 %v2818_v12, %v2813_v22  ;;  %v2822_v39 = vmul.f32 %v2818_v12, %v2814_v6 }
 0xb85   :  { %v3069_v22 = vmul.f32 0.8, %v5722_v27 }
 0xb86   :  { %v2827_v49 = vadd.f32 %v2826_v41, %v2819_v61  ;;  %v2828_v55 = vadd.f32 %v2826_v41, %v2820_v9  ;;  %v2829_v38 = vadd.f32 %v2826_v41, %v2821_v43  ;;  %v2830_v62 = vadd.f32 %v2826_v41, %v2822_v39 }
 0xb87   :  { %v3070_v61 = vceil.f32 %v3069_v22  ;;  %v2878_v9 = vrot.slane %v5777_v47, 3  ;;  %v2842_v47 = vpop.xlane.xlu0 %2841 }
 0xb88   :  { %v2831_v63 = vmax.f32 %v2827_v49, 0.0  ;;  %v2832_v60 = vmax.f32 %v2828_v55, 0.0  ;;  %v2833_v23 = vmax.f32 %v2829_v38, 0.0  ;;  %v2834_v51 = vmax.f32 %v2830_v62, 0.0 }
 0xb89   :  { %v2843_v43 = vadd.f32 1e-24, %v2842_v47 }
 0xb8a   :  { %v5817_v54 = vmul.f32 %v5739_v53, %v2831_v63  ;;  %v5820_v3 = vmul.f32 %v5737_v48, %v2832_v60  ;;  %v5823_v2 = vmul.f32 %v2833_v23, %v5741_v15  ;;  %v5826_v50 = vmul.f32 %v2834_v51, %v5748_v29 }
 0xb8b   :  { %v6339_v29 = vmov 0.0|0.0   ;;  %4714 = vrsqrt.f32 %v2843_v43 }
 0xb8c   :  { %v4534_v12 = vpack.c.bf16 %v5820_v3, %v5817_v54  ;;  %v2850_v0 = vmul.f32 %v2848_v52, %v5820_v3  ;;  %v2849_v46 = vmul.f32 %v2848_v52, %v5817_v54  ;;  %v2851_v15 = vmul.f32 %v2848_v52, %v5823_v2 }
 0xb8d   :  { %v2852_v41 = vmul.f32 %v2848_v52, %v5826_v50  ;;  %v4538_v6 = vpack.c.bf16 %v5826_v50, %v5823_v2 }
 0xb8e   :  { %4536 = vmatpush3.bf16.xpose.msk.msra.mxu1 %vm6336_vm0, %v4534_v12  ;;  %v2856_v53 = vsel %vm6337_vm1, %v2850_v0, 0.0  ;;  %v2853_v48 = vsel %vm6338_vm6, %v2849_v46, 0.0  ;;  %v2859_v40 = vsel %vm6340_vm11, %v2851_v15, 0.0  ;;  %vm6353_vm6 = vcmp.ne.s32.totalorder %v5211_v21, %v5129_v56 }
 0xb8f   :  { %2857 = vadd.xlane.f32.xlu0 %v2856_v53  ;;  %2854 = vadd.xlane.f32.xlu1 %v2853_v48  ;;  %v2862_v45 = vsel %vm6341_vm12, %v2852_v41, 0.0  ;;  %vm5876_vm11 = vmand %vm3159_vm4, %vm6353_vm6  ;;  %vm3162_vm12 = vcmp.gt.f32.partialorder %v5796_v36, 0.5 }
 0xb90   :  { %4537 = vmatprep.subr.bf16.mxu1 %v6339_v29 }
 0xb93   :  { %2860 = vadd.xlane.f32.xlu0 %v2859_v40  ;;  %2863 = vadd.xlane.f32.xlu1 %v2862_v45 }
 0xb95   :  { %v4715_v39 = vpop.eup %4714 }
 0xb96   :  { %4540 = vmatpush3.bf16.xpose.msk.msra.mxu1 %vm6336_vm0, %v4538_v6  ;;  %v2964_v55 = vrot.slane %v4715_v39, 3  ;;  %vm6350_vm0 = vcmp.ne.s32.totalorder %v5211_v21, %v5208_v20 }
 0xb97   :  { %4317 = vmatprep.subr.msk.mxu1 %vm6342_vm7, %v3070_v61  ;;  %vm5868_vm1 = vmand %vm3160_vm3, %vm6350_vm0  ;;  %vm6356_vm7 = vcmp.ne.s32.totalorder %v5211_v21, %v5214_v26  ;;  %vm6360_vm0 = vcmp.ne.s32.totalorder %v5211_v21, %v5217_v32 }
 0xb98   :  { %vm5894_vm6 = vmand %vm3162_vm12, %vm6360_vm0 }
 0xb9d   :  { %4301 = vmatmul.mubr.msk.f32.vlgmr.msra.gmra.mrb[38].mxu1 %vm6343_vm8, %v2878_v9  ;;  %vm5884_vm8 = vmand %vm3161_vm9, %vm6356_vm7  ;;  %vm6363_vm7 = vcmp.lt.s32.totalorder %v5211_v21, %v5129_v56 }
 0xb9e   :  { %4318 = vmatpush3.msk.msra.mxu1 %vm6344_vm13, %v3070_v61  ;;  %4319 = vmatprep.mubr.msk.f32.mxu1 %vm6345_vm2, %v5531_v5  ;;  %v2868_v5 = vrot.slane %v4715_v39, %v5154_v13 }
 0xb9f   :  { %4559 = vmatprep.subr.bf16.mxu1 %v6339_v29 }
 0xba1   :  { %4320 = vmatmul.mubr.msk.f32.vlgmr.msra.gmra.mrb[40].mxu1 %vm6346_vm5, %v5539_v30  ;;  %vm6359_vm5 = vcmp.lt.s32.totalorder %v5211_v21, %v5208_v20 }
 0xba2   :  { %4322 = vmatprep.mubr.msk.f32.mxu1 %vm6347_vm14, %v5546_v58 }
 0xba5   :  { %4323 = vmatmul.mubr.msk.f32.gmra.mrb[42].mxu1 %vm6348_vm15, %v5553_v17 }
 0xba6   :  { %4344 = vmatprep.mubr.msk.f32.mxu1 %vm6321_vm10, %v6349_v31 }
 0xc1c   :  { %v2858_v49 = vpop.xlane.xlu0 %2857  ;;  %v2855_v38 = vpop.xlane.xlu1 %2854 }
 0xc1d   :  { %v2870_v30 = vmul.f32 %v2868_v5, %v2858_v49  ;;  %v2869_v58 = vmul.f32 %v2868_v5, %v2855_v38 }
 0xc20   :  { %v2861_v60 = vpop.xlane.xlu0 %2860  ;;  %v2864_v51 = vpop.xlane.xlu1 %2863 }
 0xc21   :  { %v2871_v23 = vmul.f32 %v2868_v5, %v2861_v60  ;;  %v2872_v0 = vmul.f32 %v2868_v5, %v2864_v51  ;;  %v6370_v5 = vmov 1.0|1.0   ;;  %v4876_v51 = vmov 1  }
 0xc70   :  { %v2959_v62 = vpop.f32.mrb[38].mxu1 }
 0xc71   :  { %v2966_v52 = vmul.f32 %v2964_v55, %v2959_v62  ;;  %v4302_v63 = vpop.f32.mrb[39].mxu1 }
 0xc73   :  { %4716 = vtanh.f32 %v2966_v52 }
 0xc74   :  { %v4321_v17 = vpop.f32.mrb[40].mxu1  ;;  %4718 = vtanh.f32 %v2870_v30 }
 0xc75   :  { %v3140_v12 = vpop.f32.mrb[41].mxu1  ;;  %4720 = vtanh.f32 %v2869_v58 }
 0xc76   :  { %4722 = vtanh.f32 %v2871_v23  ;;  %v4630_v23 = vpack.i.bf16 %v5642_v34, %v5637_v44 }
 0xc77   :  { %4724 = vtanh.f32 %v2872_v0 }
 0xc78   :  { %v4324_v61 = vpop.f32.mrb[42].mxu1 }
 0xc79   :  { %v3150_v9 = vpop.f32.mrb[43].mxu1 }
 0xc7d   :  { %v4717_v13 = vpop.eup %4716 }
 0xc7e   :  { %v3170_v53 = vrot.slane %v4717_v13, %v5132_v57  ;;  %v4719_v48 = vpop.eup %4718 }
 0xc7f   :  { %v4721_v7 = vpop.eup %4720 }
 0xc80   :  { %vm3172_vm13 = vcmp.gt.f32.partialorder %v3170_v53, %v4719_v48  ;;  %vm3176_vm2 = vcmp.eq.f32.partialorder %v3170_v53, %v4719_v48  ;;  %vm3175_vm15 = vcmp.eq.f32.partialorder %v3170_v53, %v4721_v7  ;;  %vm3171_vm4 = vcmp.gt.f32.partialorder %v3170_v53, %v4721_v7  ;;  %v4723_v57 = vpop.eup %4722 }
 0xc81   :  { %vm3180_vm14 = vmand %vm3176_vm2, %vm6359_vm5  ;;  %vm3177_vm5 = vcmp.eq.f32.partialorder %v3170_v53, %v4723_v57  ;;  %vm3173_vm10 = vcmp.gt.f32.partialorder %v3170_v53, %v4723_v57  ;;  %v4725_v41 = vpop.eup %4724 }
 0xc82   :  { %vm3184_vm3 = vmor %vm3172_vm13, %vm3180_vm14  ;;  %vm6364_vm13 = vcmask 261120   ;;  %vm3178_vm0 = vcmp.eq.f32.partialorder %v3170_v53, %v4725_v41 }
 0xc83   :  { %vm3188_vm9 = vmand %vm5868_vm1, %vm3184_vm3  ;;  %vm6365_vm1 = vcmp.lt.s32.totalorder %v5211_v21, %v5214_v26 }
 0xc84   :  { %v3836_v15 = vsel %vm3188_vm9, 1.0, %v6349_v31  ;;  %vm3179_vm2 = vmand %vm3175_vm15, %vm6363_vm7  ;;  %vm3174_vm7 = vcmp.gt.f32.partialorder %v3170_v53, %v4725_v41 }
 0xc85   :  { %v3202_v20 = vsel %vm6364_vm13, %v3836_v15, 0.0  ;;  %vm3183_vm14 = vmor %vm3171_vm4, %vm3179_vm2 }
 0xc86   :  { %3203 = vadd.xlane.f32.xlu1 %v3202_v20  ;;  %vm3187_vm12 = vmand %vm5876_vm11, %vm3183_vm14  ;;  %vm6367_vm11 = vcmp.lt.s32.totalorder %v5211_v21, %v5217_v32 }
 0xc87   :  { %v3835_v22 = vsel %vm3187_vm12, 1.0, %v6349_v31  ;;  %vm3181_vm3 = vmand %vm3177_vm5, %vm6365_vm1 }
 0xc88   :  { %vm6366_vm9 = vmmov %vm6364_vm13 }
 0xc89   :  { %v3199_v56 = vsel %vm6366_vm9, %v3835_v22, 0.0  ;;  %vm3185_vm15 = vmor %vm3173_vm10, %vm3181_vm3  ;;  %vm3211_vm3 = vcmp.gt.f32.partialorder %v5618_v33, 0.5 }
 0xc8a   :  { %3200 = vadd.xlane.f32.xlu0 %v3199_v56  ;;  %vm3189_vm4 = vmand %vm5884_vm8, %vm3185_vm15  ;;  %vm3212_vm8 = vcmp.gt.f32.partialorder %v5624_v1, 0.5  ;;  %vm3213_vm15 = vcmp.gt.f32.partialorder %v5637_v44, 0.5 }
 0xc8b   :  { %v3837_v40 = vsel %vm3189_vm4, 1.0, %v6349_v31  ;;  %vm3182_vm2 = vmand %vm3178_vm0, %vm6367_vm11  ;;  %vm3214_vm11 = vcmp.gt.f32.partialorder %v5642_v34, 0.5 }
 0xc8c   :  { %vm3186_vm13 = vmor %vm3174_vm7, %vm3182_vm2 }
 0xc8d   :  { %vm6368_vm14 = vmmov %vm6366_vm9 }
 0xc8e   :  { %v3205_v45 = vsel %vm6368_vm14, %v3837_v40, 0.0  ;;  %vm3190_vm5 = vmand %vm5894_vm6, %vm3186_vm13  ;;  %v6373_v40 = vmov 0  }
 0xc8f   :  { %3206 = vadd.xlane.f32.xlu0 %v3205_v45  ;;  %v3838_v26 = vsel %vm3190_vm5, 1.0, %v6349_v31  ;;  %vm6369_vm10 = vmmov %vm6366_vm9 }
 0xc90   :  { %v3208_v6 = vsel %vm6369_vm10, %v3838_v26, 0.0  ;;  %vm6371_vm5 = vmmov %vm6369_vm10  ;;  %vm6372_vm10 = vmmov 0  }
 0xc91   :  { %3209 = vadd.xlane.f32.xlu1 %v3208_v6  ;;  %v6000_v6 = vld [vmem:[%s6171_s3 + $0x10] sm:$0xff] }
 0xd13   :  { %v3204_v47 = vpop.xlane.xlu1 %3203 }
 0xd14   :  { %vm3216_vm12 = vcmp.lt.f32.partialorder %v3204_v47, %v4321_v17  ;;  %v4620_v17 = vpack.i.bf16 %v5320_v24, %v5323_v25  ;;  %v6007_v47 = vld [vmem:[%s6171_s3 + $0x18] sm:$0xff] }
 0xd15   :  { %vm3220_vm1 = vmand %vm3212_vm8, %vm3216_vm12 }
 0xd16   :  { %v5925_v32 = vsel %vm3220_vm1, 1.0, %v6349_v31 }
 0xd17   :  { %v3201_v21 = vpop.xlane.xlu0 %3200  ;;  %v3228_v43 = vmul.f32 %v4719_v48, %v5925_v32 }
 0xd18   :  { %vm3215_vm6 = vcmp.lt.f32.partialorder %v3201_v21, %v3140_v12 }
 0xd19   :  { %vm3219_vm0 = vmand %vm3211_vm3, %vm3215_vm6  ;;  %3238 = vperm.xlu1 %4604, %v3228_v43  }
 0xd1a   :  { %v5930_v39 = vsel %vm3219_vm0, 1.0, %v6349_v31  ;;  %vm4554_vm9 = vmpackc.low %vm3220_vm1, %vm3219_vm0 }
 0xd1b   :  { %4555 = vmatpush3.bf16.msk.msra.mxu0 %vm4554_vm9, %v6370_v5  ;;  %v3227_v55 = vmul.f32 %v4721_v7, %v5930_v39  ;;  %v4635_v38 = vpack.i.bf16 %v5925_v32, %v5930_v39  ;;  %vm6374_vm1 = vmmov %vm6371_vm5 }
 0xd1c   :  { %v3207_v49 = vpop.xlane.xlu0 %3206  ;;  %4556 = vmatprep.subr.bf16.mxu0 %v6339_v29 }
 0xd1d   :  { %vm3217_vm7 = vcmp.lt.f32.partialorder %v3207_v49, %v3150_v9  ;;  %3233 = vperm.xlu0 %4603, %v3227_v55  }
 0xd1e   :  { %vm3221_vm4 = vmand %vm3213_vm15, %vm3217_vm7  ;;  %v3210_v62 = vpop.xlane.xlu1 %3209 }
 0xd1f   :  { %v5939_v30 = vsel %vm3221_vm4, 1.0, %v6349_v31  ;;  %vm3218_vm2 = vcmp.lt.f32.partialorder %v3210_v62, %v4324_v61 }
 0xd20   :  { %vm3222_vm13 = vmand %vm3214_vm11, %vm3218_vm2  ;;  %v3229_v52 = vmul.f32 %v4723_v57, %v5939_v30 }
 0xd21   :  { %v5944_v63 = vsel %vm3222_vm13, 1.0, %v6349_v31  ;;  %vm4557_vm14 = vmpackc.low %vm3222_vm13, %vm3221_vm4 }
 0xd22   :  { %4558 = vmatpush3.bf16.msk.msra.mxu0 %vm4557_vm14, %v6370_v5  ;;  %3243 = vperm.xlu1 %4604, %v3229_v52   ;;  %v3230_v58 = vmul.f32 %v4725_v41, %v5944_v63  ;;  %v4640_v60 = vpack.i.bf16 %v5944_v63, %v5939_v30  ;;  %v1156_v5 = vmul.f32 %v6007_v47, %v5320_v24 }
 0xd23   :  { %4565 = vmatprep.subr.bf16.mxu0 %v6339_v29  ;;  %v1155_v52 = vmul.f32 %v6000_v6, %v5323_v25 }
 0xd24   :  { %3248 = vperm.xlu0 %4603, %v3230_v58   ;;  %vm1160_vm15 = vcmp.gt.f32.partialorder %v1156_v5, 0.5 }
 0xd25   :  { %4334 = vmatmul.mubr.msk.f32.vlgmr.msra.gmra.mrb[32].mxu0 %vm6371_vm5, %v5702_v59  ;;  %vm1159_vm11 = vcmp.gt.f32.partialorder %v1155_v52, 0.5 }
 0xd26   :  { %4616 = vrot.lane.b32.xlu1 %v5415_v16, %s4875_s2  ;;  %4363 = vmatprep.mubr.msk.f32.mxu0 %vm6372_vm10, %v6349_v31 }
 0xd27   :  { %4645 = vset.pattern.permute.xlu1 %v4876_v51 }
 0xd28   :  { %4621 = vrot.lane.b32.xlu0 %v4620_v17, %s4875_s2  ;;  %v2282_v17 = vmul.f32 %v6007_v47, %v5642_v34 }
 0xd29   :  { %4646 = vset.pattern.permute.xlu0 %v4876_v51 }
 0xd2a   :  { %4626 = vrot.lane.b32.xlu1 %v5730_v10, %s4875_s2  ;;  %vm2286_vm2 = vcmp.gt.f32.partialorder %v2282_v17, 0.5  ;;  %v3535_v17 = vld [vmem:[#allocation9 + $0x40] sm:$0xff] }
 0xd2c   :  { %4631 = vrot.lane.b32.xlu0 %v4630_v23, %s4875_s2 }
 0xd2e   :  { %4636 = vrot.lane.b32.xlu1 %v4635_v38, %s4875_s2 }
 0xd30   :  { %4641 = vrot.lane.b32.xlu0 %v4640_v60, %s4875_s2 }
 0xd98   :  { %v3239_v16 = vpop.permute.xlu1 %3238 }
 0xd99   :  { %v5964_v12 = vmul.f32 %v3239_v16, %v5820_v3 }
 0xd9c   :  { %v3234_v0 = vpop.permute.xlu0 %3233 }
 0xd9d   :  { %v5967_v13 = vmul.f32 %v3234_v0, %v5817_v54  ;;  %v1163_v0 = vsel %vm1159_vm11, 1, %v6373_v40 }
 0xd9f   :  { %v4560_v10 = vpack.c.bf16 %v5964_v12, %v5967_v13 }
 0xda1   :  { %v3244_v46 = vpop.permute.xlu1 %3243  ;;  %4561 = vmatpush3.bf16.msra.mxu1 %v4560_v10 }
 0xda2   :  { %v5972_v53 = vmul.f32 %v3244_v46, %v5823_v2  ;;  %4562 = vmatprep.subr.bf16.mxu1 %v6339_v29  ;;  %v5983_v2 = vld [vmem:[%s6171_s3 + $0x8] sm:$0xff] }
 0xda3   :  { %v3249_v48 = vpop.permute.xlu0 %3248  ;;  %v1154_v55 = vmul.f32 %v5983_v2, %v5304_v11  ;;  %v1164_v11 = vsel %vm1160_vm15, 1, %v6373_v40  ;;  %v3405_v10 = vmul.f32 %v5983_v2, %v5925_v32 }
 0xda4   :  { %v5976_v4 = vmul.f32 %v3249_v48, %v5826_v50  ;;  %v5989_v50 = vld [vmem:[%s6171_s3] sm:$0xff] }
 0xda5   :  { %v4617_v3 = vpop.permute.xlu1 %4616  ;;  %vm1158_vm7 = vcmp.gt.f32.partialorder %v1154_v55, 0.5  ;;  %v2279_v62 = vmul.f32 %v5989_v50, %v5618_v33  ;;  %vm3409_vm14 = vcmp.gt.f32.partialorder %v3405_v10, 0.5  ;;  %v3531_v10 = vld [vmem:[#allocation9 + $0x20] sm:$0xff] }
 0xda6   :  { %v4563_v7 = vpack.c.bf16 %v5976_v4, %v5972_v53  ;;  %v4619_v54 = vunpack.i.h.bf16 %v4617_v3  ;;  %v4618_v18 = vunpack.i.l.bf16 %v4617_v3  ;;  %v1162_v60 = vsel %vm1158_vm7, 1, %v6373_v40 }
 0xda7   :  { %v4622_v57 = vpop.permute.xlu0 %4621  ;;  %vm2283_vm4 = vcmp.gt.f32.partialorder %v2279_v62, 0.5 }
 0xda8   :  { %v4624_v36 = vunpack.i.h.bf16 %v4622_v57  ;;  %v4623_v15 = vunpack.i.l.bf16 %v4622_v57  ;;  %4564 = vmatpush3.bf16.msra.mxu1 %v4563_v7  ;;  %v1226_v20 = vmul.f32 %v5983_v2, %v4619_v54  ;;  %v1225_v41 = vmul.f32 %v5989_v50, %v4618_v18 }
 0xda9   :  { %v4627_v22 = vpop.permute.xlu1 %4626  ;;  %4577 = vmatprep.subr.bf16.mxu1 %v6339_v29  ;;  %v2287_v25 = vsel %vm2283_vm4, 1, %v6373_v40  ;;  %v2290_v7 = vsel %vm2286_vm2, 1, %v6373_v40 }
 0xdaa   :  { %v4629_v56 = vunpack.i.h.bf16 %v4627_v22  ;;  %vm1230_vm8 = vcmp.gt.f32.partialorder %v1226_v20, 0.5  ;;  %vm1229_vm12 = vcmp.gt.f32.partialorder %v1225_v41, 0.5  ;;  %v1227_v61 = vmul.f32 %v6000_v6, %v4623_v15 }
 0xdab   :  { %v1234_v45 = vsel %vm1230_vm8, 1, %v6373_v40  ;;  %v1233_v26 = vsel %vm1229_vm12, 1, %v6373_v40  ;;  %4345 = vmatmul.mubr.msk.f32.vlgmr.msra.gmra.mrb[44].mxu1 %vm6374_vm1, %v5702_v59  ;;  %v1228_v21 = vmul.f32 %v6007_v47, %v4624_v36  ;;  %v1153_v59 = vmul.f32 %v5989_v50, %v5307_v14  ;;  %v4632_v58 = vpop.permute.xlu0 %4631 }
 0xdac   :  { %1241 = vperm.xlu0 %4646, %v1234_v45   ;;  %1238 = vperm.xlu1 %4645, %v1233_v26   ;;  %v2351_v9 = vmul.f32 %v5983_v2, %v4629_v56  ;;  %vm1231_vm3 = vcmp.gt.f32.partialorder %v1227_v61, 0.5  ;;  %v4628_v24 = vunpack.i.l.bf16 %v4627_v22  ;;  %v4633_v23 = vunpack.i.l.bf16 %v4632_v58 }
 0xdad   :  { %4382 = vmatprep.mubr.msk.f32.mxu1 %vm6372_vm10, %v6349_v31  ;;  %v1235_v49 = vsel %vm1231_vm3, 1, %v6373_v40  ;;  %vm1232_vm0 = vcmp.gt.f32.partialorder %v1228_v21, 0.5  ;;  %vm1157_vm9 = vcmp.gt.f32.partialorder %v1153_v59, 0.5  ;;  %v6033_v16 = vpop.permute.xlu1 %4636  ;;  %v4634_v46 = vunpack.i.h.bf16 %v4632_v58 }
 0xdae   :  { %vm2355_vm6 = vcmp.gt.f32.partialorder %v2351_v9, 0.5  ;;  %v1236_v14 = vsel %vm1232_vm0, 1, %v6373_v40  ;;  %v1161_v38 = vsel %vm1157_vm9, 1, %v6373_v40  ;;  %v2350_v33 = vmul.f32 %v5989_v50, %v4628_v24 }
 0xdaf   :  { %v2359_v43 = vsel %vm2355_vm6, 1, %v6373_v40  ;;  %v4638_v48 = vunpack.i.l.bf16 %v6033_v16  ;;  %v2352_v34 = vmul.f32 %v6000_v6, %v4633_v23  ;;  %v4642_v3 = vpop.permute.xlu0 %4641  ;;  %v2353_v57 = vmul.f32 %v6007_v47, %v4634_v46  ;;  %v3536_v23 = vld [vmem:[#allocation9 + $0x48] sm:$0xff] }
 0xdb0   :  { %2366 = vperm.xlu0 %4646, %v2359_v43   ;;  %1244 = vperm.xlu1 %4645, %v1235_v49   ;;  %vm2354_vm13 = vcmp.gt.f32.partialorder %v2350_v33, 0.5  ;;  %v4644_v18 = vunpack.i.h.bf16 %v4642_v3  ;;  %v3413_v36 = vsel %vm3409_vm14, 1, %v6373_v40  ;;  %v2280_v41 = vmul.f32 %v5983_v2, %v5624_v1 }
 0xdb1   :  { %v2358_v54 = vsel %vm2354_vm13, 1, %v6373_v40  ;;  %vm2356_vm5 = vcmp.gt.f32.partialorder %v2352_v34, 0.5  ;;  %v3475_v32 = vmul.f32 %v5989_v50, %v4638_v48  ;;  %vm2357_vm8 = vcmp.gt.f32.partialorder %v2353_v57, 0.5  ;;  %v3532_v48 = vld [vmem:[#allocation9 + $0x28] sm:$0xff]  ;;  %v3534_v57 = vld [vmem:[#allocation9 + $0x38] sm:$0xff] }
 0xdb2   :  { %v2360_v15 = vsel %vm2356_vm5, 1, %v6373_v40  ;;  %v3478_v20 = vmul.f32 %v6007_v47, %v4644_v18  ;;  %v1074_v22 = vmax.f32 %v5407_v19, 1.0  ;;  %v2361_v45 = vsel %vm2357_vm8, 1, %v6373_v40 }
 0xdb3   :  { %vm3479_vm10 = vcmp.gt.f32.partialorder %v3475_v32, 0.5  ;;  %vm2284_vm1 = vcmp.gt.f32.partialorder %v2280_v41, 0.5  ;;  %v2281_v26 = vmul.f32 %v6000_v6, %v5637_v44  ;;  %vm2324_vm3 = vcmp.gt.f32.partialorder %v5722_v27, 0.5  ;;  %v3533_v32 = vld [vmem:[#allocation9 + $0x30] sm:$0xff] }
 0xdb4   :  { %4649 = vset.pattern.permute.xlu0 %v6373_v40  ;;  %1247 = vperm.xlu1 %4645, %v1236_v14   ;;  %v3483_v56 = vsel %vm3479_vm10, 1, %v6373_v40  ;;  %vm3482_vm12 = vcmp.gt.f32.partialorder %v3478_v20, 0.5  ;;  %4726 = vrcp.f32 %v1074_v22  ;;  %v2288_v1 = vsel %vm2284_vm1, 1, %v6373_v40  ;;  %v3542_v20 = vld [vmem:[#allocation9 + $0x78] sm:$0xff] }
 0xdb5   :  { %1166 = vperm.xlu0 %4649, %v1161_v38   ;;  %v3486_v61 = vsel %vm3482_vm12, 1, %v6373_v40  ;;  %vm2285_vm6 = vcmp.gt.f32.partialorder %v2281_v26, 0.5  ;;  %v2325_v9 = vsel %vm2324_vm3, 1, %v6373_v40  ;;  %vm1198_vm0 = vcmp.gt.f32.partialorder %v5407_v19, 0.5 }
 0xdb6   :  { %v2289_v21 = vsel %vm2285_vm6, 1, %v6373_v40  ;;  %v3404_v44 = vmul.f32 %v5989_v50, %v5930_v39  ;;  %v1199_v43 = vsel %vm1198_vm0, 1, %v6373_v40  ;;  %vm113_vm9 = vcmask 517120  }
 0xdb7   :  { %v3406_v49 = vmul.f32 %v6000_v6, %v5939_v30  ;;  %114 = vst.msk [vmem:[#allocation2] sm:$0x3] %vm113_vm9, %v6349_v31  ;;  %v4639_v5 = vunpack.i.h.bf16 %v6033_v16  ;;  %v4643_v19 = vunpack.i.l.bf16 %v4642_v3  ;;  %v3407_v31 = vmul.f32 %v6007_v47, %v5944_v63  ;;  %v3527_v63 = vld [vmem:[#allocation9] sm:$0xff]  ;;  %v3528_v47 = vld [vmem:[#allocation9 + $0x8] sm:$0xff]  ;;  %v3530_v16 = vld [vmem:[#allocation9 + $0x18] sm:$0xff] }
 0xdb8   :  { %4647 = vset.pattern.permute.xlu1 %v6373_v40  ;;  %vm3408_vm15 = vcmp.gt.f32.partialorder %v3404_v44, 0.5  ;;  %v4566_v33 = vpack.c.bf16 %v3536_v23, %v3535_v17  ;;  %v4584_v3 = vpack.c.bf16 %v3532_v48, %v3531_v10  ;;  %vm6375_vm12 = vcmask 523264  }
 0xdb9   :  { %1175 = vperm.xlu0 %4649, %v1164_v11   ;;  %1169 = vperm.xlu1 %4647, %v1162_v60   ;;  %v3412_v55 = vsel %vm3408_vm15, 1, %v6373_v40  ;;  %vm3410_vm7 = vcmp.gt.f32.partialorder %v3406_v49, 0.5  ;;  %v3476_v39 = vmul.f32 %v5983_v2, %v4639_v5  ;;  %v3477_v14 = vmul.f32 %v6000_v6, %v4643_v19  ;;  %vm6376_vm1 = vmmov %vm6375_vm12 }
 0xdba   :  { %v3414_v50 = vsel %vm3410_vm7, 1, %v6373_v40  ;;  %vm3411_vm2 = vcmp.gt.f32.partialorder %v3407_v31, 0.5  ;;  %v2200_v6 = vmax.f32 %v5722_v27, 1.0  ;;  %v4578_v11 = vpack.c.bf16 %v3528_v47, %v3527_v63  ;;  %v3529_v27 = vld [vmem:[#allocation9 + $0x10] sm:$0xff]  ;;  %4567 = vmatpush3.bf16.msra.mxu0 %v4566_v33  ;;  %vm6377_vm3 = vmmov %vm6376_vm1 }
 0xdbb   :  { %vm3480_vm4 = vcmp.gt.f32.partialorder %v3476_v39, 0.5  ;;  %vm3481_vm11 = vcmp.gt.f32.partialorder %v3477_v14, 0.5  ;;  %v3415_v2 = vsel %vm3411_vm2, 1, %v6373_v40  ;;  %4568 = vmatprep.subr.bf16.mxu0 %v6339_v29  ;;  %vm6378_vm6 = vmmov %vm6376_vm1 }
 0xdbc   :  { %v3484_v30 = vsel %vm3480_vm4, 1, %v6373_v40  ;;  %v3485_v38 = vsel %vm3481_vm11, 1, %v6373_v40  ;;  %4728 = vrcp.f32 %v2200_v6  ;;  %4579 = vmatpush3.bf16.msra.mxu1 %v4578_v11  ;;  %vm6379_vm7 = vmmov %vm6376_vm1 }
 0xdbd   :  { %2292 = vperm.xlu0 %4649, %v2287_v25   ;;  %1172 = vperm.xlu1 %4647, %v1163_v0   ;;  %v4581_v25 = vpack.c.bf16 %v3530_v16, %v3529_v27  ;;  %v3538_v0 = vld [vmem:[#allocation9 + $0x58] sm:$0xff]  ;;  %vm6380_vm11 = vmmov %vm6376_vm1  ;;  %v6383_v27 = vld [vmem:[#allocation17_spill] sm:$0xff] }
 0xdbe   :  { %v4727_v59 = vpop.eup %4726  ;;  %4580 = vmatprep.subr.bf16.mxu1 %v6339_v29  ;;  %vm6381_vm2 = vmmov %vm6376_vm1 }
 0xdc0   :  { %4582 = vmatpush3.bf16.msra.mxu1 %v4581_v25  ;;  %v6384_v25 = vld [vmem:[#allocation18_spill] sm:$0xff] }
 0xdc1   :  { %2301 = vperm.xlu0 %4649, %v2290_v7   ;;  %4648 = vset.pattern.permute.xlu1 %v4876_v51  ;;  %v3539_v7 = vld [vmem:[#allocation9 + $0x60] sm:$0xff] }
 0xdc2   :  { %2363 = vperm.xlu1 %4648, %v2358_v54   ;;  %4583 = vmatprep.subr.bf16.mxu1 %v6339_v29  ;;  %v3540_v54 = vld [vmem:[#allocation9 + $0x68] sm:$0xff] }
 0xdc3   :  { %v4572_v18 = vpack.c.bf16 %v3540_v54, %v3539_v7 }
 0xdc4   :  { %4585 = vmatpush3.bf16.msra.mxu1 %v4584_v3  ;;  %v6386_v3 = vld [vmem:[#allocation19_spill] sm:$0xff] }
 0xdc5   :  { %3420 = vperm.xlu0 %4649, %v3413_v36   ;;  %4586 = vmatprep.subr.bf16.mxu1 %v6339_v29  ;;  %v3541_v36 = vld [vmem:[#allocation9 + $0x70] sm:$0xff] }
 0xdc6   :  { %2369 = vperm.xlu1 %4648, %v2360_v15   ;;  %v4729_v60 = vpop.eup %4728  ;;  %v4587_v15 = vpack.c.bf16 %v3534_v57, %v3533_v32  ;;  %v4575_v41 = vpack.c.bf16 %v3542_v20, %v3541_v36 }
 0xdc8   :  { %4588 = vmatpush3.bf16.msra.mxu1 %v4587_v15 }
 0xdc9   :  { %4651 = vset.pattern.permute.xlu0 %v4876_v51 }
 0xdca   :  { %3488 = vperm.xlu0 %4651, %v3483_v56   ;;  %2372 = vperm.xlu1 %4648, %v2361_v45  }
 0xdce   :  { %3497 = vperm.xlu0 %4651, %v3486_v61   ;;  %4650 = vset.pattern.permute.xlu1 %v6373_v40 }
 0xdcf   :  { %2295 = vperm.xlu1 %4650, %v2288_v1  }
 0xdd2   :  { %4654 = vset.pattern.permute.xlu0 %v6373_v40 }
 0xdd3   :  { %2327 = vperm.xlu0 %4654, %v2325_v9   ;;  %2298 = vperm.xlu1 %4650, %v2289_v21  }
 0xdd7   :  { %1148 = vperm.xlu0 %4654, %v4727_v59   ;;  %1201 = vperm.xlu1 %4650, %v1199_v43  }
 0xddb   :  { %3417 = vperm.xlu1 %4650, %v3412_v55  }
 0xddf   :  { %3423 = vperm.xlu1 %4650, %v3414_v50  }
 0xde3   :  { %4652 = vset.pattern.permute.xlu1 %v4876_v51 }
 0xde4   :  { %3491 = vperm.xlu1 %4652, %v3484_v30  }
 0xde8   :  { %3494 = vperm.xlu1 %4652, %v3485_v38  }
 0xdec   :  { %4653 = vset.pattern.permute.xlu1 %v6373_v40 }
 0xded   :  { %3426 = vperm.xlu1 %4653, %v3415_v2  }
 0xdf8   :  { %v3321_v62 = vpop.f32.mrb[32].mxu0 }
 0xdf9   :  { %v3325_v52 = vmax.f32 %v3321_v62, 1.0  ;;  %vm3449_vm13 = vcmp.gt.f32.partialorder %v3321_v62, 0.5  ;;  %v4335_v24 = vpop.f32.mrb[33].mxu0 }
 0xdfa   :  { %v3450_v58 = vsel %vm3449_vm13, 1, %v6373_v40  ;;  %v3537_v40 = vld [vmem:[#allocation9 + $0x50] sm:$0xff]  ;;  %vm6382_vm13 = vmmov %vm6376_vm1 }
 0xdfb   :  { %4730 = vrcp.f32 %v3325_v52  ;;  %3452 = vperm.xlu1 %4653, %v3450_v58   ;;  %v4569_v46 = vpack.c.bf16 %v3538_v0, %v3537_v40 }
 0xdfd   :  { %4570 = vmatpush3.bf16.msra.mxu0 %v4569_v46 }
 0xdfe   :  { %4571 = vmatprep.subr.bf16.mxu0 %v6339_v29 }
 0xdff   :  { %2274 = vperm.xlu1 %4653, %v4729_v60  }
 0xe01   :  { %4573 = vmatpush3.bf16.msra.mxu0 %v4572_v18 }
 0xe02   :  { %4574 = vmatprep.subr.bf16.mxu0 %v6339_v29 }
 0xe05   :  { %v4731_v34 = vpop.eup %4730  ;;  %4576 = vmatpush3.bf16.msra.mxu0 %v4575_v41 }
 0xe06   :  { %3399 = vperm.xlu0 %4654, %v4731_v34  }
 0xe0a   :  { %4655 = vset.pattern.permute.xlu0 %v4876_v51 }
 0xe2b   :  { %v1242_v22 = vpop.permute.xlu0 %1241  ;;  %v1239_v56 = vpop.permute.xlu1 %1238 }
 0xe2c   :  { %vm1250_vm14 = vcmp.eq.s32.totalorder %v1242_v22, 1  ;;  %vm1249_vm5 = vcmp.eq.s32.totalorder %v1239_v56, 1 }
 0xe2d   :  { %v1254_v9 = vsel %vm1250_vm14, %v5349_v35, -1e+30  ;;  %v1253_v21 = vsel %vm1249_vm5, %v5352_v37, -1e+30 }
 0xe2e   :  { %v1258_v59 = vsel %vm6376_vm1, %v1254_v9, -inf  ;;  %v1257_v43 = vsel %vm6377_vm3, %v1253_v21, -inf  ;;  %vm6387_vm3 = vmmov %vm6376_vm1 }
 0xe2f   :  { %v2367_v45 = vpop.permute.xlu0 %2366  ;;  %v1245_v26 = vpop.permute.xlu1 %1244  ;;  %v1261_v50 = vmax.f32 %v1257_v43, %v1258_v59 }
 0xe30   :  { %vm1251_vm10 = vcmp.eq.s32.totalorder %v1245_v26, 1  ;;  %vm2375_vm5 = vcmp.eq.s32.totalorder %v2367_v45, 1 }
 0xe31   :  { %v1255_v44 = vsel %vm1251_vm10, %v5366_v42, -1e+30  ;;  %v2379_v16 = vsel %vm2375_vm5, %v6383_v27, -1e+30  ;;  %vm1207_vm5 = vcmask 516096  }
 0xe32   :  { %v1259_v55 = vsel %vm6378_vm6, %v1255_v44, -inf  ;;  %v2383_v54 = vsel %vm6376_vm1, %v2379_v16, -inf  ;;  %vm6388_vm6 = vmmov %vm6376_vm1 }
 0xe33   :  { %v1248_v61 = vpop.permute.xlu1 %1247 }
 0xe34   :  { %vm1252_vm8 = vcmp.eq.s32.totalorder %v1248_v61, 1  ;;  %v1167_v1 = vpop.permute.xlu0 %1166 }
 0xe35   :  { %v1256_v51 = vsel %vm1252_vm8, %v5363_v28, -1e+30  ;;  %vm1177_vm0 = vcmp.eq.s32.totalorder %v1167_v1, 1  ;;  %vm6385_vm8 = vmmov %vm6376_vm1 }
 0xe36   :  { %v1260_v29 = vsel %vm6375_vm12, %v1256_v51, -inf  ;;  %v1181_v14 = vsel %vm1177_vm0, %v5352_v37, -1e+30 }
 0xe37   :  { %v1262_v19 = vmax.f32 %v1259_v55, %v1260_v29  ;;  %v1185_v52 = vsel %vm6380_vm11, %v1181_v14, -inf  ;;  %vm6390_vm11 = vmmov %vm6376_vm1  ;;  %v1205_v14 = vld [vmem:[#allocation2] sm:$0x1] }
 0xe38   :  { %v1176_v49 = vpop.permute.xlu0 %1175  ;;  %v1170_v5 = vpop.permute.xlu1 %1169 }
 0xe39   :  { %vm1180_vm9 = vcmp.eq.s32.totalorder %v1176_v49, 1  ;;  %vm1178_vm15 = vcmp.eq.s32.totalorder %v1170_v5, 1  ;;  %v1263_v2 = vmax.f32 %v1261_v50, %v1262_v19 }
 0xe3a   :  { %v1182_v39 = vsel %vm1178_vm15, %v5349_v35, -1e+30  ;;  %v1184_v30 = vsel %vm1180_vm9, %v5363_v28, -1e+30 }
 0xe3b   :  { %v1186_v38 = vsel %vm6379_vm7, %v1182_v39, -inf  ;;  %v1188_v24 = vsel %vm6381_vm2, %v1184_v30, -inf  ;;  %v1264_v37 = vrot.slane %v1263_v2, 4  ;;  %vm6389_vm7 = vmmov %vm6376_vm1 }
 0xe3c   :  { %v1173_v31 = vpop.permute.xlu1 %1172  ;;  %v2293_v6 = vpop.permute.xlu0 %2292  ;;  %v1189_v35 = vmax.f32 %v1185_v52, %v1186_v38  ;;  %vm6391_vm2 = vmmov %vm6376_vm1 }
 0xe3d   :  { %vm1179_vm4 = vcmp.eq.s32.totalorder %v1173_v31, 1  ;;  %v1265_v33 = vmax.f32 %v1263_v2, %v1264_v37  ;;  %vm2303_vm0 = vcmp.eq.s32.totalorder %v2293_v6, 1  ;;  %v1271_v6 = vld [vmem:[#allocation2 + $0x1] sm:$0x1] }
 0xe3e   :  { %v1183_v62 = vsel %vm1179_vm4, %v5366_v42, -1e+30  ;;  %v2307_v61 = vsel %vm2303_vm0, %v5683_v8, -1e+30 }
 0xe3f   :  { %v1187_v58 = vsel %vm6382_vm13, %v1183_v62, -inf  ;;  %v1266_v34 = vrot.slane %v1265_v33, 2  ;;  %v2311_v43 = vsel %vm6390_vm11, %v2307_v61, -inf  ;;  %vm6392_vm13 = vmmov %vm6376_vm1 }
 0xe40   :  { %v1190_v63 = vmax.f32 %v1187_v58, %v1188_v24  ;;  %v2302_v60 = vpop.permute.xlu0 %2301  ;;  %vm6396_vm11 = vmmov %vm6391_vm2 }
 0xe41   :  { %v2364_v47 = vpop.permute.xlu1 %2363  ;;  %v1267_v41 = vmax.f32 %v1265_v33, %v1266_v34  ;;  %vm2306_vm9 = vcmp.eq.s32.totalorder %v2302_v60, 1 }
 0xe42   :  { %v1191_v11 = vmax.f32 %v1189_v35, %v1190_v63  ;;  %vm2374_vm14 = vcmp.eq.s32.totalorder %v2364_v47, 1  ;;  %v2310_v1 = vsel %vm2306_vm9, %v6386_v3, -1e+30 }
 0xe43   :  { %v2378_v42 = vsel %vm2374_vm14, %v5683_v8, -1e+30  ;;  %v1268_v51 = vrot.slane %v1267_v41, 1  ;;  %v2314_v49 = vsel %vm6391_vm2, %v2310_v1, -inf }
 0xe44   :  { %v1192_v28 = vrot.slane %v1191_v11, 4  ;;  %v2382_v10 = vsel %vm6385_vm8, %v2378_v42, -inf  ;;  %v6112_v46 = vpop.permute.xlu0 %3420 }
 0xe45   :  { %v2370_v17 = vpop.permute.xlu1 %2369  ;;  %v2386_v57 = vmax.f32 %v2382_v10, %v2383_v54  ;;  %v1269_v30 = vmax.f32 %v1267_v41, %v1268_v51  ;;  %vm3429_vm9 = vcmp.eq.s32.totalorder %v6112_v46, 1 }
 0xe46   :  { %vm2376_vm10 = vcmp.eq.s32.totalorder %v2370_v17, 1  ;;  %v1193_v23 = vmax.f32 %v1191_v11, %v1192_v28 }
 0xe47   :  { %v2380_v40 = vsel %vm2376_vm10, %v6384_v25, -1e+30 }
 0xe48   :  { %v1194_v48 = vrot.slane %v1193_v23, 2  ;;  %v2384_v18 = vsel %vm6387_vm3, %v2380_v40, -inf }
 0xe49   :  { %v2373_v0 = vpop.permute.xlu1 %2372  ;;  %v3489_v56 = vpop.permute.xlu0 %3488 }
 0xe4a   :  { %vm2377_vm12 = vcmp.eq.s32.totalorder %v2373_v0, 1  ;;  %v1195_v20 = vmax.f32 %v1193_v23, %v1194_v48  ;;  %vm3499_vm8 = vcmp.eq.s32.totalorder %v3489_v56, 1 }
 0xe4b   :  { %v2381_v7 = vsel %vm2377_vm12, %v6386_v3, -1e+30 }
 0xe4c   :  { %v2385_v32 = vsel %vm6388_vm6, %v2381_v7, -inf  ;;  %v1196_v21 = vrot.slane %v1195_v20, 1  ;;  %v3503_v7 = vsel %vm3499_vm8, %v5967_v13, -1e+30  ;;  %vm6393_vm6 = vmmov %vm6391_vm2 }
 0xe4d   :  { %v2387_v36 = vmax.f32 %v2384_v18, %v2385_v32  ;;  %v3498_v19 = vpop.permute.xlu0 %3497  ;;  %vm6399_vm8 = vmmov %vm6391_vm2 }
 0xe4e   :  { %v2296_v15 = vpop.permute.xlu1 %2295  ;;  %v1197_v50 = vmax.f32 %v1195_v20, %v1196_v21  ;;  %vm3502_vm12 = vcmp.eq.s32.totalorder %v3498_v19, 1 }
 0xe4f   :  { %v2388_v22 = vmax.f32 %v2386_v57, %v2387_v36  ;;  %vm2304_vm15 = vcmp.eq.s32.totalorder %v2296_v15, 1  ;;  %v3506_v54 = vsel %vm3502_vm12, %v5976_v4, -1e+30 }
 0xe50   :  { %v2308_v45 = vsel %vm2304_vm15, %v6383_v27, -1e+30 }
 0xe51   :  { %v2389_v26 = vrot.slane %v2388_v22, 4  ;;  %v2312_v44 = vsel %vm6389_vm7, %v2308_v45, -inf  ;;  %vm6394_vm7 = vmmov %vm6391_vm2 }
 0xe52   :  { %v2299_v9 = vpop.permute.xlu1 %2298  ;;  %v2315_v8 = vmax.f32 %v2311_v43, %v2312_v44  ;;  %v2328_v11 = vpop.permute.xlu0 %2327  ;;  %v3507_v15 = vsel %vm6394_vm7, %v3503_v7, -inf }
 0xe53   :  { %v2390_v29 = vmax.f32 %v2388_v22, %v2389_v26  ;;  %vm2305_vm4 = vcmp.eq.s32.totalorder %v2299_v9, 1  ;;  %vm2329_vm10 = vcmp.eq.s32.totalorder %v2328_v11, 1  ;;  %v3433_v26 = vsel %vm3429_vm9, %v5964_v12, -1e+30 }
 0xe54   :  { %v2309_v59 = vsel %vm2305_vm4, %v6384_v25, -1e+30  ;;  %vm6395_vm4 = vmmov %vm6391_vm2 }
 0xe55   :  { %v2391_v5 = vrot.slane %v2390_v29, 2  ;;  %v2313_v55 = vsel %vm6392_vm13, %v2309_v59, -inf  ;;  %v3510_v20 = vsel %vm6395_vm4, %v3506_v54, -inf }
 0xe56   :  { %v2316_v39 = vmax.f32 %v2313_v55, %v2314_v49  ;;  %v1202_v31 = vpop.permute.xlu1 %1201 }
 0xe57   :  { %v2392_v38 = vmax.f32 %v2390_v29, %v2391_v5  ;;  %vm1203_vm14 = vcmp.eq.s32.totalorder %v1202_v31, 1 }
 0xe58   :  { %v2317_v2 = vmax.f32 %v2315_v8, %v2316_v39  ;;  %v1204_v62 = vsel %vm1203_vm14, %v1197_v50, 0.0  ;;  %v1270_v52 = vsel %vm1203_vm14, %v1269_v30, 0.0  ;;  %vm6397_vm14 = vmmov %vm6391_vm2  ;;  %v1149_v30 = vpop.permute.xlu0 %1148 }
 0xe59   :  { %v2393_v24 = vrot.slane %v2392_v38, 1  ;;  %v1206_v58 = vadd.f32 %v1205_v14, %v1204_v62  ;;  %v1273_v35 = vrot.slane %v1270_v52, 1  ;;  %v3437_v51 = vsel %vm6397_vm14, %v3433_v26, -inf }
 0xe5a   :  { %v2318_v63 = vrot.slane %v2317_v2, 4  ;;  %v3418_v47 = vpop.permute.xlu1 %3417 }
 0xe5b   :  { %1208 = vst.msk [vmem:[#allocation2] sm:$0x1] %vm1207_vm5, %v1206_v58  ;;  %v1275_v37 = vadd.f32 %v1273_v35, %v1271_v6  ;;  %v2394_v28 = vmax.f32 %v2392_v38, %v2393_v24  ;;  %vm3428_vm3 = vcmp.eq.s32.totalorder %v3418_v47, 1  ;;  %v6400_v58 = vld [vmem:[#allocation16_spill] sm:$0xff] }
 0xe5c   :  { %v2319_v60 = vmax.f32 %v2317_v2, %v2318_v63  ;;  %v3432_v41 = vsel %vm3428_vm3, %v5967_v13, -1e+30  ;;  %v1151_v35 = vmul.f32 %v1149_v30, %v6400_v58  ;;  %v6401_v47 = vld [vmem:[#allocation20_spill] sm:$0xff] }
 0xe5d   :  { %1276 = vst.msk [vmem:[#allocation2 + $0x1] sm:$0x1] %vm1207_vm5, %v1275_v37  ;;  %v2395_v33 = vsel %vm2329_vm10, %v2394_v28, 0.0  ;;  %v3436_v1 = vsel %vm6391_vm2, %v3432_v41, -inf }
 0xe5e   :  { %v2320_v17 = vrot.slane %v2319_v60, 2  ;;  %v3424_v23 = vpop.permute.xlu1 %3423  ;;  %v2398_v16 = vrot.slane %v2395_v33, 1  ;;  %v3440_v59 = vmax.f32 %v3436_v1, %v3437_v51 }
 0xe5f   :  { %vm3430_vm15 = vcmp.eq.s32.totalorder %v3424_v23, 1 }
 0xe60   :  { %v2321_v42 = vmax.f32 %v2319_v60, %v2320_v17  ;;  %v3434_v61 = vsel %vm3430_vm15, %v5972_v53, -1e+30 }
 0xe62   :  { %v2322_v27 = vrot.slane %v2321_v42, 1  ;;  %v2331_v3 = vld [vmem:[#allocation2] sm:$0x1] }
 0xe63   :  { %v3492_v25 = vpop.permute.xlu1 %3491 }
 0xe64   :  { %v2323_v40 = vmax.f32 %v2321_v42, %v2322_v27  ;;  %v2396_v0 = vld [vmem:[#allocation2 + $0x1] sm:$0x1]  ;;  %vm3500_vm1 = vcmp.eq.s32.totalorder %v3492_v25, 1 }
 0xe65   :  { %v2400_v10 = vadd.f32 %v2398_v16, %v2396_v0  ;;  %v3504_v48 = vsel %vm3500_vm1, %v5964_v12, -1e+30  ;;  %vm6402_vm1 = vmmov %vm6391_vm2 }
 0xe66   :  { %v2330_v34 = vsel %vm2329_vm10, %v2323_v40, 0.0  ;;  %v3508_v57 = vsel %vm6393_vm6, %v3504_v48, -inf  ;;  %vm6398_vm10 = vmmov %vm6391_vm2 }
 0xe67   :  { %v2332_v18 = vadd.f32 %v2331_v3, %v2330_v34  ;;  %2401 = vst.msk [vmem:[#allocation2 + $0x1] sm:$0x1] %vm1207_vm5, %v2400_v10  ;;  %v3495_v32 = vpop.permute.xlu1 %3494  ;;  %v3511_v56 = vmax.f32 %v3507_v15, %v3508_v57  ;;  %v3438_v44 = vsel %vm6398_vm10, %v3434_v61, -inf  ;;  %vm6403_vm3 = vmmov %vm6402_vm1  ;;  %v3847_v10 = vld [vmem:[%s6177_s9] ss:$0 sm:$0xff] }
 0xe68   :  { %vm3501_vm0 = vcmp.eq.s32.totalorder %v3495_v32, 1 }
 0xe69   :  { %2333 = vst.msk [vmem:[#allocation2] sm:$0x1] %vm1207_vm5, %v2332_v18  ;;  %v3505_v36 = vsel %vm3501_vm0, %v5972_v53, -1e+30 }
 0xe6a   :  { %v3509_v22 = vsel %vm6396_vm11, %v3505_v36, -inf }
 0xe6b   :  { %v3512_v45 = vmax.f32 %v3509_v22, %v3510_v20 }
 0xe6c   :  { %v3427_v46 = vpop.permute.xlu1 %3426 }
 0xe6d   :  { %v3513_v9 = vmax.f32 %v3511_v56, %v3512_v45  ;;  %vm3431_vm13 = vcmp.eq.s32.totalorder %v3427_v46, 1 }
 0xe6e   :  { %v3435_v21 = vsel %vm3431_vm13, %v5976_v4, -1e+30  ;;  %v3521_v62 = vld [vmem:[#allocation2 + $0x1] sm:$0x1] }
 0xe6f   :  { %v3514_v13 = vrot.slane %v3513_v9, 4  ;;  %v3439_v29 = vsel %vm6399_vm8, %v3435_v21, -inf }
 0xe70   :  { %v3441_v43 = vmax.f32 %v3438_v44, %v3439_v29  ;;  %v3456_v28 = vld [vmem:[#allocation2] sm:$0x1] }
 0xe71   :  { %v3515_v49 = vmax.f32 %v3513_v9, %v3514_v13 }
 0xe72   :  { %v3442_v12 = vmax.f32 %v3440_v59, %v3441_v43 }
 0xe73   :  { %v3516_v5 = vrot.slane %v3515_v49, 2 }
 0xe74   :  { %v3443_v53 = vrot.slane %v3442_v12, 4 }
 0xe75   :  { %v3517_v55 = vmax.f32 %v3515_v49, %v3516_v5 }
 0xe76   :  { %v3444_v19 = vmax.f32 %v3442_v12, %v3443_v53 }
 0xe77   :  { %v3518_v8 = vrot.slane %v3517_v55, 1 }
 0xe78   :  { %v3445_v39 = vrot.slane %v3444_v19, 2 }
 0xe79   :  { %v3519_v50 = vmax.f32 %v3517_v55, %v3518_v8 }
 0xe7a   :  { %v3446_v14 = vmax.f32 %v3444_v19, %v3445_v39  ;;  %v3453_v4 = vpop.permute.xlu1 %3452 }
 0xe7b   :  { %vm3454_vm12 = vcmp.eq.s32.totalorder %v3453_v4, 1 }
 0xe7c   :  { %v3447_v31 = vrot.slane %v3446_v14, 1  ;;  %v3520_v38 = vsel %vm3454_vm12, %v3519_v50, 0.0 }
 0xe7d   :  { %v3523_v2 = vrot.slane %v3520_v38, 1 }
 0xe7e   :  { %v3448_v6 = vmax.f32 %v3446_v14, %v3447_v31  ;;  %v2275_v52 = vpop.permute.xlu1 %2274  ;;  %v3393_v24 = vpop.f32.mrb[44].mxu1 }
 0xe7f   :  { %v3525_v63 = vadd.f32 %v3523_v2, %v3521_v62  ;;  %v2277_v37 = vmul.f32 %v2275_v52, %v6401_v47  ;;  %v4346_v11 = vpop.f32.mrb[45].mxu1 }
 0xe80   :  { %v3455_v60 = vsel %vm3454_vm12, %v3448_v6, 0.0 }
 0xe81   :  { %v3457_v17 = vadd.f32 %v3456_v28, %v3455_v60  ;;  %3526 = vst.msk [vmem:[#allocation2 + $0x1] sm:$0x1] %vm1207_vm5, %v3525_v63  ;;  %v2278_v23 = vadd.f32 %v2277_v37, %v1151_v35 }
 0xe83   :  { %3458 = vst.msk [vmem:[#allocation2] sm:$0x1] %vm1207_vm5, %v3457_v17 }
 0xe85   :  { %v3400_v33 = vpop.permute.xlu0 %3399 }
 0xe86   :  { %v3402_v42 = vmul.f32 %v3400_v33, %v3393_v24 }
 0xe88   :  { %v3403_v27 = vadd.f32 %v3402_v42, %v2278_v23 }
 0xe8a   :  { %4383 = vmatmul.mubr.msk.f32.vlgmr.msra.gmra.mrb[46].mxu1 %vm6402_vm1, %v3403_v27  ;;  %v3543_v16 = vld [vmem:[#allocation2] sm:$0x3] }
 0xe8b   :  { %4364 = vmatmul.mubr.msk.f32.vlgmr.msra.gmra.mrb[34].mxu0 %vm6403_vm3, %v3543_v16 }
 0xf5d   :  { %v3686_v25 = vpop.f32.mrb[46].mxu1 }
 0xf5e   :  { %v4384_v40 = vpop.f32.mrb[47].mxu1  ;;  %v3613_v0 = vpop.f32.mrb[34].mxu0 }
 0xf5f   :  { %v3687_v48 = vadd.f32 %v3686_v25, %v3613_v0  ;;  %v4365_v34 = vpop.f32.mrb[35].mxu0 }
 0xf61   :  { %v3697_v3 = vadd.f32 %v3847_v10, %v3687_v48 }
 0xf63   :  { %3698 = vst [vmem:[#allocation11] sm:$0x3] %v3697_v3 }
 0xf64   :  { %4845 = shalt.err (!%p4842_p8)
}
 0xf65   :  { %s4846_s19 = scalar_lea.hbm %s6178_s10, 32 }
 0xf66   :  { %p4847_p9 = scmp.ne.s32.totalorder %s6178_s10, %s4846_s19  ;;  %p4850_p10 = scmp.lt.u32.totalorder %s4846_s19, %s6178_s10 }
 0xf68   :  { %p4852_p11 = pnand %p4850_p10, %p4847_p9 }
 0xf6a   :  { %4855 = shalt.err (!%p4852_p11)
}
 0xf6b   :  { %3708 = dma.vmem_to_hbm [thread:$0]  %s3706_s17, 32, %s6178_s10, [#allocation5]  }
 0xf6c   :  { %4862 = dma.done.wait [#allocation5], 32  }
 0xf6d   :  { %4863 = vsyncadd [#allocation5], 4294967264 }
 0xf6e   :  { %3712 = vsyncpa [#allocation4], 1 }
 0xf6f   :  { %3713 = vsyncpa [#allocation7], 1 }
 0xf70   :  { %3714 = vsyncpa [#allocation10], 1 }
 0xf71   :  { %3715 = vsyncpa [#allocation5], 1 }

</bundles_post_ra>
